<compile_context>
chip_gen: v7x
topology: tpu7x:2x2x1
jax: 0.10.0
libtpu: 0.0.40
codegen_flags: <defaults>
</compile_context>

<pallas_src>
import jax
import jax.numpy as jnp
import numpy as np
from jax import lax
from jax.experimental import pallas as pl
from jax.experimental.pallas import tpu as pltpu


# ----------------------------------------------------------------------------
# The single fused kernel: conv1+relu -> pool1 -> (BN-folded) conv2+relu ->
# pool2 -> flatten -> fc1+relu -> fc2, for TB images per grid step.
# Activation layout: rows = (image, spatial row), lanes = (spatial col, chan).
# ----------------------------------------------------------------------------
def _digit_cnn_kernel(x_ref, d1_ref, b1_ref, selw1_ref, selh1_ref,
                      c2_ref, b2_ref, rs2_ref, selw2_ref, selh2_ref,
                      rsf_ref, wp1_ref, fb1_ref, w2fc_ref, fb2_ref,
                      out_ref):
    f32 = jnp.float32
    tb = x_ref.shape[0]

    def mm(a, b):
        return jnp.dot(a, b, preferred_element_type=f32)

    # ---- conv1 (1->10, k=5, valid) + bias + ReLU: 5 banded matmuls ----------
    # y1[(b,i), j*10+co] = sum_kh sum_w x[b, i+kh, w] * D1[kh][w, j*10+co]
    y1 = None
    for kh in range(5):
        xs = x_ref[:, kh:kh + 24, :].reshape(tb * 24, 28)   # free reshape (24%8==0)
        t = mm(xs, d1_ref[kh])                              # (tb*24, 240)
        y1 = t if y1 is None else y1 + t
    y1 = jnp.maximum(y1 + b1_ref[...], 0.0)

    # ---- maxpool1 2x2: lane pairs then row pairs, via 0/1 selection matmuls -
    zl = jnp.maximum(mm(y1, selw1_ref[0]), mm(y1, selw1_ref[1]))      # (tb*24, 120)
    p1 = jnp.maximum(mm(selh1_ref[0], zl), mm(selh1_ref[1], zl))      # (tb*12, 120)

    # ---- conv2 (10->20, k=5, BN folded) + bias + ReLU -----------------------
    y2 = None
    for kh in range(5):
        rows = mm(rs2_ref[kh], p1)                          # (tb*8, 120) rows i+kh
        t = mm(rows, c2_ref[kh])                            # (tb*8, 160)
        y2 = t if y2 is None else y2 + t
    y2 = jnp.maximum(y2 + b2_ref[...], 0.0)

    # ---- maxpool2 2x2 -------------------------------------------------------
    zl2 = jnp.maximum(mm(y2, selw2_ref[0]), mm(y2, selw2_ref[1]))     # (tb*8, 80)
    p2 = jnp.maximum(mm(selh2_ref[0], zl2), mm(selh2_ref[1], zl2))    # (tb*4, 80)

    # ---- flatten + fc1 + ReLU (sum over the 4 pooled rows i) + fc2 ----------
    h = None
    for i in range(4):
        rows = mm(rsf_ref[i], p2)                           # (tb, 80) = row i of each image
        t = mm(rows, wp1_ref[i])                            # (tb, 150)
        h = t if h is None else h + t
    h = jnp.maximum(h + fb1_ref[...], 0.0)
    out_ref[...] = mm(h, w2fc_ref[...]) + fb2_ref[...]      # (tb, 10)


# ----------------------------------------------------------------------------
# Host-side (one-time) weight re-layouts and constant selection matrices
# ----------------------------------------------------------------------------
def _band_conv1(w1):
    # D1[kh][w, j*10+co] = w1[co, 0, kh, w-j]  for 0 <= w-j < 5
    wt = jnp.transpose(w1[:, 0], (1, 2, 0))                 # (kh, kw, co)
    w_idx = np.arange(28)[:, None]
    j_idx = np.arange(24)[None, :]
    kw = w_idx - j_idx
    valid = jnp.asarray((kw >= 0) & (kw < 5), jnp.float32)  # (28, 24)
    kw_c = jnp.asarray(np.clip(kw, 0, 4))
    d = jnp.take(wt, kw_c, axis=1)                          # (5, 28, 24, 10)
    d = d * valid[None, :, :, None]
    return d.reshape(5, 28, 240)


def _band_conv2(w2bn):
    # C2[kh][w*10+ci, j*20+co] = w2bn[co, ci, kh, w-j]  for 0 <= w-j < 5
    wt = jnp.transpose(w2bn, (2, 3, 1, 0))                  # (kh, kw, ci, co)
    w_idx = np.arange(12)[:, None]
    j_idx = np.arange(8)[None, :]
    kw = w_idx - j_idx
    valid = jnp.asarray((kw >= 0) & (kw < 5), jnp.float32)  # (12, 8)
    kw_c = jnp.asarray(np.clip(kw, 0, 4))
    d = jnp.take(wt, kw_c, axis=1)                          # (5, 12, 8, 10, 20)
    d = d * valid[None, :, :, None, None]
    d = jnp.transpose(d, (0, 1, 3, 2, 4))                   # (5, 12, 10, 8, 20)
    return d.reshape(5, 120, 160)


def _lane_pool_sel(in_w, n_c):
    # (2, in_w*n_c, (in_w//2)*n_c): picks lane (2*w2+d, c) -> (w2, c)
    out_w = in_w // 2
    s = np.zeros((2, in_w * n_c, out_w * n_c), np.float32)
    for d in range(2):
        for w2 in range(out_w):
            for c in range(n_c):
                s[d, (2 * w2 + d) * n_c + c, w2 * n_c + c] = 1.0
    return jnp.asarray(s)


def _row_pool_sel(tb, in_h):
    # (2, tb*in_h//2, tb*in_h): block-diagonal, picks row (b, 2r+d) -> (b, r)
    out_h = in_h // 2
    s = np.zeros((2, tb * out_h, tb * in_h), np.float32)
    for d in range(2):
        for b in range(tb):
            for r in range(out_h):
                s[d, b * out_h + r, b * in_h + 2 * r + d] = 1.0
    return jnp.asarray(s)


def _row_shift_sel(tb, in_h, out_h, n_shift):
    # (n_shift, tb*out_h, tb*in_h): picks row (b, i+k) -> (b, i)
    s = np.zeros((n_shift, tb * out_h, tb * in_h), np.float32)
    for k in range(n_shift):
        for b in range(tb):
            for i in range(out_h):
                s[k, b * out_h + i, b * in_h + i + k] = 1.0
    return jnp.asarray(s)


def digit_cnn_forward(x, p, tb=8):
    """x: (N, 1, 28, 28) NCHW float; returns (N, 10) logits."""
    f32 = jnp.float32
    assert x.shape[1:] == (1, 28, 28)
    n = x.shape[0]

    x_in = x[:, 0, :, :].astype(f32)                        # (n, 28, 28) — raw image only
    n_pad = -(-n // tb) * tb
    if n_pad != n:
        x_in = jnp.concatenate(
            [x_in, jnp.zeros((n_pad - n, 28, 28), f32)], axis=0)

    # ---- fold BatchNorm (running stats) into conv2 (exact) ------------------
    bn_scale = p["bn_gamma"] / jnp.sqrt(p["bn_var"] + 1e-5)
    bn_shift = p["bn_beta"] - p["bn_mean"] * bn_scale
    w2bn = p["conv2_w"] * bn_scale[None, :, None, None]
    b2eff = p["conv2_b"] + jnp.einsum("oihw,i->o", p["conv2_w"], bn_shift)

    # ---- banded conv weights + bias rows (lane layout (col, channel)) -------
    d1 = _band_conv1(p["conv1_w"])                          # (5, 28, 240)
    c2 = _band_conv2(w2bn)                                  # (5, 120, 160)
    b1row = jnp.tile(p["conv1_b"], 24)[None, :]             # (1, 240)
    b2row = jnp.tile(b2eff, 8)[None, :]                     # (1, 160)

    # ---- constant 0/1 selection matrices (pooling / row shifts / flatten) ---
    selw1 = _lane_pool_sel(24, 10)                          # (2, 240, 120)
    selh1 = _row_pool_sel(tb, 24)                           # (2, tb*12, tb*24)
    rs2 = _row_shift_sel(tb, 12, 8, 5)                      # (5, tb*8,  tb*12)
    selw2 = _lane_pool_sel(8, 20)                           # (2, 160, 80)
    selh2 = _row_pool_sel(tb, 8)                            # (2, tb*4,  tb*8)
    rsf = _row_shift_sel(tb, 4, 1, 4)                       # (4, tb,    tb*4)

    # ---- fc weights: permute fc1 columns from NCHW flatten to (i, (j, c)) ---
    wp1 = (p["fc1_w"].reshape(150, 20, 4, 4)
           .transpose(2, 3, 1, 0).reshape(4, 80, 150))      # (4, 80, 150)
    fb1 = p["fc1_b"][None, :]                               # (1, 150)
    w2fc = p["fc2_w"].T                                     # (150, 10)
    fb2 = p["fc2_b"][None, :]                               # (1, 10)

    args = (x_in, d1, b1row, selw1, selh1, c2, b2row, rs2,
            selw2, selh2, rsf, wp1, fb1, w2fc, fb2)

    def batch_spec(shape):
        nd = len(shape)
        return pl.BlockSpec((tb,) + shape[1:],
                            lambda i, _nd=nd: (i,) + (0,) * (_nd - 1))

    def const_spec(shape):
        nd = len(shape)
        return pl.BlockSpec(shape, lambda i, _nd=nd: (0,) * _nd)

    in_specs = [batch_spec(x_in.shape)] + [const_spec(a.shape) for a in args[1:]]

    out = pl.pallas_call(
        _digit_cnn_kernel,
        grid=(n_pad // tb,),
        in_specs=in_specs,
        out_specs=pl.BlockSpec((tb, 10), lambda i: (i, 0)),
        out_shape=jax.ShapeDtypeStruct((n_pad, 10), f32),
        compiler_params=pltpu.CompilerParams(
            dimension_semantics=("parallel",)),
    )(*args)
    return out[:n]


# ----------------------------------------------------------------------------
# Pure-JAX reference (correctness check against the fused Pallas kernel)
# ----------------------------------------------------------------------------
def reference_forward(x, p):
    dn = ("NCHW", "OIHW", "NCHW")
    y = lax.conv_general_dilated(x, p["conv1_w"], (1, 1), "VALID",
                                 dimension_numbers=dn)
    y = jnp.maximum(y + p["conv1_b"][None, :, None, None], 0.0)
    y = lax.reduce_window(y, -jnp.inf, lax.max, (1, 1, 2, 2), (1, 1, 2, 2), "VALID")
    scale = p["bn_gamma"] / jnp.sqrt(p["bn_var"] + 1e-5)
    y = (y - p["bn_mean"][None, :, None, None]) * scale[None, :, None, None] \
        + p["bn_beta"][None, :, None, None]
    y = lax.conv_general_dilated(y, p["conv2_w"], (1, 1), "VALID",
                                 dimension_numbers=dn)
    y = jnp.maximum(y + p["conv2_b"][None, :, None, None], 0.0)
    y = lax.reduce_window(y, -jnp.inf, lax.max, (1, 1, 2, 2), (1, 1, 2, 2), "VALID")
    lin = y.reshape(-1, 320)
    h = jnp.maximum(lin @ p["fc1_w"].T + p["fc1_b"], 0.0)
    return h @ p["fc2_w"].T + p["fc2_b"]


# ----------------------------------------------------------------------------
# Deterministic parameter init (shapes from DigitCNN.__init__)
# ----------------------------------------------------------------------------
def init_params(key):
    ks = jax.random.split(key, 12)
    f32 = jnp.float32
    return {
        "conv1_w": 0.10 * jax.random.normal(ks[0], (10, 1, 5, 5), f32),
        "conv1_b": 0.10 * jax.random.normal(ks[1], (10,), f32),
        "bn_gamma": 1.0 + 0.10 * jax.random.normal(ks[2], (10,), f32),
        "bn_beta": 0.10 * jax.random.normal(ks[3], (10,), f32),
        "bn_mean": 0.10 * jax.random.normal(ks[4], (10,), f32),
        "bn_var": 0.5 + 0.5 * jnp.abs(jax.random.normal(ks[5], (10,), f32)),
        "conv2_w": 0.05 * jax.random.normal(ks[6], (20, 10, 5, 5), f32),
        "conv2_b": 0.05 * jax.random.normal(ks[7], (20,), f32),
        "fc1_w": 0.05 * jax.random.normal(ks[8], (150, 320), f32),
        "fc1_b": 0.05 * jax.random.normal(ks[9], (150,), f32),
        "fc2_w": 0.10 * jax.random.normal(ks[10], (10, 150), f32),
        "fc2_b": 0.10 * jax.random.normal(ks[11], (10,), f32),
    }


if __name__ == "__main__":
    key = jax.random.PRNGKey(0)
    pkey, xkey = jax.random.split(key)
    params = init_params(pkey)
    # MNIST-sized input forced by Linear(320): 28x28 -> conv/pool -> 20*4*4
    x = jax.random.normal(xkey, (2, 1, 28, 28), jnp.float32)      # NCHW

    out = jax.block_until_ready(digit_cnn_forward(x, params))
    ref = jax.block_until_ready(reference_forward(x, params))
    np.testing.assert_allclose(np.asarray(out), np.asarray(ref), rtol=2e-2, atol=2e-2)
    print("KERNEL_OK")
</pallas_src>

<mosaic_0001>
module attributes {stable_mosaic.version = 11 : i64} {
  func.func @_digit_cnn_kernel(%arg0: i32, %arg1: memref<8x28x28xf32, #tpu.memory_space<vmem>>, %arg2: memref<5x28x240xf32, #tpu.memory_space<vmem>>, %arg3: memref<1x240xf32, #tpu.memory_space<vmem>>, %arg4: memref<2x240x120xf32, #tpu.memory_space<vmem>>, %arg5: memref<2x96x192xf32, #tpu.memory_space<vmem>>, %arg6: memref<5x120x160xf32, #tpu.memory_space<vmem>>, %arg7: memref<1x160xf32, #tpu.memory_space<vmem>>, %arg8: memref<5x64x96xf32, #tpu.memory_space<vmem>>, %arg9: memref<2x160x80xf32, #tpu.memory_space<vmem>>, %arg10: memref<2x32x64xf32, #tpu.memory_space<vmem>>, %arg11: memref<4x8x32xf32, #tpu.memory_space<vmem>>, %arg12: memref<4x80x150xf32, #tpu.memory_space<vmem>>, %arg13: memref<1x150xf32, #tpu.memory_space<vmem>>, %arg14: memref<150x10xf32, #tpu.memory_space<vmem>>, %arg15: memref<1x10xf32, #tpu.memory_space<vmem>>, %arg16: memref<8x10xf32, #tpu.memory_space<vmem>>) attributes {dimension_semantics = [#tpu.dimension_semantics<parallel>], iteration_bounds = array<i64: 1>, scalar_prefetch = 0 : i64, scratch_operands = 0 : i64, tpu.core_type = #tpu.core_type<tc>, window_params = [{transform_indices = @transform_0, window_bounds = array<i64: 8, 28, 28>}, {pipeline_mode = #tpu.pipeline_mode<synchronous>, transform_indices = @transform_1, window_bounds = array<i64: 5, 28, 240>}, {pipeline_mode = #tpu.pipeline_mode<synchronous>, transform_indices = @transform_2, window_bounds = array<i64: 1, 240>}, {pipeline_mode = #tpu.pipeline_mode<synchronous>, transform_indices = @transform_3, window_bounds = array<i64: 2, 240, 120>}, {pipeline_mode = #tpu.pipeline_mode<synchronous>, transform_indices = @transform_4, window_bounds = array<i64: 2, 96, 192>}, {pipeline_mode = #tpu.pipeline_mode<synchronous>, transform_indices = @transform_5, window_bounds = array<i64: 5, 120, 160>}, {pipeline_mode = #tpu.pipeline_mode<synchronous>, transform_indices = @transform_6, window_bounds = array<i64: 1, 160>}, {pipeline_mode = #tpu.pipeline_mode<synchronous>, transform_indices = @transform_7, window_bounds = array<i64: 5, 64, 96>}, {pipeline_mode = #tpu.pipeline_mode<synchronous>, transform_indices = @transform_8, window_bounds = array<i64: 2, 160, 80>}, {pipeline_mode = #tpu.pipeline_mode<synchronous>, transform_indices = @transform_9, window_bounds = array<i64: 2, 32, 64>}, {pipeline_mode = #tpu.pipeline_mode<synchronous>, transform_indices = @transform_10, window_bounds = array<i64: 4, 8, 32>}, {pipeline_mode = #tpu.pipeline_mode<synchronous>, transform_indices = @transform_11, window_bounds = array<i64: 4, 80, 150>}, {pipeline_mode = #tpu.pipeline_mode<synchronous>, transform_indices = @transform_12, window_bounds = array<i64: 1, 150>}, {pipeline_mode = #tpu.pipeline_mode<synchronous>, transform_indices = @transform_13, window_bounds = array<i64: 150, 10>}, {pipeline_mode = #tpu.pipeline_mode<synchronous>, transform_indices = @transform_14, window_bounds = array<i64: 1, 10>}, {transform_indices = @transform_15, window_bounds = array<i64: 8, 10>}]} {
    %c0 = arith.constant 0 : index
    %c0_0 = arith.constant 0 : index
    %c0_1 = arith.constant 0 : index
    %0 = vector.load %arg1[%c0, %c0_0, %c0_1] : memref<8x28x28xf32, #tpu.memory_space<vmem>>, vector<8x24x28xf32>
    %1 = vector.shape_cast %0 : vector<8x24x28xf32> to vector<192x28xf32>
    %c0_2 = arith.constant 0 : index
    %c0_3 = arith.constant 0 : index
    %c0_4 = arith.constant 0 : index
    %2 = vector.load %arg2[%c0_2, %c0_3, %c0_4] : memref<5x28x240xf32, #tpu.memory_space<vmem>>, vector<1x28x240xf32>
    %3 = vector.shape_cast %2 : vector<1x28x240xf32> to vector<28x240xf32>
    %cst = arith.constant dense<0.000000e+00> : vector<192x240xf32>
    %4 = tpu.matmul %1, %3, %cst {dimension_numbers = #tpu.dot_dimension_numbers<[1], [0], [0], [1], [0, 0, 1, 1], [], []>} : vector<192x28xf32>, vector<28x240xf32>, vector<192x240xf32> -> vector<192x240xf32>
    %c0_5 = arith.constant 0 : index
    %c1 = arith.constant 1 : index
    %c0_6 = arith.constant 0 : index
    %5 = vector.load %arg1[%c0_5, %c1, %c0_6] : memref<8x28x28xf32, #tpu.memory_space<vmem>>, vector<8x24x28xf32>
    %6 = vector.shape_cast %5 : vector<8x24x28xf32> to vector<192x28xf32>
    %c1_7 = arith.constant 1 : index
    %c0_8 = arith.constant 0 : index
    %c0_9 = arith.constant 0 : index
    %7 = vector.load %arg2[%c1_7, %c0_8, %c0_9] : memref<5x28x240xf32, #tpu.memory_space<vmem>>, vector<1x28x240xf32>
    %8 = vector.shape_cast %7 : vector<1x28x240xf32> to vector<28x240xf32>
    %cst_10 = arith.constant dense<0.000000e+00> : vector<192x240xf32>
    %9 = tpu.matmul %6, %8, %cst_10 {dimension_numbers = #tpu.dot_dimension_numbers<[1], [0], [0], [1], [0, 0, 1, 1], [], []>} : vector<192x28xf32>, vector<28x240xf32>, vector<192x240xf32> -> vector<192x240xf32>
    %10 = arith.addf %4, %9 : vector<192x240xf32>
    %c0_11 = arith.constant 0 : index
    %c2 = arith.constant 2 : index
    %c0_12 = arith.constant 0 : index
    %11 = vector.load %arg1[%c0_11, %c2, %c0_12] : memref<8x28x28xf32, #tpu.memory_space<vmem>>, vector<8x24x28xf32>
    %12 = vector.shape_cast %11 : vector<8x24x28xf32> to vector<192x28xf32>
    %c2_13 = arith.constant 2 : index
    %c0_14 = arith.constant 0 : index
    %c0_15 = arith.constant 0 : index
    %13 = vector.load %arg2[%c2_13, %c0_14, %c0_15] : memref<5x28x240xf32, #tpu.memory_space<vmem>>, vector<1x28x240xf32>
    %14 = vector.shape_cast %13 : vector<1x28x240xf32> to vector<28x240xf32>
    %cst_16 = arith.constant dense<0.000000e+00> : vector<192x240xf32>
    %15 = tpu.matmul %12, %14, %cst_16 {dimension_numbers = #tpu.dot_dimension_numbers<[1], [0], [0], [1], [0, 0, 1, 1], [], []>} : vector<192x28xf32>, vector<28x240xf32>, vector<192x240xf32> -> vector<192x240xf32>
    %16 = arith.addf %10, %15 : vector<192x240xf32>
    %c0_17 = arith.constant 0 : index
    %c3 = arith.constant 3 : index
    %c0_18 = arith.constant 0 : index
    %17 = vector.load %arg1[%c0_17, %c3, %c0_18] : memref<8x28x28xf32, #tpu.memory_space<vmem>>, vector<8x24x28xf32>
    %18 = vector.shape_cast %17 : vector<8x24x28xf32> to vector<192x28xf32>
    %c3_19 = arith.constant 3 : index
    %c0_20 = arith.constant 0 : index
    %c0_21 = arith.constant 0 : index
    %19 = vector.load %arg2[%c3_19, %c0_20, %c0_21] : memref<5x28x240xf32, #tpu.memory_space<vmem>>, vector<1x28x240xf32>
    %20 = vector.shape_cast %19 : vector<1x28x240xf32> to vector<28x240xf32>
    %cst_22 = arith.constant dense<0.000000e+00> : vector<192x240xf32>
    %21 = tpu.matmul %18, %20, %cst_22 {dimension_numbers = #tpu.dot_dimension_numbers<[1], [0], [0], [1], [0, 0, 1, 1], [], []>} : vector<192x28xf32>, vector<28x240xf32>, vector<192x240xf32> -> vector<192x240xf32>
    %22 = arith.addf %16, %21 : vector<192x240xf32>
    %c0_23 = arith.constant 0 : index
    %c4 = arith.constant 4 : index
    %c0_24 = arith.constant 0 : index
    %23 = vector.load %arg1[%c0_23, %c4, %c0_24] : memref<8x28x28xf32, #tpu.memory_space<vmem>>, vector<8x24x28xf32>
    %24 = vector.shape_cast %23 : vector<8x24x28xf32> to vector<192x28xf32>
    %c4_25 = arith.constant 4 : index
    %c0_26 = arith.constant 0 : index
    %c0_27 = arith.constant 0 : index
    %25 = vector.load %arg2[%c4_25, %c0_26, %c0_27] : memref<5x28x240xf32, #tpu.memory_space<vmem>>, vector<1x28x240xf32>
    %26 = vector.shape_cast %25 : vector<1x28x240xf32> to vector<28x240xf32>
    %cst_28 = arith.constant dense<0.000000e+00> : vector<192x240xf32>
    %27 = tpu.matmul %24, %26, %cst_28 {dimension_numbers = #tpu.dot_dimension_numbers<[1], [0], [0], [1], [0, 0, 1, 1], [], []>} : vector<192x28xf32>, vector<28x240xf32>, vector<192x240xf32> -> vector<192x240xf32>
    %28 = arith.addf %22, %27 : vector<192x240xf32>
    %c0_29 = arith.constant 0 : index
    %c0_30 = arith.constant 0 : index
    %29 = vector.load %arg3[%c0_29, %c0_30] : memref<1x240xf32, #tpu.memory_space<vmem>>, vector<1x240xf32>
    %30 = vector.broadcast %29 : vector<1x240xf32> to vector<192x240xf32>
    %31 = arith.addf %28, %30 : vector<192x240xf32>
    %cst_31 = arith.constant 0.000000e+00 : f32
    %32 = vector.broadcast %cst_31 : f32 to vector<192x240xf32>
    %33 = arith.maximumf %31, %32 : vector<192x240xf32>
    %c0_32 = arith.constant 0 : index
    %c0_33 = arith.constant 0 : index
    %c0_34 = arith.constant 0 : index
    %34 = vector.load %arg4[%c0_32, %c0_33, %c0_34] : memref<2x240x120xf32, #tpu.memory_space<vmem>>, vector<1x240x120xf32>
    %35 = vector.shape_cast %34 : vector<1x240x120xf32> to vector<240x120xf32>
    %cst_35 = arith.constant dense<0.000000e+00> : vector<192x120xf32>
    %36 = tpu.matmul %33, %35, %cst_35 {dimension_numbers = #tpu.dot_dimension_numbers<[1], [0], [0], [1], [0, 0, 1, 1], [], []>} : vector<192x240xf32>, vector<240x120xf32>, vector<192x120xf32> -> vector<192x120xf32>
    %c1_36 = arith.constant 1 : index
    %c0_37 = arith.constant 0 : index
    %c0_38 = arith.constant 0 : index
    %37 = vector.load %arg4[%c1_36, %c0_37, %c0_38] : memref<2x240x120xf32, #tpu.memory_space<vmem>>, vector<1x240x120xf32>
    %38 = vector.shape_cast %37 : vector<1x240x120xf32> to vector<240x120xf32>
    %cst_39 = arith.constant dense<0.000000e+00> : vector<192x120xf32>
    %39 = tpu.matmul %33, %38, %cst_39 {dimension_numbers = #tpu.dot_dimension_numbers<[1], [0], [0], [1], [0, 0, 1, 1], [], []>} : vector<192x240xf32>, vector<240x120xf32>, vector<192x120xf32> -> vector<192x120xf32>
    %40 = arith.maximumf %36, %39 : vector<192x120xf32>
    %c0_40 = arith.constant 0 : index
    %c0_41 = arith.constant 0 : index
    %c0_42 = arith.constant 0 : index
    %41 = vector.load %arg5[%c0_40, %c0_41, %c0_42] : memref<2x96x192xf32, #tpu.memory_space<vmem>>, vector<1x96x192xf32>
    %42 = vector.shape_cast %41 : vector<1x96x192xf32> to vector<96x192xf32>
    %cst_43 = arith.constant dense<0.000000e+00> : vector<96x120xf32>
    %43 = tpu.matmul %42, %40, %cst_43 {dimension_numbers = #tpu.dot_dimension_numbers<[1], [0], [0], [1], [0, 0, 1, 1], [], []>} : vector<96x192xf32>, vector<192x120xf32>, vector<96x120xf32> -> vector<96x120xf32>
    %c1_44 = arith.constant 1 : index
    %c0_45 = arith.constant 0 : index
    %c0_46 = arith.constant 0 : index
    %44 = vector.load %arg5[%c1_44, %c0_45, %c0_46] : memref<2x96x192xf32, #tpu.memory_space<vmem>>, vector<1x96x192xf32>
    %45 = vector.shape_cast %44 : vector<1x96x192xf32> to vector<96x192xf32>
    %cst_47 = arith.constant dense<0.000000e+00> : vector<96x120xf32>
    %46 = tpu.matmul %45, %40, %cst_47 {dimension_numbers = #tpu.dot_dimension_numbers<[1], [0], [0], [1], [0, 0, 1, 1], [], []>} : vector<96x192xf32>, vector<192x120xf32>, vector<96x120xf32> -> vector<96x120xf32>
    %47 = arith.maximumf %43, %46 : vector<96x120xf32>
    %c0_48 = arith.constant 0 : index
    %c0_49 = arith.constant 0 : index
    %c0_50 = arith.constant 0 : index
    %48 = vector.load %arg8[%c0_48, %c0_49, %c0_50] : memref<5x64x96xf32, #tpu.memory_space<vmem>>, vector<1x64x96xf32>
    %49 = vector.shape_cast %48 : vector<1x64x96xf32> to vector<64x96xf32>
    %cst_51 = arith.constant dense<0.000000e+00> : vector<64x120xf32>
    %50 = tpu.matmul %49, %47, %cst_51 {dimension_numbers = #tpu.dot_dimension_numbers<[1], [0], [0], [1], [0, 0, 1, 1], [], []>} : vector<64x96xf32>, vector<96x120xf32>, vector<64x120xf32> -> vector<64x120xf32>
    %c0_52 = arith.constant 0 : index
    %c0_53 = arith.constant 0 : index
    %c0_54 = arith.constant 0 : index
    %51 = vector.load %arg6[%c0_52, %c0_53, %c0_54] : memref<5x120x160xf32, #tpu.memory_space<vmem>>, vector<1x120x160xf32>
    %52 = vector.shape_cast %51 : vector<1x120x160xf32> to vector<120x160xf32>
    %cst_55 = arith.constant dense<0.000000e+00> : vector<64x160xf32>
    %53 = tpu.matmul %50, %52, %cst_55 {dimension_numbers = #tpu.dot_dimension_numbers<[1], [0], [0], [1], [0, 0, 1, 1], [], []>} : vector<64x120xf32>, vector<120x160xf32>, vector<64x160xf32> -> vector<64x160xf32>
    %c1_56 = arith.constant 1 : index
    %c0_57 = arith.constant 0 : index
    %c0_58 = arith.constant 0 : index
    %54 = vector.load %arg8[%c1_56, %c0_57, %c0_58] : memref<5x64x96xf32, #tpu.memory_space<vmem>>, vector<1x64x96xf32>
    %55 = vector.shape_cast %54 : vector<1x64x96xf32> to vector<64x96xf32>
    %cst_59 = arith.constant dense<0.000000e+00> : vector<64x120xf32>
    %56 = tpu.matmul %55, %47, %cst_59 {dimension_numbers = #tpu.dot_dimension_numbers<[1], [0], [0], [1], [0, 0, 1, 1], [], []>} : vector<64x96xf32>, vector<96x120xf32>, vector<64x120xf32> -> vector<64x120xf32>
    %c1_60 = arith.constant 1 : index
    %c0_61 = arith.constant 0 : index
    %c0_62 = arith.constant 0 : index
    %57 = vector.load %arg6[%c1_60, %c0_61, %c0_62] : memref<5x120x160xf32, #tpu.memory_space<vmem>>, vector<1x120x160xf32>
    %58 = vector.shape_cast %57 : vector<1x120x160xf32> to vector<120x160xf32>
    %cst_63 = arith.constant dense<0.000000e+00> : vector<64x160xf32>
    %59 = tpu.matmul %56, %58, %cst_63 {dimension_numbers = #tpu.dot_dimension_numbers<[1], [0], [0], [1], [0, 0, 1, 1], [], []>} : vector<64x120xf32>, vector<120x160xf32>, vector<64x160xf32> -> vector<64x160xf32>
    %60 = arith.addf %53, %59 : vector<64x160xf32>
    %c2_64 = arith.constant 2 : index
    %c0_65 = arith.constant 0 : index
    %c0_66 = arith.constant 0 : index
    %61 = vector.load %arg8[%c2_64, %c0_65, %c0_66] : memref<5x64x96xf32, #tpu.memory_space<vmem>>, vector<1x64x96xf32>
    %62 = vector.shape_cast %61 : vector<1x64x96xf32> to vector<64x96xf32>
    %cst_67 = arith.constant dense<0.000000e+00> : vector<64x120xf32>
    %63 = tpu.matmul %62, %47, %cst_67 {dimension_numbers = #tpu.dot_dimension_numbers<[1], [0], [0], [1], [0, 0, 1, 1], [], []>} : vector<64x96xf32>, vector<96x120xf32>, vector<64x120xf32> -> vector<64x120xf32>
    %c2_68 = arith.constant 2 : index
    %c0_69 = arith.constant 0 : index
    %c0_70 = arith.constant 0 : index
    %64 = vector.load %arg6[%c2_68, %c0_69, %c0_70] : memref<5x120x160xf32, #tpu.memory_space<vmem>>, vector<1x120x160xf32>
    %65 = vector.shape_cast %64 : vector<1x120x160xf32> to vector<120x160xf32>
    %cst_71 = arith.constant dense<0.000000e+00> : vector<64x160xf32>
    %66 = tpu.matmul %63, %65, %cst_71 {dimension_numbers = #tpu.dot_dimension_numbers<[1], [0], [0], [1], [0, 0, 1, 1], [], []>} : vector<64x120xf32>, vector<120x160xf32>, vector<64x160xf32> -> vector<64x160xf32>
    %67 = arith.addf %60, %66 : vector<64x160xf32>
    %c3_72 = arith.constant 3 : index
    %c0_73 = arith.constant 0 : index
    %c0_74 = arith.constant 0 : index
    %68 = vector.load %arg8[%c3_72, %c0_73, %c0_74] : memref<5x64x96xf32, #tpu.memory_space<vmem>>, vector<1x64x96xf32>
    %69 = vector.shape_cast %68 : vector<1x64x96xf32> to vector<64x96xf32>
    %cst_75 = arith.constant dense<0.000000e+00> : vector<64x120xf32>
    %70 = tpu.matmul %69, %47, %cst_75 {dimension_numbers = #tpu.dot_dimension_numbers<[1], [0], [0], [1], [0, 0, 1, 1], [], []>} : vector<64x96xf32>, vector<96x120xf32>, vector<64x120xf32> -> vector<64x120xf32>
    %c3_76 = arith.constant 3 : index
    %c0_77 = arith.constant 0 : index
    %c0_78 = arith.constant 0 : index
    %71 = vector.load %arg6[%c3_76, %c0_77, %c0_78] : memref<5x120x160xf32, #tpu.memory_space<vmem>>, vector<1x120x160xf32>
    %72 = vector.shape_cast %71 : vector<1x120x160xf32> to vector<120x160xf32>
    %cst_79 = arith.constant dense<0.000000e+00> : vector<64x160xf32>
    %73 = tpu.matmul %70, %72, %cst_79 {dimension_numbers = #tpu.dot_dimension_numbers<[1], [0], [0], [1], [0, 0, 1, 1], [], []>} : vector<64x120xf32>, vector<120x160xf32>, vector<64x160xf32> -> vector<64x160xf32>
    %74 = arith.addf %67, %73 : vector<64x160xf32>
    %c4_80 = arith.constant 4 : index
    %c0_81 = arith.constant 0 : index
    %c0_82 = arith.constant 0 : index
    %75 = vector.load %arg8[%c4_80, %c0_81, %c0_82] : memref<5x64x96xf32, #tpu.memory_space<vmem>>, vector<1x64x96xf32>
    %76 = vector.shape_cast %75 : vector<1x64x96xf32> to vector<64x96xf32>
    %cst_83 = arith.constant dense<0.000000e+00> : vector<64x120xf32>
    %77 = tpu.matmul %76, %47, %cst_83 {dimension_numbers = #tpu.dot_dimension_numbers<[1], [0], [0], [1], [0, 0, 1, 1], [], []>} : vector<64x96xf32>, vector<96x120xf32>, vector<64x120xf32> -> vector<64x120xf32>
    %c4_84 = arith.constant 4 : index
    %c0_85 = arith.constant 0 : index
    %c0_86 = arith.constant 0 : index
    %78 = vector.load %arg6[%c4_84, %c0_85, %c0_86] : memref<5x120x160xf32, #tpu.memory_space<vmem>>, vector<1x120x160xf32>
    %79 = vector.shape_cast %78 : vector<1x120x160xf32> to vector<120x160xf32>
    %cst_87 = arith.constant dense<0.000000e+00> : vector<64x160xf32>
    %80 = tpu.matmul %77, %79, %cst_87 {dimension_numbers = #tpu.dot_dimension_numbers<[1], [0], [0], [1], [0, 0, 1, 1], [], []>} : vector<64x120xf32>, vector<120x160xf32>, vector<64x160xf32> -> vector<64x160xf32>
    %81 = arith.addf %74, %80 : vector<64x160xf32>
    %c0_88 = arith.constant 0 : index
    %c0_89 = arith.constant 0 : index
    %82 = vector.load %arg7[%c0_88, %c0_89] : memref<1x160xf32, #tpu.memory_space<vmem>>, vector<1x160xf32>
    %83 = vector.broadcast %82 : vector<1x160xf32> to vector<64x160xf32>
    %84 = arith.addf %81, %83 : vector<64x160xf32>
    %cst_90 = arith.constant 0.000000e+00 : f32
    %85 = vector.broadcast %cst_90 : f32 to vector<64x160xf32>
    %86 = arith.maximumf %84, %85 : vector<64x160xf32>
    %c0_91 = arith.constant 0 : index
    %c0_92 = arith.constant 0 : index
    %c0_93 = arith.constant 0 : index
    %87 = vector.load %arg9[%c0_91, %c0_92, %c0_93] : memref<2x160x80xf32, #tpu.memory_space<vmem>>, vector<1x160x80xf32>
    %88 = vector.shape_cast %87 : vector<1x160x80xf32> to vector<160x80xf32>
    %cst_94 = arith.constant dense<0.000000e+00> : vector<64x80xf32>
    %89 = tpu.matmul %86, %88, %cst_94 {dimension_numbers = #tpu.dot_dimension_numbers<[1], [0], [0], [1], [0, 0, 1, 1], [], []>} : vector<64x160xf32>, vector<160x80xf32>, vector<64x80xf32> -> vector<64x80xf32>
    %c1_95 = arith.constant 1 : index
    %c0_96 = arith.constant 0 : index
    %c0_97 = arith.constant 0 : index
    %90 = vector.load %arg9[%c1_95, %c0_96, %c0_97] : memref<2x160x80xf32, #tpu.memory_space<vmem>>, vector<1x160x80xf32>
    %91 = vector.shape_cast %90 : vector<1x160x80xf32> to vector<160x80xf32>
    %cst_98 = arith.constant dense<0.000000e+00> : vector<64x80xf32>
    %92 = tpu.matmul %86, %91, %cst_98 {dimension_numbers = #tpu.dot_dimension_numbers<[1], [0], [0], [1], [0, 0, 1, 1], [], []>} : vector<64x160xf32>, vector<160x80xf32>, vector<64x80xf32> -> vector<64x80xf32>
    %93 = arith.maximumf %89, %92 : vector<64x80xf32>
    %c0_99 = arith.constant 0 : index
    %c0_100 = arith.constant 0 : index
    %c0_101 = arith.constant 0 : index
    %94 = vector.load %arg10[%c0_99, %c0_100, %c0_101] : memref<2x32x64xf32, #tpu.memory_space<vmem>>, vector<1x32x64xf32>
    %95 = vector.shape_cast %94 : vector<1x32x64xf32> to vector<32x64xf32>
    %cst_102 = arith.constant dense<0.000000e+00> : vector<32x80xf32>
    %96 = tpu.matmul %95, %93, %cst_102 {dimension_numbers = #tpu.dot_dimension_numbers<[1], [0], [0], [1], [0, 0, 1, 1], [], []>} : vector<32x64xf32>, vector<64x80xf32>, vector<32x80xf32> -> vector<32x80xf32>
    %c1_103 = arith.constant 1 : index
    %c0_104 = arith.constant 0 : index
    %c0_105 = arith.constant 0 : index
    %97 = vector.load %arg10[%c1_103, %c0_104, %c0_105] : memref<2x32x64xf32, #tpu.memory_space<vmem>>, vector<1x32x64xf32>
    %98 = vector.shape_cast %97 : vector<1x32x64xf32> to vector<32x64xf32>
    %cst_106 = arith.constant dense<0.000000e+00> : vector<32x80xf32>
    %99 = tpu.matmul %98, %93, %cst_106 {dimension_numbers = #tpu.dot_dimension_numbers<[1], [0], [0], [1], [0, 0, 1, 1], [], []>} : vector<32x64xf32>, vector<64x80xf32>, vector<32x80xf32> -> vector<32x80xf32>
    %100 = arith.maximumf %96, %99 : vector<32x80xf32>
    %c0_107 = arith.constant 0 : index
    %c0_108 = arith.constant 0 : index
    %c0_109 = arith.constant 0 : index
    %101 = vector.load %arg11[%c0_107, %c0_108, %c0_109] : memref<4x8x32xf32, #tpu.memory_space<vmem>>, vector<1x8x32xf32>
    %102 = vector.shape_cast %101 : vector<1x8x32xf32> to vector<8x32xf32>
    %cst_110 = arith.constant dense<0.000000e+00> : vector<8x80xf32>
    %103 = tpu.matmul %102, %100, %cst_110 {dimension_numbers = #tpu.dot_dimension_numbers<[1], [0], [0], [1], [0, 0, 1, 1], [], []>} : vector<8x32xf32>, vector<32x80xf32>, vector<8x80xf32> -> vector<8x80xf32>
    %c0_111 = arith.constant 0 : index
    %c0_112 = arith.constant 0 : index
    %c0_113 = arith.constant 0 : index
    %104 = vector.load %arg12[%c0_111, %c0_112, %c0_113] : memref<4x80x150xf32, #tpu.memory_space<vmem>>, vector<1x80x150xf32>
    %105 = vector.shape_cast %104 : vector<1x80x150xf32> to vector<80x150xf32>
    %cst_114 = arith.constant dense<0.000000e+00> : vector<8x150xf32>
    %106 = tpu.matmul %103, %105, %cst_114 {dimension_numbers = #tpu.dot_dimension_numbers<[1], [0], [0], [1], [0, 0, 1, 1], [], []>} : vector<8x80xf32>, vector<80x150xf32>, vector<8x150xf32> -> vector<8x150xf32>
    %c1_115 = arith.constant 1 : index
    %c0_116 = arith.constant 0 : index
    %c0_117 = arith.constant 0 : index
    %107 = vector.load %arg11[%c1_115, %c0_116, %c0_117] : memref<4x8x32xf32, #tpu.memory_space<vmem>>, vector<1x8x32xf32>
    %108 = vector.shape_cast %107 : vector<1x8x32xf32> to vector<8x32xf32>
    %cst_118 = arith.constant dense<0.000000e+00> : vector<8x80xf32>
    %109 = tpu.matmul %108, %100, %cst_118 {dimension_numbers = #tpu.dot_dimension_numbers<[1], [0], [0], [1], [0, 0, 1, 1], [], []>} : vector<8x32xf32>, vector<32x80xf32>, vector<8x80xf32> -> vector<8x80xf32>
    %c1_119 = arith.constant 1 : index
    %c0_120 = arith.constant 0 : index
    %c0_121 = arith.constant 0 : index
    %110 = vector.load %arg12[%c1_119, %c0_120, %c0_121] : memref<4x80x150xf32, #tpu.memory_space<vmem>>, vector<1x80x150xf32>
    %111 = vector.shape_cast %110 : vector<1x80x150xf32> to vector<80x150xf32>
    %cst_122 = arith.constant dense<0.000000e+00> : vector<8x150xf32>
    %112 = tpu.matmul %109, %111, %cst_122 {dimension_numbers = #tpu.dot_dimension_numbers<[1], [0], [0], [1], [0, 0, 1, 1], [], []>} : vector<8x80xf32>, vector<80x150xf32>, vector<8x150xf32> -> vector<8x150xf32>
    %113 = arith.addf %106, %112 : vector<8x150xf32>
    %c2_123 = arith.constant 2 : index
    %c0_124 = arith.constant 0 : index
    %c0_125 = arith.constant 0 : index
    %114 = vector.load %arg11[%c2_123, %c0_124, %c0_125] : memref<4x8x32xf32, #tpu.memory_space<vmem>>, vector<1x8x32xf32>
    %115 = vector.shape_cast %114 : vector<1x8x32xf32> to vector<8x32xf32>
    %cst_126 = arith.constant dense<0.000000e+00> : vector<8x80xf32>
    %116 = tpu.matmul %115, %100, %cst_126 {dimension_numbers = #tpu.dot_dimension_numbers<[1], [0], [0], [1], [0, 0, 1, 1], [], []>} : vector<8x32xf32>, vector<32x80xf32>, vector<8x80xf32> -> vector<8x80xf32>
    %c2_127 = arith.constant 2 : index
    %c0_128 = arith.constant 0 : index
    %c0_129 = arith.constant 0 : index
    %117 = vector.load %arg12[%c2_127, %c0_128, %c0_129] : memref<4x80x150xf32, #tpu.memory_space<vmem>>, vector<1x80x150xf32>
    %118 = vector.shape_cast %117 : vector<1x80x150xf32> to vector<80x150xf32>
    %cst_130 = arith.constant dense<0.000000e+00> : vector<8x150xf32>
    %119 = tpu.matmul %116, %118, %cst_130 {dimension_numbers = #tpu.dot_dimension_numbers<[1], [0], [0], [1], [0, 0, 1, 1], [], []>} : vector<8x80xf32>, vector<80x150xf32>, vector<8x150xf32> -> vector<8x150xf32>
    %120 = arith.addf %113, %119 : vector<8x150xf32>
    %c3_131 = arith.constant 3 : index
    %c0_132 = arith.constant 0 : index
    %c0_133 = arith.constant 0 : index
    %121 = vector.load %arg11[%c3_131, %c0_132, %c0_133] : memref<4x8x32xf32, #tpu.memory_space<vmem>>, vector<1x8x32xf32>
    %122 = vector.shape_cast %121 : vector<1x8x32xf32> to vector<8x32xf32>
    %cst_134 = arith.constant dense<0.000000e+00> : vector<8x80xf32>
    %123 = tpu.matmul %122, %100, %cst_134 {dimension_numbers = #tpu.dot_dimension_numbers<[1], [0], [0], [1], [0, 0, 1, 1], [], []>} : vector<8x32xf32>, vector<32x80xf32>, vector<8x80xf32> -> vector<8x80xf32>
    %c3_135 = arith.constant 3 : index
    %c0_136 = arith.constant 0 : index
    %c0_137 = arith.constant 0 : index
    %124 = vector.load %arg12[%c3_135, %c0_136, %c0_137] : memref<4x80x150xf32, #tpu.memory_space<vmem>>, vector<1x80x150xf32>
    %125 = vector.shape_cast %124 : vector<1x80x150xf32> to vector<80x150xf32>
    %cst_138 = arith.constant dense<0.000000e+00> : vector<8x150xf32>
    %126 = tpu.matmul %123, %125, %cst_138 {dimension_numbers = #tpu.dot_dimension_numbers<[1], [0], [0], [1], [0, 0, 1, 1], [], []>} : vector<8x80xf32>, vector<80x150xf32>, vector<8x150xf32> -> vector<8x150xf32>
    %127 = arith.addf %120, %126 : vector<8x150xf32>
    %c0_139 = arith.constant 0 : index
    %c0_140 = arith.constant 0 : index
    %128 = vector.load %arg13[%c0_139, %c0_140] : memref<1x150xf32, #tpu.memory_space<vmem>>, vector<1x150xf32>
    %129 = vector.broadcast %128 : vector<1x150xf32> to vector<8x150xf32>
    %130 = arith.addf %127, %129 : vector<8x150xf32>
    %cst_141 = arith.constant 0.000000e+00 : f32
    %131 = vector.broadcast %cst_141 : f32 to vector<8x150xf32>
    %132 = arith.maximumf %130, %131 : vector<8x150xf32>
    %c0_142 = arith.constant 0 : index
    %c0_143 = arith.constant 0 : index
    %133 = vector.load %arg14[%c0_142, %c0_143] : memref<150x10xf32, #tpu.memory_space<vmem>>, vector<150x10xf32>
    %cst_144 = arith.constant dense<0.000000e+00> : vector<8x10xf32>
    %134 = tpu.matmul %132, %133, %cst_144 {dimension_numbers = #tpu.dot_dimension_numbers<[1], [0], [0], [1], [0, 0, 1, 1], [], []>} : vector<8x150xf32>, vector<150x10xf32>, vector<8x10xf32> -> vector<8x10xf32>
    %c0_145 = arith.constant 0 : index
    %c0_146 = arith.constant 0 : index
    %135 = vector.load %arg15[%c0_145, %c0_146] : memref<1x10xf32, #tpu.memory_space<vmem>>, vector<1x10xf32>
    %136 = vector.broadcast %135 : vector<1x10xf32> to vector<8x10xf32>
    %137 = arith.addf %134, %136 : vector<8x10xf32>
    %c0_147 = arith.constant 0 : index
    %c0_148 = arith.constant 0 : index
    %138 = vector.load %arg16[%c0_147, %c0_148] : memref<8x10xf32, #tpu.memory_space<vmem>>, vector<8x10xf32>
    tpu.vector_store %arg16[%c0_147, %c0_148], %137 {strides = array<i32>} : memref<8x10xf32, #tpu.memory_space<vmem>>, vector<8x10xf32>,
    return
  }
  func.func @transform_0(%arg0: i32) -> (i32, i32, i32) {
    %c0_i32 = arith.constant 0 : i32
    %c0_i32_0 = arith.constant 0 : i32
    %c0_i32_1 = arith.constant 0 : i32
    return %arg0, %c0_i32, %c0_i32_0 : i32, i32, i32
  }
  func.func @transform_1(%arg0: i32) -> (i32, i32, i32) {
    %c0_i32 = arith.constant 0 : i32
    %c0_i32_0 = arith.constant 0 : i32
    %c0_i32_1 = arith.constant 0 : i32
    %c0_i32_2 = arith.constant 0 : i32
    return %c0_i32, %c0_i32_0, %c0_i32_1 : i32, i32, i32
  }
  func.func @transform_2(%arg0: i32) -> (i32, i32) {
    %c0_i32 = arith.constant 0 : i32
    %c0_i32_0 = arith.constant 0 : i32
    %c0_i32_1 = arith.constant 0 : i32
    return %c0_i32, %c0_i32_0 : i32, i32
  }
  func.func @transform_3(%arg0: i32) -> (i32, i32, i32) {
    %c0_i32 = arith.constant 0 : i32
    %c0_i32_0 = arith.constant 0 : i32
    %c0_i32_1 = arith.constant 0 : i32
    %c0_i32_2 = arith.constant 0 : i32
    return %c0_i32, %c0_i32_0, %c0_i32_1 : i32, i32, i32
  }
  func.func @transform_4(%arg0: i32) -> (i32, i32, i32) {
    %c0_i32 = arith.constant 0 : i32
    %c0_i32_0 = arith.constant 0 : i32
    %c0_i32_1 = arith.constant 0 : i32
    %c0_i32_2 = arith.constant 0 : i32
    return %c0_i32, %c0_i32_0, %c0_i32_1 : i32, i32, i32
  }
  func.func @transform_5(%arg0: i32) -> (i32, i32, i32) {
    %c0_i32 = arith.constant 0 : i32
    %c0_i32_0 = arith.constant 0 : i32
    %c0_i32_1 = arith.constant 0 : i32
    %c0_i32_2 = arith.constant 0 : i32
    return %c0_i32, %c0_i32_0, %c0_i32_1 : i32, i32, i32
  }
  func.func @transform_6(%arg0: i32) -> (i32, i32) {
    %c0_i32 = arith.constant 0 : i32
    %c0_i32_0 = arith.constant 0 : i32
    %c0_i32_1 = arith.constant 0 : i32
    return %c0_i32, %c0_i32_0 : i32, i32
  }
  func.func @transform_7(%arg0: i32) -> (i32, i32, i32) {
    %c0_i32 = arith.constant 0 : i32
    %c0_i32_0 = arith.constant 0 : i32
    %c0_i32_1 = arith.constant 0 : i32
    %c0_i32_2 = arith.constant 0 : i32
    return %c0_i32, %c0_i32_0, %c0_i32_1 : i32, i32, i32
  }
  func.func @transform_8(%arg0: i32) -> (i32, i32, i32) {
    %c0_i32 = arith.constant 0 : i32
    %c0_i32_0 = arith.constant 0 : i32
    %c0_i32_1 = arith.constant 0 : i32
    %c0_i32_2 = arith.constant 0 : i32
    return %c0_i32, %c0_i32_0, %c0_i32_1 : i32, i32, i32
  }
  func.func @transform_9(%arg0: i32) -> (i32, i32, i32) {
    %c0_i32 = arith.constant 0 : i32
    %c0_i32_0 = arith.constant 0 : i32
    %c0_i32_1 = arith.constant 0 : i32
    %c0_i32_2 = arith.constant 0 : i32
    return %c0_i32, %c0_i32_0, %c0_i32_1 : i32, i32, i32
  }
  func.func @transform_10(%arg0: i32) -> (i32, i32, i32) {
    %c0_i32 = arith.constant 0 : i32
    %c0_i32_0 = arith.constant 0 : i32
    %c0_i32_1 = arith.constant 0 : i32
    %c0_i32_2 = arith.constant 0 : i32
    return %c0_i32, %c0_i32_0, %c0_i32_1 : i32, i32, i32
  }
  func.func @transform_11(%arg0: i32) -> (i32, i32, i32) {
    %c0_i32 = arith.constant 0 : i32
    %c0_i32_0 = arith.constant 0 : i32
    %c0_i32_1 = arith.constant 0 : i32
    %c0_i32_2 = arith.constant 0 : i32
    return %c0_i32, %c0_i32_0, %c0_i32_1 : i32, i32, i32
  }
  func.func @transform_12(%arg0: i32) -> (i32, i32) {
    %c0_i32 = arith.constant 0 : i32
    %c0_i32_0 = arith.constant 0 : i32
    %c0_i32_1 = arith.constant 0 : i32
    return %c0_i32, %c0_i32_0 : i32, i32
  }
  func.func @transform_13(%arg0: i32) -> (i32, i32) {
    %c0_i32 = arith.constant 0 : i32
    %c0_i32_0 = arith.constant 0 : i32
    %c0_i32_1 = arith.constant 0 : i32
    return %c0_i32, %c0_i32_0 : i32, i32
  }
  func.func @transform_14(%arg0: i32) -> (i32, i32) {
    %c0_i32 = arith.constant 0 : i32
    %c0_i32_0 = arith.constant 0 : i32
    %c0_i32_1 = arith.constant 0 : i32
    return %c0_i32, %c0_i32_0 : i32, i32
  }
  func.func @transform_15(%arg0: i32) -> (i32, i32) {
    %c0_i32 = arith.constant 0 : i32
    %c0_i32_0 = arith.constant 0 : i32
    return %arg0, %c0_i32 : i32, i32
  }
}

</mosaic_0001>

<bundles_post_ra>
// kernel: tpu_custom_call.1
= control target key start
LH: loop header
LB: loop body
LE: loop exit
PB: predicated region body
PF: predicated region fallthrough
CT: control target
= control target key end

     0   :  { %vm189_vm0 = vcmask 1043456   ;;  %v11050_v7 = vmov 0.0   ;;  %vm7789_vm1 = vmmov 1   ;;  %vm116_vm3 = vcmask 228352   ;;  %s11034_s0 = inlined_call_operand.vmem [shape: f32[8,28,28], index: 0, kind: input, shape index: {}]   ;;  %s11035_s1 = inlined_call_operand.vmem [shape: f32[5,28,240], index: 1, kind: input, shape index: {}]   ;;  %s11036_s2 = inlined_call_operand.vmem [shape: f32[1,240], index: 2, kind: input, shape index: {}]   ;;  %s11037_s3 = inlined_call_operand.vmem [shape: f32[2,240,120], index: 3, kind: input, shape index: {}]   ;;  %s11038_s4 = inlined_call_operand.vmem [shape: f32[2,96,192], index: 4, kind: input, shape index: {}]   ;;  %s11039_s5 = inlined_call_operand.vmem [shape: f32[5,120,160], index: 5, kind: input, shape index: {}]   ;;  %s11040_s6 = inlined_call_operand.vmem [shape: f32[1,160], index: 6, kind: input, shape index: {}]   ;;  %s11041_s7 = inlined_call_operand.vmem [shape: f32[5,64,96], index: 7, kind: input, shape index: {}]   ;;  %s11042_s8 = inlined_call_operand.vmem [shape: f32[2,160,80], index: 8, kind: input, shape index: {}]   ;;  %s11043_s9 = inlined_call_operand.vmem [shape: f32[2,32,64], index: 9, kind: input, shape index: {}]   ;;  %s11044_s10 = inlined_call_operand.vmem [shape: f32[4,8,32], index: 10, kind: input, shape index: {}]   ;;  %s11045_s11 = inlined_call_operand.vmem [shape: f32[4,80,150], index: 11, kind: input, shape index: {}]   ;;  %s11046_s12 = inlined_call_operand.vmem [shape: f32[1,150], index: 12, kind: input, shape index: {}]   ;;  %s11047_s13 = inlined_call_operand.vmem [shape: f32[150,10], index: 13, kind: input, shape index: {}]   ;;  %s11048_s14 = inlined_call_operand.vmem [shape: f32[1,10], index: 14, kind: input, shape index: {}]   ;;  %s11049_s15 = inlined_call_operand.hbm [shape: f32[8,10], index: 15, kind: output, shape index: {}]  }
   0x1   :  { %v5749_v0 = vld [vmem:[%s11035_s1 + $0x48] sm:$0xff]  ;;  %v5751_v1 = vld [vmem:[%s11035_s1 + $0x58] sm:$0xff]  ;;  %v5748_v2 = vld [vmem:[%s11035_s1 + $0x40] sm:$0xff]  ;;  %260 = vmatprep.mubr.f32.mxu0 %v11050_v7 }
   0x2   :  { %v6802_v3 = vpack.c.bf16 %v5751_v1, %v5749_v0  ;;  %v5750_v4 = vld [vmem:[%s11035_s1 + $0x50] sm:$0xff]  ;;  %v5753_v5 = vld [vmem:[%s11035_s1 + $0x68] sm:$0xff]  ;;  %v5755_v6 = vld [vmem:[%s11035_s1 + $0x78] sm:$0xf] }
   0x3   :  { %v6804_v8 = vpack.c.bf16 %v5750_v4, %v5748_v2  ;;  %v6806_v9 = vpack.c.bf16 %v5755_v6, %v5753_v5  ;;  %vm7892_vm2 = vmpackc.low %vm189_vm0, %vm7789_vm1  ;;  %v5752_v11 = vld [vmem:[%s11035_s1 + $0x60] sm:$0xff]  ;;  %v5754_v12 = vld [vmem:[%s11035_s1 + $0x70] sm:$0xf] }
   0x4   :  { %6803 = vmatprep.subr.bf16.mxu0 %v6802_v3  ;;  %v76_v13 = vld [vmem:[%s11035_s1 + $0x8] sm:$0xff]  ;;  %v6809_v14 = vpack.c.bf16 %v5754_v12, %v5752_v11  ;;  %v78_v15 = vld [vmem:[%s11035_s1 + $0x18] sm:$0xff]  ;;  %v75_v17 = vld [vmem:[%s11035_s1] sm:$0xff] }
   0x5   :  { %6805 = vmatpush1.bf16.msra.mxu0 %v6804_v8  ;;  %v6812_v16 = vpack.c.bf16 %v78_v15, %v76_v13  ;;  %v77_v18 = vld [vmem:[%s11035_s1 + $0x10] sm:$0xff]  ;;  %v83_v19 = vld [vmem:[%s11034_s0 + $0x1] sm:$0xff]  ;;  %v82_v22 = vld [vmem:[%s11035_s1 + $0x38] sm:$0xf] }
   0x6   :  { %6808 = vmatprep.subr.msk.bf16.mxu0 %vm7892_vm2, %v6806_v9  ;;  %v6814_v20 = vpack.c.bf16 %v77_v18, %v75_v17  ;;  %v80_v21 = vld [vmem:[%s11035_s1 + $0x28] sm:$0xff]  ;;  %v79_v23 = vld [vmem:[%s11035_s1 + $0x20] sm:$0xff]  ;;  %v81_v25 = vld [vmem:[%s11035_s1 + $0x30] sm:$0xf] }
   0x7   :  { %v6816_v24 = vpack.c.bf16 %v82_v22, %v80_v21  ;;  %v84_v26 = vld [vmem:[%s11034_s0 + $0x9] sm:$0xff]  ;;  %v6819_v27 = vpack.c.bf16 %v81_v25, %v79_v23  ;;  %v5811_v29 = vld [vmem:[%s11035_s1 + $0x98] sm:$0xff] }
   0x8   :  { %v5809_v28 = vld [vmem:[%s11035_s1 + $0x88] sm:$0xff]  ;;  %v85_v31 = vld [vmem:[%s11034_s0 + $0x11] sm:$0xff] }
   0x9   :  { %6811 = vmatpush1.bf16.msk.msra.mxu0 %vm7892_vm2, %v6809_v14  ;;  %v6822_v30 = vpack.c.bf16 %v5811_v29, %v5809_v28 }
   0xa   :  { %6813 = vmatprep.subr.bf16.mxu0 %v6812_v16 }
   0xc   :  { %5758 = vmatmul.mubr.msk.f32.vlgmr.msra.gmra.mrb[0].mxu0 %vm116_vm3, %v83_v19 }
   0xd   :  { %266 = vmatprep.mubr.f32.mxu0 %v11050_v7  ;;  %6815 = vmatpush1.bf16.msra.mxu0 %v6814_v20 }
   0xe   :  { %6818 = vmatprep.subr.msk.bf16.mxu0 %vm7892_vm2, %v6816_v24 }
  0x10   :  { %5759 = vmatmul.mubr.msk.f32.gmra.mrb[2].mxu0 %vm116_vm3, %v84_v26 }
  0x11   :  { %272 = vmatprep.mubr.f32.mxu0 %v11050_v7  ;;  %6821 = vmatpush1.bf16.msk.msra.mxu0 %vm7892_vm2, %v6819_v27 }
  0x12   :  { %6823 = vmatprep.subr.bf16.mxu0 %v6822_v30 }
  0x13   :  { %20 = vsyncpa [#allocation3], 0  ;;  %v86_v32 = vld [vmem:[%s11034_s0 + $0x21] sm:$0xff]  ;;  %v87_v33 = vld [vmem:[%s11034_s0 + $0x29] sm:$0xff]  ;;  %vm1934_vm4 = vcmask 916480   ;;  %vm2456_vm5 = vcmask 523264  }
  0x14   :  { %5760 = vmatmul.mubr.msk.f32.gmra.mrb[4].mxu0 %vm116_vm3, %v85_v31  ;;  %v88_v34 = vld [vmem:[%s11034_s0 + $0x31] sm:$0xff]  ;;  %v89_v35 = vld [vmem:[%s11034_s0 + $0x41] sm:$0xff]  ;;  %v90_v36 = vld [vmem:[%s11034_s0 + $0x49] sm:$0xff]  ;;  %vm2824_vm6 = vcmask 785408   ;;  %vm3153_vm7 = vcmask 982016   ;;  %vm4458_vm8 = vcmask 261120  }
  0x15   :  { %278 = vmatprep.mubr.f32.mxu0 %v11050_v7  ;;  %v91_v37 = vld [vmem:[%s11034_s0 + $0x51] sm:$0xff]  ;;  %v92_v38 = vld [vmem:[%s11034_s0 + $0x61] sm:$0xff]  ;;  %v93_v39 = vld [vmem:[%s11034_s0 + $0x69] sm:$0xff]  ;;  %vm7791_vm9 = vmmov 0   ;;  %vm5119_vm10 = vcmask 654336   ;;  %vm5658_vm11 = vcmask 1045504  }
  0x16   :  { %v94_v40 = vld [vmem:[%s11034_s0 + $0x71] sm:$0xff]  ;;  %v95_v41 = vld [vmem:[%s11034_s0 + $0x81] sm:$0xff]  ;;  %v96_v42 = vld [vmem:[%s11034_s0 + $0x89] sm:$0xff]  ;;  %vm5654_vm12 = vcmask 179200   ;;  %s7792_s20 = smov [#allocation2]   ;;  %vm5732_vm13 = vcmask 80896  }
  0x17   :  { %v97_v43 = vld [vmem:[%s11034_s0 + $0x91] sm:$0xff]  ;;  %v98_v44 = vld [vmem:[%s11034_s0 + $0xa1] sm:$0xff]  ;;  %v99_v45 = vld [vmem:[%s11034_s0 + $0xa9] sm:$0xff] }
  0x18   :  { %5761 = vmatmul.mubr.msk.f32.gmra.mrb[6].mxu0 %vm116_vm3, %v86_v32  ;;  %v100_v46 = vld [vmem:[%s11034_s0 + $0xb1] sm:$0xff]  ;;  %v101_v47 = vld [vmem:[%s11034_s0 + $0xc1] sm:$0xff]  ;;  %v102_v48 = vld [vmem:[%s11034_s0 + $0xc9] sm:$0xff] }
  0x19   :  { %284 = vmatprep.mubr.f32.mxu0 %v11050_v7  ;;  %v103_v49 = vld [vmem:[%s11034_s0 + $0xd1] sm:$0xff]  ;;  %v104_v50 = vld [vmem:[%s11034_s0 + $0xe1] sm:$0xff]  ;;  %v105_v51 = vld [vmem:[%s11034_s0 + $0xe9] sm:$0xff] }
  0x1a   :  { %v106_v52 = vld [vmem:[%s11034_s0 + $0xf1] sm:$0xff]  ;;  %v5808_v53 = vld [vmem:[%s11035_s1 + $0x80] sm:$0xff]  ;;  %v5813_v55 = vld [vmem:[%s11035_s1 + $0xa8] sm:$0xff] }
  0x1b   :  { %v5810_v54 = vld [vmem:[%s11035_s1 + $0x90] sm:$0xff]  ;;  %v5815_v56 = vld [vmem:[%s11035_s1 + $0xb8] sm:$0xf]  ;;  %v51_v57 = vld [vmem:[%s11034_s0] sm:$0xff] }
  0x1c   :  { %5762 = vmatmul.mubr.msk.f32.gmra.mrb[8].mxu0 %vm116_vm3, %v87_v33  ;;  %v6824_v58 = vpack.c.bf16 %v5810_v54, %v5808_v53  ;;  %v6826_v59 = vpack.c.bf16 %v5815_v56, %v5813_v55  ;;  %v5812_v60 = vld [vmem:[%s11035_s1 + $0xa0] sm:$0xff]  ;;  %v5814_v61 = vld [vmem:[%s11035_s1 + $0xb0] sm:$0xf]  ;;  %v5843_v62 = vld [vmem:[%s11035_s1 + $0xc8] sm:$0xff] }
  0x1d   :  { %290 = vmatprep.mubr.f32.mxu0 %v11050_v7  ;;  %v5845_v63 = vld [vmem:[%s11035_s1 + $0xd8] sm:$0xff]  ;;  %v52_v0 = vld [vmem:[%s11034_s0 + $0x8] sm:$0xff]  ;;  %v6829_v1 = vpack.c.bf16 %v5814_v61, %v5812_v60  ;;  %v53_v3 = vld [vmem:[%s11034_s0 + $0x10] sm:$0xff] }
  0x1e   :  { %v6832_v2 = vpack.c.bf16 %v5845_v63, %v5843_v62  ;;  %v54_v4 = vld [vmem:[%s11034_s0 + $0x20] sm:$0xff]  ;;  %v55_v5 = vld [vmem:[%s11034_s0 + $0x28] sm:$0xff]  ;;  %v56_v6 = vld [vmem:[%s11034_s0 + $0x30] sm:$0xff] }
  0x1f   :  { %v57_v8 = vld [vmem:[%s11034_s0 + $0x40] sm:$0xff]  ;;  %v58_v9 = vld [vmem:[%s11034_s0 + $0x48] sm:$0xff]  ;;  %v59_v11 = vld [vmem:[%s11034_s0 + $0x50] sm:$0xff] }
  0x20   :  { %5763 = vmatmul.mubr.msk.f32.gmra.mrb[10].mxu0 %vm116_vm3, %v88_v34  ;;  %v60_v12 = vld [vmem:[%s11034_s0 + $0x60] sm:$0xff]  ;;  %v61_v13 = vld [vmem:[%s11034_s0 + $0x68] sm:$0xff]  ;;  %v62_v14 = vld [vmem:[%s11034_s0 + $0x70] sm:$0xff] }
  0x21   :  { %296 = vmatprep.mubr.f32.mxu0 %v11050_v7  ;;  %v63_v15 = vld [vmem:[%s11034_s0 + $0x80] sm:$0xff]  ;;  %v64_v16 = vld [vmem:[%s11034_s0 + $0x88] sm:$0xff]  ;;  %v65_v17 = vld [vmem:[%s11034_s0 + $0x90] sm:$0xff] }
  0x22   :  { %v66_v18 = vld [vmem:[%s11034_s0 + $0xa0] sm:$0xff]  ;;  %v67_v19 = vld [vmem:[%s11034_s0 + $0xa8] sm:$0xff]  ;;  %v68_v20 = vld [vmem:[%s11034_s0 + $0xb0] sm:$0xff] }
  0x23   :  { %v69_v21 = vld [vmem:[%s11034_s0 + $0xc0] sm:$0xff]  ;;  %v70_v22 = vld [vmem:[%s11034_s0 + $0xc8] sm:$0xff]  ;;  %v71_v23 = vld [vmem:[%s11034_s0 + $0xd0] sm:$0xff] }
  0x24   :  { %5764 = vmatmul.mubr.msk.f32.gmra.mrb[12].mxu0 %vm116_vm3, %v89_v35  ;;  %v72_v24 = vld [vmem:[%s11034_s0 + $0xe0] sm:$0xff]  ;;  %v73_v25 = vld [vmem:[%s11034_s0 + $0xe8] sm:$0xff]  ;;  %v74_v26 = vld [vmem:[%s11034_s0 + $0xf0] sm:$0xff] }
  0x25   :  { %302 = vmatprep.mubr.f32.mxu0 %v11050_v7  ;;  %v5842_v27 = vld [vmem:[%s11035_s1 + $0xc0] sm:$0xff]  ;;  %v5844_v28 = vld [vmem:[%s11035_s1 + $0xd0] sm:$0xff]  ;;  %v5847_v29 = vld [vmem:[%s11035_s1 + $0xe8] sm:$0xff] }
  0x26   :  { %v5849_v30 = vld [vmem:[%s11035_s1 + $0xf8] sm:$0xf]  ;;  %v692_v31 = vld [vmem:[%s11034_s0 + $0x2] sm:$0xff]  ;;  %v6834_v32 = vpack.c.bf16 %v5844_v28, %v5842_v27  ;;  %v5848_v35 = vld [vmem:[%s11035_s1 + $0xf0] sm:$0xf] }
  0x27   :  { %v6836_v33 = vpack.c.bf16 %v5849_v30, %v5847_v29  ;;  %v5846_v34 = vld [vmem:[%s11035_s1 + $0xe0] sm:$0xff]  ;;  %v706_v53 = vld [vmem:[%s11034_s0 + $0x92] sm:$0xff]  ;;  %v708_v55 = vld [vmem:[%s11034_s0 + $0xaa] sm:$0xff]  ;;  %v11065_v29 = vmov 0.0|0.0  }
  0x28   :  { %5765 = vmatmul.mubr.msk.f32.gmra.mrb[14].mxu0 %vm116_vm3, %v90_v36  ;;  %v5877_v36 = vld [vmem:[%s11035_s1 + $0x108] sm:$0xff]  ;;  %v709_v56 = vld [vmem:[%s11034_s0 + $0xb2] sm:$0xff]  ;;  %v5876_v63 = vld [vmem:[%s11035_s1 + $0x100] sm:$0xff]  ;;  %6852 = vmatprep.subr.bf16.mxu1 %v11065_v29 }
  0x29   :  { %308 = vmatprep.mubr.f32.mxu0 %v11050_v7  ;;  %v707_v54 = vld [vmem:[%s11034_s0 + $0xa2] sm:$0xff]  ;;  %v714_v61 = vld [vmem:[%s11034_s0 + $0xea] sm:$0xff]  ;;  %v715_v62 = vld [vmem:[%s11034_s0 + $0xf2] sm:$0xff] }
  0x2a   :  { %v713_v60 = vld [vmem:[%s11034_s0 + $0xe2] sm:$0xff]  ;;  %v1065_v10 = vld [vmem:[%s11034_s0 + $0x33] sm:$0xff]  ;;  %v1076_v28 = vld [vmem:[%s11034_s0 + $0xab] sm:$0xff] }
  0x2b   :  { %v1906_v27 = vld [vmem:[%s11037_s3 + $0x10] sm:$0xff] }
  0x2c   :  { %5766 = vmatmul.mubr.msk.f32.gmra.mrb[16].mxu0 %vm116_vm3, %v91_v37  ;;  %v5879_v37 = vld [vmem:[%s11035_s1 + $0x118] sm:$0xff] }
  0x2d   :  { %314 = vmatprep.mubr.f32.mxu0 %v11050_v7 }
  0x30   :  { %5767 = vmatmul.mubr.msk.f32.gmra.mrb[18].mxu0 %vm116_vm3, %v92_v38  ;;  %v693_v38 = vld [vmem:[%s11034_s0 + $0xa] sm:$0xff] }
  0x31   :  { %320 = vmatprep.mubr.f32.mxu0 %v11050_v7 }
  0x34   :  { %5768 = vmatmul.mubr.msk.f32.gmra.mrb[20].mxu0 %vm116_vm3, %v93_v39  ;;  %v6839_v39 = vpack.c.bf16 %v5848_v35, %v5846_v34  ;;  %v1909_v34 = vld [vmem:[%s11037_s3 + $0x28] sm:$0xff]  ;;  %v1077_v35 = vld [vmem:[%s11034_s0 + $0xb3] sm:$0xff] }
  0x35   :  { %326 = vmatprep.mubr.f32.mxu0 %v11050_v7 }
  0x38   :  { %5769 = vmatmul.mubr.msk.f32.gmra.mrb[22].mxu0 %vm116_vm3, %v94_v40  ;;  %v6842_v40 = vpack.c.bf16 %v5879_v37, %v5877_v36  ;;  %v1910_v37 = vld [vmem:[%s11037_s3 + $0x30] sm:$0xff] }
  0x39   :  { %332 = vmatprep.mubr.f32.mxu0 %v11050_v7 }
  0x3c   :  { %5770 = vmatmul.mubr.msk.f32.gmra.mrb[24].mxu0 %vm116_vm3, %v95_v41  ;;  %v694_v41 = vld [vmem:[%s11034_s0 + $0x12] sm:$0xff] }
  0x3d   :  { %338 = vmatprep.mubr.f32.mxu0 %v11050_v7 }
  0x40   :  { %5771 = vmatmul.mubr.msk.f32.gmra.mrb[26].mxu0 %vm116_vm3, %v96_v42  ;;  %v695_v42 = vld [vmem:[%s11034_s0 + $0x22] sm:$0xff] }
  0x41   :  { %344 = vmatprep.mubr.f32.mxu0 %v11050_v7 }
  0x44   :  { %5772 = vmatmul.mubr.msk.f32.gmra.mrb[28].mxu0 %vm116_vm3, %v97_v43  ;;  %v696_v43 = vld [vmem:[%s11034_s0 + $0x2a] sm:$0xff] }
  0x45   :  { %350 = vmatprep.mubr.f32.mxu0 %v11050_v7 }
  0x48   :  { %5773 = vmatmul.mubr.msk.f32.gmra.mrb[30].mxu0 %vm116_vm3, %v98_v44  ;;  %v697_v44 = vld [vmem:[%s11034_s0 + $0x32] sm:$0xff] }
  0x49   :  { %356 = vmatprep.mubr.f32.mxu0 %v11050_v7 }
  0x4c   :  { %5774 = vmatmul.mubr.msk.f32.gmra.mrb[32].mxu0 %vm116_vm3, %v99_v45  ;;  %v698_v45 = vld [vmem:[%s11034_s0 + $0x42] sm:$0xff] }
  0x4d   :  { %362 = vmatprep.mubr.f32.mxu0 %v11050_v7 }
  0x50   :  { %5775 = vmatmul.mubr.msk.f32.gmra.mrb[34].mxu0 %vm116_vm3, %v100_v46  ;;  %v699_v46 = vld [vmem:[%s11034_s0 + $0x4a] sm:$0xff] }
  0x51   :  { %368 = vmatprep.mubr.f32.mxu0 %v11050_v7 }
  0x54   :  { %5776 = vmatmul.mubr.msk.f32.gmra.mrb[36].mxu0 %vm116_vm3, %v101_v47  ;;  %v700_v47 = vld [vmem:[%s11034_s0 + $0x52] sm:$0xff] }
  0x55   :  { %374 = vmatprep.mubr.f32.mxu0 %v11050_v7 }
  0x58   :  { %5777 = vmatmul.mubr.msk.f32.gmra.mrb[38].mxu0 %vm116_vm3, %v102_v48  ;;  %v701_v48 = vld [vmem:[%s11034_s0 + $0x62] sm:$0xff] }
  0x59   :  { %380 = vmatprep.mubr.f32.mxu0 %v11050_v7 }
  0x5c   :  { %5778 = vmatmul.mubr.msk.f32.gmra.mrb[40].mxu0 %vm116_vm3, %v103_v49  ;;  %v702_v49 = vld [vmem:[%s11034_s0 + $0x6a] sm:$0xff] }
  0x5d   :  { %386 = vmatprep.mubr.f32.mxu0 %v11050_v7 }
  0x60   :  { %5779 = vmatmul.mubr.msk.f32.gmra.mrb[42].mxu0 %vm116_vm3, %v104_v50  ;;  %v703_v50 = vld [vmem:[%s11034_s0 + $0x72] sm:$0xff] }
  0x61   :  { %392 = vmatprep.mubr.f32.mxu0 %v11050_v7 }
  0x64   :  { %5780 = vmatmul.mubr.msk.f32.gmra.mrb[44].mxu0 %vm116_vm3, %v105_v51  ;;  %v704_v51 = vld [vmem:[%s11034_s0 + $0x82] sm:$0xff] }
  0x65   :  { %398 = vmatprep.mubr.f32.mxu0 %v11050_v7 }
  0x68   :  { %5781 = vmatmul.mubr.msk.f32.gmra.mrb[46].mxu0 %vm116_vm3, %v106_v52  ;;  %v705_v52 = vld [vmem:[%s11034_s0 + $0x8a] sm:$0xff] }
  0x69   :  { %547 = vmatprep.mubr.f32.mxu0 %v11050_v7 }
  0x6c   :  { %5784 = vmatmul.mubr.msk.f32.vlgmr.msra.gmra.mrb[0].mxu0 %vm116_vm3, %v51_v57  ;;  %v710_v57 = vld [vmem:[%s11034_s0 + $0xc2] sm:$0xff] }
  0x6d   :  { %553 = vmatprep.mubr.f32.mxu0 %v11050_v7  ;;  %6825 = vmatpush1.bf16.msra.mxu0 %v6824_v58  ;;  %v711_v58 = vld [vmem:[%s11034_s0 + $0xca] sm:$0xff] }
  0x6e   :  { %6828 = vmatprep.subr.msk.bf16.mxu0 %vm7892_vm2, %v6826_v59  ;;  %v712_v59 = vld [vmem:[%s11034_s0 + $0xd2] sm:$0xff] }
  0x70   :  { %5785 = vmatmul.mubr.msk.f32.gmra.mrb[2].mxu0 %vm116_vm3, %v52_v0  ;;  %v5878_v0 = vld [vmem:[%s11035_s1 + $0x110] sm:$0xff] }
  0x71   :  { %559 = vmatprep.mubr.f32.mxu0 %v11050_v7  ;;  %6831 = vmatpush1.bf16.msk.msra.mxu0 %vm7892_vm2, %v6829_v1  ;;  %v5881_v1 = vld [vmem:[%s11035_s1 + $0x128] sm:$0xff] }
  0x72   :  { %6833 = vmatprep.subr.bf16.mxu0 %v6832_v2  ;;  %v5883_v2 = vld [vmem:[%s11035_s1 + $0x138] sm:$0xf] }
  0x74   :  { %5786 = vmatmul.mubr.msk.f32.gmra.mrb[4].mxu0 %vm116_vm3, %v53_v3  ;;  %v1060_v3 = vld [vmem:[%s11034_s0 + $0x3] sm:$0xff] }
  0x75   :  { %565 = vmatprep.mubr.f32.mxu0 %v11050_v7 }
  0x78   :  { %5787 = vmatmul.mubr.msk.f32.gmra.mrb[6].mxu0 %vm116_vm3, %v54_v4  ;;  %v6844_v4 = vpack.c.bf16 %v5878_v0, %v5876_v63  ;;  %v1428_v63 = vld [vmem:[%s11034_s0 + $0x4] sm:$0xff] }
  0x79   :  { %571 = vmatprep.mubr.f32.mxu0 %v11050_v7 }
  0x7c   :  { %5788 = vmatmul.mubr.msk.f32.gmra.mrb[8].mxu0 %vm116_vm3, %v55_v5  ;;  %v6846_v5 = vpack.c.bf16 %v5883_v2, %v5881_v1  ;;  %v1924_v1 = vld [vmem:[%s11037_s3 + $0xa0] sm:$0xff]  ;;  %v1925_v2 = vld [vmem:[%s11037_s3 + $0xa8] sm:$0xff] }
  0x7d   :  { %577 = vmatprep.mubr.f32.mxu0 %v11050_v7 }
  0x80   :  { %5789 = vmatmul.mubr.msk.f32.gmra.mrb[10].mxu0 %vm116_vm3, %v56_v6  ;;  %v5880_v6 = vld [vmem:[%s11035_s1 + $0x120] sm:$0xff] }
  0x81   :  { %583 = vmatprep.mubr.f32.mxu0 %v11050_v7 }
  0x84   :  { %5790 = vmatmul.mubr.msk.f32.gmra.mrb[12].mxu0 %vm116_vm3, %v57_v8  ;;  %v5882_v8 = vld [vmem:[%s11035_s1 + $0x130] sm:$0xf] }
  0x85   :  { %589 = vmatprep.mubr.f32.mxu0 %v11050_v7 }
  0x88   :  { %5791 = vmatmul.mubr.msk.f32.gmra.mrb[14].mxu0 %vm116_vm3, %v58_v9  ;;  %v1061_v9 = vld [vmem:[%s11034_s0 + $0xb] sm:$0xff] }
  0x89   :  { %595 = vmatprep.mubr.f32.mxu0 %v11050_v7 }
  0x8c   :  { %5792 = vmatmul.mubr.msk.f32.gmra.mrb[16].mxu0 %vm116_vm3, %v59_v11  ;;  %v6849_v11 = vpack.c.bf16 %v5882_v8, %v5880_v6  ;;  %v1927_v6 = vld [vmem:[%s11037_s3 + $0xb8] sm:$0xff] }
  0x8d   :  { %601 = vmatprep.mubr.f32.mxu0 %v11050_v7  ;;  %v1430_v8 = vld [vmem:[%s11034_s0 + $0x14] sm:$0xff] }
  0x90   :  { %5793 = vmatmul.mubr.msk.f32.gmra.mrb[18].mxu0 %vm116_vm3, %v60_v12  ;;  %v1062_v12 = vld [vmem:[%s11034_s0 + $0x13] sm:$0xff] }
  0x91   :  { %607 = vmatprep.mubr.f32.mxu0 %v11050_v7 }
  0x94   :  { %5794 = vmatmul.mubr.msk.f32.gmra.mrb[20].mxu0 %vm116_vm3, %v61_v13  ;;  %v1063_v13 = vld [vmem:[%s11034_s0 + $0x23] sm:$0xff] }
  0x95   :  { %613 = vmatprep.mubr.f32.mxu0 %v11050_v7 }
  0x98   :  { %5795 = vmatmul.mubr.msk.f32.gmra.mrb[22].mxu0 %vm116_vm3, %v62_v14  ;;  %v1064_v14 = vld [vmem:[%s11034_s0 + $0x2b] sm:$0xff] }
  0x99   :  { %619 = vmatprep.mubr.f32.mxu0 %v11050_v7 }
  0x9c   :  { %5796 = vmatmul.mubr.msk.f32.gmra.mrb[24].mxu0 %vm116_vm3, %v63_v15  ;;  %v1066_v15 = vld [vmem:[%s11034_s0 + $0x43] sm:$0xff] }
  0x9d   :  { %625 = vmatprep.mubr.f32.mxu0 %v11050_v7 }
  0xa0   :  { %5797 = vmatmul.mubr.msk.f32.gmra.mrb[26].mxu0 %vm116_vm3, %v64_v16  ;;  %v1067_v16 = vld [vmem:[%s11034_s0 + $0x4b] sm:$0xff] }
  0xa1   :  { %631 = vmatprep.mubr.f32.mxu0 %v11050_v7 }
  0xa4   :  { %5798 = vmatmul.mubr.msk.f32.gmra.mrb[28].mxu0 %vm116_vm3, %v65_v17  ;;  %v1068_v17 = vld [vmem:[%s11034_s0 + $0x53] sm:$0xff] }
  0xa5   :  { %637 = vmatprep.mubr.f32.mxu0 %v11050_v7 }
  0xa8   :  { %5799 = vmatmul.mubr.msk.f32.gmra.mrb[30].mxu0 %vm116_vm3, %v66_v18  ;;  %v1069_v18 = vld [vmem:[%s11034_s0 + $0x63] sm:$0xff] }
  0xa9   :  { %643 = vmatprep.mubr.f32.mxu0 %v11050_v7 }
  0xac   :  { %5800 = vmatmul.mubr.msk.f32.gmra.mrb[32].mxu0 %vm116_vm3, %v67_v19  ;;  %v1070_v19 = vld [vmem:[%s11034_s0 + $0x6b] sm:$0xff] }
  0xad   :  { %649 = vmatprep.mubr.f32.mxu0 %v11050_v7 }
  0xb0   :  { %5801 = vmatmul.mubr.msk.f32.gmra.mrb[34].mxu0 %vm116_vm3, %v68_v20  ;;  %v1071_v20 = vld [vmem:[%s11034_s0 + $0x73] sm:$0xff] }
  0xb1   :  { %655 = vmatprep.mubr.f32.mxu0 %v11050_v7 }
  0xb4   :  { %5802 = vmatmul.mubr.msk.f32.gmra.mrb[36].mxu0 %vm116_vm3, %v69_v21  ;;  %v1072_v21 = vld [vmem:[%s11034_s0 + $0x83] sm:$0xff] }
  0xb5   :  { %661 = vmatprep.mubr.f32.mxu0 %v11050_v7 }
  0xb8   :  { %5803 = vmatmul.mubr.msk.f32.gmra.mrb[38].mxu0 %vm116_vm3, %v70_v22  ;;  %v1073_v22 = vld [vmem:[%s11034_s0 + $0x8b] sm:$0xff] }
  0xb9   :  { %667 = vmatprep.mubr.f32.mxu0 %v11050_v7 }
  0xbc   :  { %5804 = vmatmul.mubr.msk.f32.gmra.mrb[40].mxu0 %vm116_vm3, %v71_v23  ;;  %v1074_v23 = vld [vmem:[%s11034_s0 + $0x93] sm:$0xff] }
  0xbd   :  { %673 = vmatprep.mubr.f32.mxu0 %v11050_v7 }
  0xc0   :  { %5805 = vmatmul.mubr.msk.f32.gmra.mrb[42].mxu0 %vm116_vm3, %v72_v24  ;;  %v1075_v24 = vld [vmem:[%s11034_s0 + $0xa3] sm:$0xff] }
  0xc1   :  { %679 = vmatprep.mubr.f32.mxu0 %v11050_v7 }
  0xc4   :  { %5806 = vmatmul.mubr.msk.f32.gmra.mrb[44].mxu0 %vm116_vm3, %v73_v25  ;;  %v1904_v25 = vld [vmem:[%s11037_s3] sm:$0xff] }
  0xc5   :  { %685 = vmatprep.mubr.f32.mxu0 %v11050_v7 }
  0xc8   :  { %5807 = vmatmul.mubr.msk.f32.gmra.mrb[46].mxu0 %vm116_vm3, %v74_v26  ;;  %v1905_v26 = vld [vmem:[%s11037_s3 + $0x8] sm:$0xff] }
  0xc9   :  { %867 = vmatprep.mubr.f32.mxu0 %v11050_v7  ;;  %v6853_v30 = vpack.c.bf16 %v1905_v26, %v1904_v25  ;;  %v1443_v25 = vld [vmem:[%s11034_s0 + $0xa4] sm:$0xff]  ;;  %v1444_v26 = vld [vmem:[%s11034_s0 + $0xac] sm:$0xff] }
  0xcb   :  { %6854 = vmatpush1.bf16.msra.mxu1 %v6853_v30  ;;  %v1447_v30 = vld [vmem:[%s11034_s0 + $0xcc] sm:$0xff] }
  0xcc   :  { %5818 = vmatmul.mubr.msk.f32.vlgmr.msra.gmra.mrb[0].mxu0 %vm116_vm3, %v692_v31  ;;  %v1907_v31 = vld [vmem:[%s11037_s3 + $0x18] sm:$0xff]  ;;  %6855 = vmatprep.subr.bf16.mxu1 %v11065_v29 }
  0xcd   :  { %873 = vmatprep.mubr.f32.mxu0 %v11050_v7  ;;  %6835 = vmatpush1.bf16.msra.mxu0 %v6834_v32  ;;  %v6856_v32 = vpack.c.bf16 %v1907_v31, %v1906_v27  ;;  %v1445_v27 = vld [vmem:[%s11034_s0 + $0xb4] sm:$0xff] }
  0xce   :  { %6838 = vmatprep.subr.msk.bf16.mxu0 %vm7892_vm2, %v6836_v33  ;;  %v1908_v33 = vld [vmem:[%s11037_s3 + $0x20] sm:$0xff]  ;;  %v1448_v31 = vld [vmem:[%s11034_s0 + $0xd4] sm:$0xff] }
  0xcf   :  { %6857 = vmatpush1.bf16.msra.mxu1 %v6856_v32  ;;  %v6859_v36 = vpack.c.bf16 %v1909_v34, %v1908_v33  ;;  %v1930_v32 = vld [vmem:[%s11037_s3 + $0xd0] sm:$0xff]  ;;  %v1931_v33 = vld [vmem:[%s11037_s3 + $0xd8] sm:$0xff]  ;;  %v1449_v34 = vld [vmem:[%s11034_s0 + $0xe4] sm:$0xff] }
  0xd0   :  { %5819 = vmatmul.mubr.msk.f32.gmra.mrb[2].mxu0 %vm116_vm3, %v693_v38  ;;  %6858 = vmatprep.subr.bf16.mxu1 %v11065_v29  ;;  %v1911_v38 = vld [vmem:[%s11037_s3 + $0x38] sm:$0xff] }
  0xd1   :  { %879 = vmatprep.mubr.f32.mxu0 %v11050_v7  ;;  %6841 = vmatpush1.bf16.msk.msra.mxu0 %vm7892_vm2, %v6839_v39  ;;  %v1078_v39 = vld [vmem:[%s11034_s0 + $0xc3] sm:$0xff] }
  0xd2   :  { %6843 = vmatprep.subr.bf16.mxu0 %v6842_v40  ;;  %v6862_v40 = vpack.c.bf16 %v1911_v38, %v1910_v37  ;;  %v1933_v37 = vld [vmem:[%s11037_s3 + $0xe8] sm:$0xff] }
  0xd3   :  { %6860 = vmatpush1.bf16.msra.mxu1 %v6859_v36  ;;  %v1932_v36 = vld [vmem:[%s11037_s3 + $0xe0] sm:$0xff]  ;;  %v1450_v38 = vld [vmem:[%s11034_s0 + $0xec] sm:$0xff] }
  0xd4   :  { %5820 = vmatmul.mubr.msk.f32.gmra.mrb[4].mxu0 %vm116_vm3, %v694_v41  ;;  %6861 = vmatprep.subr.bf16.mxu1 %v11065_v29  ;;  %v1912_v41 = vld [vmem:[%s11037_s3 + $0x40] sm:$0xff] }
  0xd5   :  { %885 = vmatprep.mubr.f32.mxu0 %v11050_v7 }
  0xd7   :  { %6863 = vmatpush1.bf16.msra.mxu1 %v6862_v40  ;;  %v1451_v40 = vld [vmem:[%s11034_s0 + $0xf4] sm:$0xff] }
  0xd8   :  { %5821 = vmatmul.mubr.msk.f32.gmra.mrb[6].mxu0 %vm116_vm3, %v695_v42  ;;  %v1913_v42 = vld [vmem:[%s11037_s3 + $0x48] sm:$0xff]  ;;  %6864 = vmatprep.subr.bf16.mxu1 %v11065_v29 }
  0xd9   :  { %891 = vmatprep.mubr.f32.mxu0 %v11050_v7 }
  0xdc   :  { %5822 = vmatmul.mubr.msk.f32.gmra.mrb[8].mxu0 %vm116_vm3, %v696_v43  ;;  %v1079_v43 = vld [vmem:[%s11034_s0 + $0xcb] sm:$0xff] }
  0xdd   :  { %897 = vmatprep.mubr.f32.mxu0 %v11050_v7 }
  0xe0   :  { %5823 = vmatmul.mubr.msk.f32.gmra.mrb[10].mxu0 %vm116_vm3, %v697_v44  ;;  %v6865_v44 = vpack.c.bf16 %v1913_v42, %v1912_v41  ;;  %v1798_v41 = vlaneseq }
  0xe1   :  { %903 = vmatprep.mubr.f32.mxu0 %v11050_v7 }
  0xe2   :  { %6866 = vmatpush1.bf16.msra.mxu1 %v6865_v44  ;;  %v1799_v42 = vshrl.u32 %v1798_v41, 7  ;;  %v1796_v44 = vld [vmem:[%s11036_s2] sm:$0x3] }
  0xe3   :  { %6867 = vmatprep.subr.bf16.mxu1 %v11065_v29 }
  0xe4   :  { %5824 = vmatmul.mubr.msk.f32.gmra.mrb[12].mxu0 %vm116_vm3, %v698_v45  ;;  %v1914_v45 = vld [vmem:[%s11037_s3 + $0x50] sm:$0xff] }
  0xe5   :  { %909 = vmatprep.mubr.f32.mxu0 %v11050_v7 }
  0xe8   :  { %5825 = vmatmul.mubr.msk.f32.gmra.mrb[14].mxu0 %vm116_vm3, %v699_v46  ;;  %v1915_v46 = vld [vmem:[%s11037_s3 + $0x58] sm:$0xff] }
  0xe9   :  { %915 = vmatprep.mubr.f32.mxu0 %v11050_v7 }
  0xec   :  { %5826 = vmatmul.mubr.msk.f32.gmra.mrb[16].mxu0 %vm116_vm3, %v700_v47  ;;  %v1080_v47 = vld [vmem:[%s11034_s0 + $0xd3] sm:$0xff] }
  0xed   :  { %921 = vmatprep.mubr.f32.mxu0 %v11050_v7 }
  0xf0   :  { %5827 = vmatmul.mubr.msk.f32.gmra.mrb[18].mxu0 %vm116_vm3, %v701_v48  ;;  %v6868_v48 = vpack.c.bf16 %v1915_v46, %v1914_v45  ;;  %v8728_v45 = vsub.s32 1, %v1799_v42 }
  0xf1   :  { %927 = vmatprep.mubr.f32.mxu0 %v11050_v7 }
  0xf2   :  { %6869 = vmatpush1.bf16.msra.mxu1 %v6868_v48 }
  0xf3   :  { %6870 = vmatprep.subr.bf16.mxu1 %v11065_v29 }
  0xf4   :  { %5828 = vmatmul.mubr.msk.f32.gmra.mrb[20].mxu0 %vm116_vm3, %v702_v49  ;;  %v1916_v49 = vld [vmem:[%s11037_s3 + $0x60] sm:$0xff] }
  0xf5   :  { %933 = vmatprep.mubr.f32.mxu0 %v11050_v7 }
  0xf8   :  { %5829 = vmatmul.mubr.msk.f32.gmra.mrb[22].mxu0 %vm116_vm3, %v703_v50  ;;  %v1917_v50 = vld [vmem:[%s11037_s3 + $0x68] sm:$0xff] }
  0xf9   :  { %939 = vmatprep.mubr.f32.mxu0 %v11050_v7 }
  0xfc   :  { %5830 = vmatmul.mubr.msk.f32.gmra.mrb[24].mxu0 %vm116_vm3, %v704_v51  ;;  %v1081_v51 = vld [vmem:[%s11034_s0 + $0xe3] sm:$0xff] }
  0xfd   :  { %945 = vmatprep.mubr.f32.mxu0 %v11050_v7 }
 0x100   :  { %5831 = vmatmul.mubr.msk.f32.gmra.mrb[26].mxu0 %vm116_vm3, %v705_v52  ;;  %v6871_v52 = vpack.c.bf16 %v1917_v50, %v1916_v49 }
 0x101   :  { %951 = vmatprep.mubr.f32.mxu0 %v11050_v7 }
 0x102   :  { %6872 = vmatpush1.bf16.msra.mxu1 %v6871_v52  ;;  %v5935_v52 = vld [vmem:[%s11037_s3 + $0xf8] sm:$0xff] }
 0x103   :  { %6873 = vmatprep.subr.bf16.mxu1 %v11065_v29 }
 0x104   :  { %5832 = vmatmul.mubr.msk.f32.gmra.mrb[28].mxu0 %vm116_vm3, %v706_v53  ;;  %v1918_v53 = vld [vmem:[%s11037_s3 + $0x70] sm:$0xff] }
 0x105   :  { %957 = vmatprep.mubr.f32.mxu0 %v11050_v7 }
 0x108   :  { %5833 = vmatmul.mubr.msk.f32.gmra.mrb[30].mxu0 %vm116_vm3, %v707_v54  ;;  %v1919_v54 = vld [vmem:[%s11037_s3 + $0x78] sm:$0xff] }
 0x109   :  { %963 = vmatprep.mubr.f32.mxu0 %v11050_v7 }
 0x10c   :  { %5834 = vmatmul.mubr.msk.f32.gmra.mrb[32].mxu0 %vm116_vm3, %v708_v55  ;;  %v1082_v55 = vld [vmem:[%s11034_s0 + $0xeb] sm:$0xff] }
 0x10d   :  { %969 = vmatprep.mubr.f32.mxu0 %v11050_v7 }
 0x110   :  { %5835 = vmatmul.mubr.msk.f32.gmra.mrb[34].mxu0 %vm116_vm3, %v709_v56  ;;  %v6874_v56 = vpack.c.bf16 %v1919_v54, %v1918_v53 }
 0x111   :  { %975 = vmatprep.mubr.f32.mxu0 %v11050_v7 }
 0x112   :  { %6875 = vmatpush1.bf16.msra.mxu1 %v6874_v56 }
 0x113   :  { %6876 = vmatprep.subr.bf16.mxu1 %v11065_v29 }
 0x114   :  { %5836 = vmatmul.mubr.msk.f32.gmra.mrb[36].mxu0 %vm116_vm3, %v710_v57  ;;  %v1920_v57 = vld [vmem:[%s11037_s3 + $0x80] sm:$0xff] }
 0x115   :  { %981 = vmatprep.mubr.f32.mxu0 %v11050_v7 }
 0x118   :  { %5837 = vmatmul.mubr.msk.f32.gmra.mrb[38].mxu0 %vm116_vm3, %v711_v58  ;;  %v1921_v58 = vld [vmem:[%s11037_s3 + $0x88] sm:$0xff] }
 0x119   :  { %987 = vmatprep.mubr.f32.mxu0 %v11050_v7 }
 0x11c   :  { %5838 = vmatmul.mubr.msk.f32.gmra.mrb[40].mxu0 %vm116_vm3, %v712_v59  ;;  %v1083_v59 = vld [vmem:[%s11034_s0 + $0xf3] sm:$0xff] }
 0x11d   :  { %993 = vmatprep.mubr.f32.mxu0 %v11050_v7 }
 0x120   :  { %5839 = vmatmul.mubr.msk.f32.gmra.mrb[42].mxu0 %vm116_vm3, %v713_v60  ;;  %v6877_v60 = vpack.c.bf16 %v1921_v58, %v1920_v57 }
 0x121   :  { %999 = vmatprep.mubr.f32.mxu0 %v11050_v7 }
 0x122   :  { %6878 = vmatpush1.bf16.msra.mxu1 %v6877_v60  ;;  %v5936_v60 = vld [vmem:[%s11037_s3 + $0x100] sm:$0xff] }
 0x123   :  { %6879 = vmatprep.subr.bf16.mxu1 %v11065_v29 }
 0x124   :  { %5840 = vmatmul.mubr.msk.f32.gmra.mrb[44].mxu0 %vm116_vm3, %v714_v61  ;;  %v1922_v61 = vld [vmem:[%s11037_s3 + $0x90] sm:$0xff] }
 0x125   :  { %1005 = vmatprep.mubr.f32.mxu0 %v11050_v7 }
 0x128   :  { %5841 = vmatmul.mubr.msk.f32.gmra.mrb[46].mxu0 %vm116_vm3, %v715_v62  ;;  %v1923_v62 = vld [vmem:[%s11037_s3 + $0x98] sm:$0xff] }
 0x129   :  { %1235 = vmatprep.mubr.f32.mxu0 %v11050_v7  ;;  %v6880_v0 = vpack.c.bf16 %v1923_v62, %v1922_v61  ;;  %v5937_v61 = vld [vmem:[%s11037_s3 + $0x108] sm:$0xff] }
 0x12b   :  { %6881 = vmatpush1.bf16.msra.mxu1 %v6880_v0 }
 0x12c   :  { %5852 = vmatmul.mubr.msk.f32.vlgmr.msra.gmra.mrb[0].mxu0 %vm116_vm3, %v1060_v3  ;;  %v1429_v3 = vld [vmem:[%s11034_s0 + $0xc] sm:$0xff]  ;;  %6882 = vmatprep.subr.bf16.mxu1 %v11065_v29 }
 0x12d   :  { %1241 = vmatprep.mubr.f32.mxu0 %v11050_v7  ;;  %6845 = vmatpush1.bf16.msra.mxu0 %v6844_v4  ;;  %v6883_v4 = vpack.c.bf16 %v1925_v2, %v1924_v1  ;;  %v6901_v1 = vpack.c.bf16 %v5937_v61, %v5936_v60  ;;  %v5948_v61 = vld [vmem:[%s11037_s3 + $0x160] sm:$0xff] }
 0x12e   :  { %6848 = vmatprep.subr.msk.bf16.mxu0 %vm7892_vm2, %v6846_v5  ;;  %v1926_v5 = vld [vmem:[%s11037_s3 + $0xb0] sm:$0xff] }
 0x12f   :  { %6884 = vmatpush1.bf16.msra.mxu1 %v6883_v4 }
 0x130   :  { %5853 = vmatmul.mubr.msk.f32.gmra.mrb[2].mxu0 %vm116_vm3, %v1061_v9  ;;  %v6886_v9 = vpack.c.bf16 %v1927_v6, %v1926_v5  ;;  %6885 = vmatprep.subr.bf16.mxu1 %v11065_v29  ;;  %v5938_v5 = vld [vmem:[%s11037_s3 + $0x110] sm:$0xff]  ;;  %v5939_v6 = vld [vmem:[%s11037_s3 + $0x118] sm:$0xff] }
 0x131   :  { %1247 = vmatprep.mubr.f32.mxu0 %v11050_v7  ;;  %6851 = vmatpush1.bf16.msk.msra.mxu0 %vm7892_vm2, %v6849_v11  ;;  %v1928_v11 = vld [vmem:[%s11037_s3 + $0xc0] sm:$0xff] }
 0x133   :  { %6887 = vmatpush1.bf16.msra.mxu1 %v6886_v9 }
 0x134   :  { %5854 = vmatmul.mubr.msk.f32.gmra.mrb[4].mxu0 %vm116_vm3, %v1062_v12  ;;  %v1929_v12 = vld [vmem:[%s11037_s3 + $0xc8] sm:$0xff]  ;;  %6888 = vmatprep.subr.bf16.mxu1 %v11065_v29 }
 0x135   :  { %1253 = vmatprep.mubr.f32.mxu0 %v11050_v7 }
 0x138   :  { %5855 = vmatmul.mubr.msk.f32.gmra.mrb[6].mxu0 %vm116_vm3, %v1063_v13  ;;  %v1431_v13 = vld [vmem:[%s11034_s0 + $0x24] sm:$0xff] }
 0x139   :  { %1259 = vmatprep.mubr.f32.mxu0 %v11050_v7 }
 0x13c   :  { %5856 = vmatmul.mubr.msk.f32.gmra.mrb[8].mxu0 %vm116_vm3, %v1064_v14  ;;  %v6889_v14 = vpack.c.bf16 %v1929_v12, %v1928_v11  ;;  %v6904_v12 = vpack.c.bf16 %v5939_v6, %v5938_v5 }
 0x13d   :  { %1265 = vmatprep.mubr.f32.mxu0 %v11050_v7 }
 0x13e   :  { %6890 = vmatpush1.bf16.msra.mxu1 %v6889_v14 }
 0x13f   :  { %6891 = vmatprep.subr.bf16.mxu1 %v11065_v29 }
 0x140   :  { %5857 = vmatmul.mubr.msk.f32.gmra.mrb[10].mxu0 %vm116_vm3, %v1065_v10  ;;  %v1432_v10 = vld [vmem:[%s11034_s0 + $0x2c] sm:$0xff] }
 0x141   :  { %1271 = vmatprep.mubr.f32.mxu0 %v11050_v7 }
 0x144   :  { %5858 = vmatmul.mubr.msk.f32.gmra.mrb[12].mxu0 %vm116_vm3, %v1066_v15  ;;  %v1433_v15 = vld [vmem:[%s11034_s0 + $0x34] sm:$0xff] }
 0x145   :  { %1277 = vmatprep.mubr.f32.mxu0 %v11050_v7 }
 0x148   :  { %5859 = vmatmul.mubr.msk.f32.gmra.mrb[14].mxu0 %vm116_vm3, %v1067_v16  ;;  %v1434_v16 = vld [vmem:[%s11034_s0 + $0x44] sm:$0xff] }
 0x149   :  { %1283 = vmatprep.mubr.f32.mxu0 %v11050_v7 }
 0x14c   :  { %5860 = vmatmul.mubr.msk.f32.gmra.mrb[16].mxu0 %vm116_vm3, %v1068_v17  ;;  %v1435_v17 = vld [vmem:[%s11034_s0 + $0x4c] sm:$0xff] }
 0x14d   :  { %1289 = vmatprep.mubr.f32.mxu0 %v11050_v7 }
 0x150   :  { %5861 = vmatmul.mubr.msk.f32.gmra.mrb[18].mxu0 %vm116_vm3, %v1069_v18  ;;  %v1436_v18 = vld [vmem:[%s11034_s0 + $0x54] sm:$0xff] }
 0x151   :  { %1295 = vmatprep.mubr.f32.mxu0 %v11050_v7 }
 0x154   :  { %5862 = vmatmul.mubr.msk.f32.gmra.mrb[20].mxu0 %vm116_vm3, %v1070_v19  ;;  %v1437_v19 = vld [vmem:[%s11034_s0 + $0x64] sm:$0xff] }
 0x155   :  { %1301 = vmatprep.mubr.f32.mxu0 %v11050_v7 }
 0x158   :  { %5863 = vmatmul.mubr.msk.f32.gmra.mrb[22].mxu0 %vm116_vm3, %v1071_v20  ;;  %v1438_v20 = vld [vmem:[%s11034_s0 + $0x6c] sm:$0xff] }
 0x159   :  { %1307 = vmatprep.mubr.f32.mxu0 %v11050_v7 }
 0x15c   :  { %5864 = vmatmul.mubr.msk.f32.gmra.mrb[24].mxu0 %vm116_vm3, %v1072_v21  ;;  %v1439_v21 = vld [vmem:[%s11034_s0 + $0x74] sm:$0xff] }
 0x15d   :  { %1313 = vmatprep.mubr.f32.mxu0 %v11050_v7 }
 0x160   :  { %5865 = vmatmul.mubr.msk.f32.gmra.mrb[26].mxu0 %vm116_vm3, %v1073_v22  ;;  %v1440_v22 = vld [vmem:[%s11034_s0 + $0x84] sm:$0xff] }
 0x161   :  { %1319 = vmatprep.mubr.f32.mxu0 %v11050_v7 }
 0x164   :  { %5866 = vmatmul.mubr.msk.f32.gmra.mrb[28].mxu0 %vm116_vm3, %v1074_v23  ;;  %v1441_v23 = vld [vmem:[%s11034_s0 + $0x8c] sm:$0xff] }
 0x165   :  { %1325 = vmatprep.mubr.f32.mxu0 %v11050_v7 }
 0x168   :  { %5867 = vmatmul.mubr.msk.f32.gmra.mrb[30].mxu0 %vm116_vm3, %v1075_v24  ;;  %v1442_v24 = vld [vmem:[%s11034_s0 + $0x94] sm:$0xff] }
 0x169   :  { %1331 = vmatprep.mubr.f32.mxu0 %v11050_v7 }
 0x16c   :  { %5868 = vmatmul.mubr.msk.f32.gmra.mrb[32].mxu0 %vm116_vm3, %v1076_v28  ;;  %v1446_v28 = vld [vmem:[%s11034_s0 + $0xc4] sm:$0xff] }
 0x16d   :  { %1337 = vmatprep.mubr.f32.mxu0 %v11050_v7 }
 0x170   :  { %5869 = vmatmul.mubr.msk.f32.gmra.mrb[34].mxu0 %vm116_vm3, %v1077_v35  ;;  %v6892_v35 = vpack.c.bf16 %v1931_v33, %v1930_v32 }
 0x171   :  { %1343 = vmatprep.mubr.f32.mxu0 %v11050_v7 }
 0x172   :  { %6893 = vmatpush1.bf16.msra.mxu1 %v6892_v35  ;;  %v5945_v35 = vld [vmem:[%s11037_s3 + $0x148] sm:$0xff] }
 0x173   :  { %6894 = vmatprep.subr.bf16.mxu1 %v11065_v29 }
 0x174   :  { %5870 = vmatmul.mubr.msk.f32.gmra.mrb[36].mxu0 %vm116_vm3, %v1078_v39  ;;  %v6895_v39 = vpack.c.bf16 %v1933_v37, %v1932_v36 }
 0x175   :  { %1349 = vmatprep.mubr.f32.mxu0 %v11050_v7 }
 0x176   :  { %6896 = vmatpush1.bf16.msra.mxu1 %v6895_v39 }
 0x177   :  { %6897 = vmatprep.subr.bf16.mxu1 %v11065_v29 }
 0x178   :  { %5871 = vmatmul.mubr.msk.f32.gmra.mrb[38].mxu0 %vm116_vm3, %v1079_v43  ;;  %v8723_v43 = vsub.s32 0, %v1799_v42 }
 0x179   :  { %1355 = vmatprep.mubr.f32.mxu0 %v11050_v7 }
 0x17a   :  { %v8731_v46 = vrot.slane %v1796_v44, %v8723_v43 }
 0x17c   :  { %5872 = vmatmul.mubr.msk.f32.gmra.mrb[40].mxu0 %vm116_vm3, %v1080_v47  ;;  %v8734_v47 = vrot.slane %v1796_v44, %v8728_v45  ;;  %v5946_v44 = vld [vmem:[%s11037_s3 + $0x150] sm:$0xff] }
 0x17d   :  { %1361 = vmatprep.mubr.f32.mxu0 %v11050_v7 }
 0x180   :  { %5873 = vmatmul.mubr.msk.f32.gmra.mrb[42].mxu0 %vm116_vm3, %v1081_v51  ;;  %v5934_v51 = vld [vmem:[%s11037_s3 + $0xf0] sm:$0xff] }
 0x181   :  { %1367 = vmatprep.mubr.f32.mxu0 %v11050_v7  ;;  %v6898_v56 = vpack.c.bf16 %v5935_v52, %v5934_v51 }
 0x184   :  { %5874 = vmatmul.mubr.msk.f32.gmra.mrb[44].mxu0 %vm116_vm3, %v1082_v55 }
 0x185   :  { %1373 = vmatprep.mubr.f32.mxu0 %v11050_v7 }
 0x188   :  { %5875 = vmatmul.mubr.msk.f32.gmra.mrb[46].mxu0 %vm116_vm3, %v1083_v59 }
 0x189   :  { %1603 = vmatprep.mubr.f32.mxu0 %v11050_v7 }
 0x18c   :  { %5886 = vmatmul.mubr.msk.f32.vlgmr.msra.gmra.mrb[0].mxu0 %vm116_vm3, %v1428_v63 }
 0x18d   :  { %1609 = vmatprep.mubr.f32.mxu0 %v11050_v7 }
 0x190   :  { %5887 = vmatmul.mubr.msk.f32.gmra.mrb[2].mxu0 %vm116_vm3, %v1429_v3 }
 0x191   :  { %1615 = vmatprep.mubr.f32.mxu0 %v11050_v7 }
 0x194   :  { %5888 = vmatmul.mubr.msk.f32.gmra.mrb[4].mxu0 %vm116_vm3, %v1430_v8 }
 0x195   :  { %1621 = vmatprep.mubr.f32.mxu0 %v11050_v7 }
 0x198   :  { %5889 = vmatmul.mubr.msk.f32.gmra.mrb[6].mxu0 %vm116_vm3, %v1431_v13 }
 0x199   :  { %1627 = vmatprep.mubr.f32.mxu0 %v11050_v7 }
 0x19c   :  { %5890 = vmatmul.mubr.msk.f32.gmra.mrb[8].mxu0 %vm116_vm3, %v1432_v10 }
 0x19d   :  { %1633 = vmatprep.mubr.f32.mxu0 %v11050_v7 }
 0x1a0   :  { %5891 = vmatmul.mubr.msk.f32.gmra.mrb[10].mxu0 %vm116_vm3, %v1433_v15  ;;  %v5940_v15 = vld [vmem:[%s11037_s3 + $0x120] sm:$0xff] }
 0x1a1   :  { %1639 = vmatprep.mubr.f32.mxu0 %v11050_v7 }
 0x1a4   :  { %5892 = vmatmul.mubr.msk.f32.gmra.mrb[12].mxu0 %vm116_vm3, %v1434_v16  ;;  %v5941_v16 = vld [vmem:[%s11037_s3 + $0x128] sm:$0xff] }
 0x1a5   :  { %1645 = vmatprep.mubr.f32.mxu0 %v11050_v7 }
 0x1a8   :  { %5893 = vmatmul.mubr.msk.f32.gmra.mrb[14].mxu0 %vm116_vm3, %v1435_v17 }
 0x1a9   :  { %1651 = vmatprep.mubr.f32.mxu0 %v11050_v7 }
 0x1ac   :  { %5894 = vmatmul.mubr.msk.f32.gmra.mrb[16].mxu0 %vm116_vm3, %v1436_v18 }
 0x1ad   :  { %1657 = vmatprep.mubr.f32.mxu0 %v11050_v7 }
 0x1b0   :  { %5895 = vmatmul.mubr.msk.f32.gmra.mrb[18].mxu0 %vm116_vm3, %v1437_v19 }
 0x1b1   :  { %1663 = vmatprep.mubr.f32.mxu0 %v11050_v7 }
 0x1b4   :  { %5896 = vmatmul.mubr.msk.f32.gmra.mrb[20].mxu0 %vm116_vm3, %v1438_v20  ;;  %v6907_v20 = vpack.c.bf16 %v5941_v16, %v5940_v15  ;;  %v5950_v15 = vld [vmem:[%s11037_s3 + $0x170] sm:$0xff]  ;;  %v5951_v16 = vld [vmem:[%s11037_s3 + $0x178] sm:$0xff] }
 0x1b5   :  { %1669 = vmatprep.mubr.f32.mxu0 %v11050_v7 }
 0x1b8   :  { %5897 = vmatmul.mubr.msk.f32.gmra.mrb[22].mxu0 %vm116_vm3, %v1439_v21 }
 0x1b9   :  { %1675 = vmatprep.mubr.f32.mxu0 %v11050_v7 }
 0x1bc   :  { %5898 = vmatmul.mubr.msk.f32.gmra.mrb[24].mxu0 %vm116_vm3, %v1440_v22 }
 0x1bd   :  { %1681 = vmatprep.mubr.f32.mxu0 %v11050_v7 }
 0x1c0   :  { %5899 = vmatmul.mubr.msk.f32.gmra.mrb[26].mxu0 %vm116_vm3, %v1441_v23 }
 0x1c1   :  { %1687 = vmatprep.mubr.f32.mxu0 %v11050_v7 }
 0x1c4   :  { %5900 = vmatmul.mubr.msk.f32.gmra.mrb[28].mxu0 %vm116_vm3, %v1442_v24  ;;  %v5942_v24 = vld [vmem:[%s11037_s3 + $0x130] sm:$0xff] }
 0x1c5   :  { %1693 = vmatprep.mubr.f32.mxu0 %v11050_v7 }
 0x1c8   :  { %5901 = vmatmul.mubr.msk.f32.gmra.mrb[30].mxu0 %vm116_vm3, %v1443_v25  ;;  %v5943_v25 = vld [vmem:[%s11037_s3 + $0x138] sm:$0xff] }
 0x1c9   :  { %1699 = vmatprep.mubr.f32.mxu0 %v11050_v7 }
 0x1cc   :  { %5902 = vmatmul.mubr.msk.f32.gmra.mrb[32].mxu0 %vm116_vm3, %v1444_v26 }
 0x1cd   :  { %1705 = vmatprep.mubr.f32.mxu0 %v11050_v7 }
 0x1d0   :  { %5903 = vmatmul.mubr.msk.f32.gmra.mrb[34].mxu0 %vm116_vm3, %v1445_v27 }
 0x1d1   :  { %1711 = vmatprep.mubr.f32.mxu0 %v11050_v7 }
 0x1d4   :  { %5904 = vmatmul.mubr.msk.f32.gmra.mrb[36].mxu0 %vm116_vm3, %v1446_v28 }
 0x1d5   :  { %1717 = vmatprep.mubr.f32.mxu0 %v11050_v7 }
 0x1d8   :  { %5905 = vmatmul.mubr.msk.f32.gmra.mrb[38].mxu0 %vm116_vm3, %v1447_v30  ;;  %v6910_v30 = vpack.c.bf16 %v5943_v25, %v5942_v24  ;;  %v6922_v24 = vpack.c.bf16 %v5951_v16, %v5950_v15 }
 0x1d9   :  { %1723 = vmatprep.mubr.f32.mxu0 %v11050_v7 }
 0x1dc   :  { %5906 = vmatmul.mubr.msk.f32.gmra.mrb[40].mxu0 %vm116_vm3, %v1448_v31 }
 0x1dd   :  { %1729 = vmatprep.mubr.f32.mxu0 %v11050_v7 }
 0x1e0   :  { %5907 = vmatmul.mubr.msk.f32.gmra.mrb[42].mxu0 %vm116_vm3, %v1449_v34  ;;  %v5944_v34 = vld [vmem:[%s11037_s3 + $0x140] sm:$0xff] }
 0x1e1   :  { %1735 = vmatprep.mubr.f32.mxu0 %v11050_v7  ;;  %v6913_v39 = vpack.c.bf16 %v5945_v35, %v5944_v34  ;;  %v5953_v34 = vld [vmem:[%s11037_s3 + $0x188] sm:$0xff] }
 0x1e4   :  { %5908 = vmatmul.mubr.msk.f32.gmra.mrb[44].mxu0 %vm116_vm3, %v1450_v38 }
 0x1e5   :  { %1741 = vmatprep.mubr.f32.mxu0 %v11050_v7 }
 0x1e8   :  { %5909 = vmatmul.mubr.msk.f32.gmra.mrb[46].mxu0 %vm116_vm3, %v1451_v40 }
 0x25f   :  { %v1605_v48 = vpop.f32.mrb[0].mxu0 }
 0x260   :  { %v8737_v49 = vadd.f32 %v8731_v46, %v1605_v48  ;;  %v1607_v50 = vpop.f32.mrb[1].mxu0  ;;  %v5947_v48 = vld [vmem:[%s11037_s3 + $0x158] sm:$0xff] }
 0x261   :  { %v8746_v53 = vadd.f32 %v8734_v47, %v1607_v50 }
 0x262   :  { %v1856_v57 = vmax.f32 %v8737_v49, 0.0 }
 0x263   :  { %v1857_v54 = vmax.f32 %v8746_v53, 0.0  ;;  %v1611_v55 = vpop.f32.mrb[2].mxu0 }
 0x264   :  { %v8751_v58 = vadd.f32 %v8731_v46, %v1611_v55  ;;  %v1613_v59 = vpop.f32.mrb[3].mxu0  ;;  %v6916_v55 = vpack.c.bf16 %v5947_v48, %v5946_v44 }
 0x265   :  { %v8760_v62 = vadd.f32 %v8734_v47, %v1613_v59  ;;  %5910 = vmatprep.mubr.msk.f32.mxu1 %vm1934_vm4, %v1857_v54 }
 0x266   :  { %2072 = vmatmul.mubr.f32.vlgmr.msra.gmra.mrb[0].mxu1 %v1856_v57  ;;  %v1858_v2 = vmax.f32 %v8751_v58, 0.0 }
 0x267   :  { %v1859_v63 = vmax.f32 %v8760_v62, 0.0  ;;  %v1617_v0 = vpop.f32.mrb[4].mxu0  ;;  %6899 = vmatpush1.bf16.msra.mxu1 %v6898_v56 }
 0x268   :  { %v8770_v3 = vadd.f32 %v8731_v46, %v1617_v0  ;;  %v1619_v4 = vpop.f32.mrb[5].mxu0  ;;  %6900 = vmatprep.subr.bf16.mxu1 %v11065_v29  ;;  %v5949_v0 = vld [vmem:[%s11037_s3 + $0x168] sm:$0xff] }
 0x269   :  { %v8780_v8 = vadd.f32 %v8734_v47, %v1619_v4  ;;  %5911 = vmatprep.mubr.msk.f32.mxu1 %vm1934_vm4, %v1859_v63  ;;  %v6919_v6 = vpack.c.bf16 %v5949_v0, %v5948_v61 }
 0x26a   :  { %2077 = vmatmul.mubr.f32.gmra.mrb[2].mxu1 %v1858_v2  ;;  %v11088_v13 = vmax.f32 %v8770_v3, 0.0 }
 0x26b   :  { %v11090_v9 = vmax.f32 %v8780_v8, 0.0  ;;  %v1623_v11 = vpop.f32.mrb[6].mxu0  ;;  %6902 = vmatpush1.bf16.msra.mxu1 %v6901_v1 }
 0x26c   :  { %v8790_v14 = vadd.f32 %v8731_v46, %v1623_v11  ;;  %v1625_v10 = vpop.f32.mrb[7].mxu0  ;;  %6903 = vmatprep.subr.bf16.mxu1 %v11065_v29 }
 0x26d   :  { %v8800_v17 = vadd.f32 %v8734_v47, %v1625_v10  ;;  %5912 = vmatprep.mubr.msk.f32.mxu1 %vm1934_vm4, %v11090_v9 }
 0x26e   :  { %2082 = vmatmul.mubr.f32.gmra.mrb[4].mxu1 %v11088_v13  ;;  %v11086_v21 = vmax.f32 %v8790_v14, 0.0  ;;  %v11097_v49 = vmax.f32 %v8790_v14, 0.0 }
 0x26f   :  { %v11087_v18 = vmax.f32 %v8800_v17, 0.0  ;;  %v1629_v19 = vpop.f32.mrb[8].mxu0  ;;  %6905 = vmatpush1.bf16.msra.mxu1 %v6904_v12  ;;  %v11096_v53 = vmax.f32 %v8800_v17, 0.0 }
 0x270   :  { %v8810_v22 = vadd.f32 %v8731_v46, %v1629_v19  ;;  %v1631_v23 = vpop.f32.mrb[9].mxu0  ;;  %6906 = vmatprep.subr.bf16.mxu1 %v11065_v29 }
 0x271   :  { %v8820_v26 = vadd.f32 %v8734_v47, %v1631_v23  ;;  %5913 = vmatprep.mubr.msk.f32.mxu1 %vm1934_vm4, %v11087_v18 }
 0x272   :  { %2087 = vmatmul.mubr.f32.gmra.mrb[6].mxu1 %v11086_v21  ;;  %v11082_v31 = vmax.f32 %v8810_v22, 0.0 }
 0x273   :  { %v11085_v27 = vmax.f32 %v8820_v26, 0.0  ;;  %v1635_v28 = vpop.f32.mrb[10].mxu0  ;;  %6908 = vmatpush1.bf16.msra.mxu1 %v6907_v20 }
 0x274   :  { %v8830_v32 = vadd.f32 %v8731_v46, %v1635_v28  ;;  %v1637_v33 = vpop.f32.mrb[11].mxu0  ;;  %6909 = vmatprep.subr.bf16.mxu1 %v11065_v29 }
 0x275   :  { %v8840_v36 = vadd.f32 %v8734_v47, %v1637_v33  ;;  %5914 = vmatprep.mubr.msk.f32.mxu1 %vm1934_vm4, %v11085_v27  ;;  %v5952_v33 = vld [vmem:[%s11037_s3 + $0x180] sm:$0xff] }
 0x276   :  { %2092 = vmatmul.mubr.f32.gmra.mrb[8].mxu1 %v11082_v31  ;;  %v11078_v40 = vmax.f32 %v8830_v32, 0.0  ;;  %v11101_v62 = vmax.f32 %v8830_v32, 0.0 }
 0x277   :  { %v11081_v37 = vmax.f32 %v8840_v36, 0.0  ;;  %v1641_v38 = vpop.f32.mrb[12].mxu0  ;;  %6911 = vmatpush1.bf16.msra.mxu1 %v6910_v30  ;;  %v11100_v58 = vmax.f32 %v8840_v36, 0.0 }
 0x278   :  { %v8850_v41 = vadd.f32 %v8731_v46, %v1641_v38  ;;  %v1643_v42 = vpop.f32.mrb[13].mxu0  ;;  %6912 = vmatprep.subr.bf16.mxu1 %v11065_v29 }
 0x279   :  { %v8860_v50 = vadd.f32 %v8734_v47, %v1643_v42  ;;  %5915 = vmatprep.mubr.msk.f32.mxu1 %vm1934_vm4, %v11081_v37  ;;  %v6925_v42 = vpack.c.bf16 %v5953_v34, %v5952_v33 }
 0x27a   :  { %2097 = vmatmul.mubr.f32.gmra.mrb[10].mxu1 %v11078_v40  ;;  %v11074_v56 = vmax.f32 %v8850_v41, 0.0 }
 0x27b   :  { %v11077_v51 = vmax.f32 %v8860_v50, 0.0  ;;  %v1647_v52 = vpop.f32.mrb[14].mxu0  ;;  %6914 = vmatpush1.bf16.msra.mxu1 %v6913_v39 }
 0x27c   :  { %v8870_v59 = vadd.f32 %v8731_v46, %v1647_v52  ;;  %v1649_v60 = vpop.f32.mrb[15].mxu0  ;;  %6915 = vmatprep.subr.bf16.mxu1 %v11065_v29 }
 0x27d   :  { %v8880_v1 = vadd.f32 %v8734_v47, %v1649_v60  ;;  %5916 = vmatprep.mubr.msk.f32.mxu1 %vm1934_vm4, %v11077_v51  ;;  %v5955_v60 = vld [vmem:[%s11037_s3 + $0x198] sm:$0xff] }
 0x27e   :  { %2102 = vmatmul.mubr.f32.gmra.mrb[12].mxu1 %v11074_v56  ;;  %v11070_v11 = vmax.f32 %v8870_v59, 0.0 }
 0x27f   :  { %v11073_v4 = vmax.f32 %v8880_v1, 0.0  ;;  %v1653_v5 = vpop.f32.mrb[16].mxu0  ;;  %6917 = vmatpush1.bf16.msra.mxu1 %v6916_v55  ;;  %v5954_v55 = vld [vmem:[%s11037_s3 + $0x190] sm:$0xff] }
 0x280   :  { %v8890_v12 = vadd.f32 %v8731_v46, %v1653_v5  ;;  %v1655_v10 = vpop.f32.mrb[17].mxu0  ;;  %6918 = vmatprep.subr.bf16.mxu1 %v11065_v29 }
 0x281   :  { %v8900_v19 = vadd.f32 %v8734_v47, %v1655_v10  ;;  %5917 = vmatprep.mubr.msk.f32.mxu1 %vm1934_vm4, %v11073_v4 }
 0x282   :  { %2107 = vmatmul.mubr.f32.gmra.mrb[14].mxu1 %v11070_v11  ;;  %v11060_v25 = vmax.f32 %v8890_v12, 0.0  ;;  %v11107_v14 = vmax.f32 %v8890_v12, 0.0 }
 0x283   :  { %v11069_v20 = vmax.f32 %v8900_v19, 0.0  ;;  %v1659_v23 = vpop.f32.mrb[18].mxu0  ;;  %6920 = vmatpush1.bf16.msra.mxu1 %v6919_v6  ;;  %v6928_v6 = vpack.c.bf16 %v5955_v60, %v5954_v55  ;;  %v5958_v60 = vld [vmem:[%s11037_s3 + $0x1b0] sm:$0xff] }
 0x284   :  { %v8910_v28 = vadd.f32 %v8731_v46, %v1659_v23  ;;  %v1661_v30 = vpop.f32.mrb[19].mxu0  ;;  %6921 = vmatprep.subr.bf16.mxu1 %v11065_v29  ;;  %v5956_v23 = vld [vmem:[%s11037_s3 + $0x1a0] sm:$0xff] }
 0x285   :  { %v8920_v35 = vadd.f32 %v8734_v47, %v1661_v30  ;;  %5918 = vmatprep.mubr.msk.f32.mxu1 %vm1934_vm4, %v11069_v20 }
 0x286   :  { %2112 = vmatmul.mubr.f32.gmra.mrb[16].mxu1 %v11060_v25  ;;  %v11056_v44 = vmax.f32 %v8910_v28, 0.0 }
 0x287   :  { %v11059_v38 = vmax.f32 %v8920_v35, 0.0  ;;  %v1665_v39 = vpop.f32.mrb[20].mxu0  ;;  %6923 = vmatpush1.bf16.msra.mxu1 %v6922_v24  ;;  %v5957_v24 = vld [vmem:[%s11037_s3 + $0x1a8] sm:$0xff]  ;;  %v11108_v17 = vmax.f32 %v8920_v35, 0.0 }
 0x288   :  { %v8930_v48 = vadd.f32 %v8731_v46, %v1665_v39  ;;  %v1667_v52 = vpop.f32.mrb[21].mxu0  ;;  %6924 = vmatprep.subr.bf16.mxu1 %v11065_v29  ;;  %v6931_v39 = vpack.c.bf16 %v5957_v24, %v5956_v23 }
 0x289   :  { %v8940_v61 = vadd.f32 %v8734_v47, %v1667_v52  ;;  %5919 = vmatprep.mubr.msk.f32.mxu1 %vm1934_vm4, %v11059_v38 }
 0x28a   :  { %2117 = vmatmul.mubr.f32.gmra.mrb[18].mxu1 %v11056_v44  ;;  %v11052_v10 = vmax.f32 %v8930_v48, 0.0 }
 0x28b   :  { %v11055_v0 = vmax.f32 %v8940_v61, 0.0  ;;  %v1671_v5 = vpop.f32.mrb[22].mxu0  ;;  %6926 = vmatpush1.bf16.msra.mxu1 %v6925_v42 }
 0x28c   :  { %v8950_v15 = vadd.f32 %v8731_v46, %v1671_v5  ;;  %v1673_v16 = vpop.f32.mrb[23].mxu0  ;;  %6927 = vmatprep.subr.bf16.mxu1 %v11065_v29  ;;  %v5959_v5 = vld [vmem:[%s11037_s3 + $0x1b8] sm:$0xff] }
 0x28d   :  { %v8960_v30 = vadd.f32 %v8734_v47, %v1673_v16  ;;  %5920 = vmatprep.mubr.msk.f32.mxu1 %vm1934_vm4, %v11055_v0  ;;  %v6934_v24 = vpack.c.bf16 %v5959_v5, %v5958_v60 }
 0x28e   :  { %2122 = vmatmul.mubr.f32.gmra.mrb[20].mxu1 %v11052_v10  ;;  %v11053_v42 = vmax.f32 %v8950_v15, 0.0 }
 0x28f   :  { %v11054_v33 = vmax.f32 %v8960_v30, 0.0  ;;  %v1677_v34 = vpop.f32.mrb[24].mxu0  ;;  %6929 = vmatpush1.bf16.msra.mxu1 %v6928_v6 }
 0x290   :  { %v8970_v52 = vadd.f32 %v8731_v46, %v1677_v34  ;;  %v1679_v55 = vpop.f32.mrb[25].mxu0  ;;  %6930 = vmatprep.subr.bf16.mxu1 %v11065_v29 }
 0x291   :  { %v8980_v16 = vadd.f32 %v8734_v47, %v1679_v55  ;;  %5921 = vmatprep.mubr.msk.f32.mxu1 %vm1934_vm4, %v11054_v33  ;;  %v5960_v55 = vld [vmem:[%s11037_s3 + $0x1c0] sm:$0xff] }
 0x292   :  { %2127 = vmatmul.mubr.f32.gmra.mrb[22].mxu1 %v11053_v42  ;;  %v11057_v34 = vmax.f32 %v8970_v52, 0.0  ;;  %v5961_v42 = vld [vmem:[%s11037_s3 + $0x1c8] sm:$0xff]  ;;  %v11115_v36 = vmax.f32 %v8970_v52, 0.0 }
 0x293   :  { %v11058_v6 = vmax.f32 %v8980_v16, 0.0  ;;  %v1683_v23 = vpop.f32.mrb[26].mxu0  ;;  %6932 = vmatpush1.bf16.msra.mxu1 %v6931_v39  ;;  %v6937_v5 = vpack.c.bf16 %v5961_v42, %v5960_v55  ;;  %v11114_v32 = vmax.f32 %v8980_v16, 0.0 }
 0x294   :  { %v8990_v7 = vadd.f32 %v8731_v46, %v1683_v23  ;;  %v1685_v10 = vpop.f32.mrb[27].mxu0  ;;  %6933 = vmatprep.subr.bf16.mxu1 %v11065_v29 }
 0x295   :  { %v9000_v33 = vadd.f32 %v8734_v47, %v1685_v10  ;;  %5922 = vmatprep.mubr.msk.f32.mxu1 %vm1934_vm4, %v11058_v6  ;;  %v5962_v10 = vld [vmem:[%s11037_s3 + $0x1d0] sm:$0xff] }
 0x296   :  { %2132 = vmatmul.mubr.f32.gmra.mrb[24].mxu1 %v11057_v34  ;;  %v11061_v23 = vmax.f32 %v8990_v7, 0.0  ;;  %v5963_v34 = vld [vmem:[%s11037_s3 + $0x1d8] sm:$0xff] }
 0x297   :  { %v11064_v39 = vmax.f32 %v9000_v33, 0.0  ;;  %v1689_v60 = vpop.f32.mrb[28].mxu0  ;;  %6935 = vmatpush1.bf16.msra.mxu1 %v6934_v24  ;;  %v6940_v55 = vpack.c.bf16 %v5963_v34, %v5962_v10 }
 0x298   :  { %v9010_v0 = vadd.f32 %v8731_v46, %v1689_v60  ;;  %v1691_v44 = vpop.f32.mrb[29].mxu0  ;;  %6936 = vmatprep.subr.bf16.mxu1 %v11065_v29 }
 0x299   :  { %v9020_v6 = vadd.f32 %v8734_v47, %v1691_v44  ;;  %5923 = vmatprep.mubr.msk.f32.mxu1 %vm1934_vm4, %v11064_v39 }
 0x29a   :  { %2137 = vmatmul.mubr.f32.gmra.mrb[26].mxu1 %v11061_v23  ;;  %v11062_v60 = vmax.f32 %v9010_v0, 0.0 }
 0x29b   :  { %v11063_v42 = vmax.f32 %v9020_v6, 0.0  ;;  %v1695_v24 = vpop.f32.mrb[30].mxu0  ;;  %6938 = vmatpush1.bf16.msra.mxu1 %v6937_v5 }
 0x29c   :  { %v9030_v38 = vadd.f32 %v8731_v46, %v1695_v24  ;;  %v1697_v25 = vpop.f32.mrb[31].mxu0  ;;  %6939 = vmatprep.subr.bf16.mxu1 %v11065_v29 }
 0x29d   :  { %v9034_v44 = vadd.f32 %v8734_v47, %v1697_v25  ;;  %5924 = vmatprep.mubr.msk.f32.mxu1 %vm1934_vm4, %v11063_v42 }
 0x29e   :  { %2142 = vmatmul.mubr.f32.gmra.mrb[28].mxu1 %v11062_v60  ;;  %v11067_v10 = vmax.f32 %v9030_v38, 0.0 }
 0x29f   :  { %v11068_v34 = vmax.f32 %v9034_v44, 0.0  ;;  %v1701_v5 = vpop.f32.mrb[32].mxu0  ;;  %6941 = vmatpush1.bf16.msra.mxu1 %v6940_v55  ;;  %v11120_v12 = vmax.f32 %v9034_v44, 0.0 }
 0x2a0   :  { %v9044_v24 = vadd.f32 %v8731_v46, %v1701_v5  ;;  %v1703_v23 = vpop.f32.mrb[33].mxu0  ;;  %6942 = vmatprep.subr.bf16.mxu1 %v11065_v29 }
 0x2a1   :  { %v9048_v25 = vadd.f32 %v8734_v47, %v1703_v23  ;;  %5925 = vmatprep.mubr.msk.f32.mxu1 %vm1934_vm4, %v11068_v34 }
 0x2a2   :  { %2147 = vmatmul.mubr.f32.gmra.mrb[30].mxu1 %v11067_v10  ;;  %v11071_v42 = vmax.f32 %v9044_v24, 0.0 }
 0x2a3   :  { %v11072_v55 = vmax.f32 %v9048_v25, 0.0  ;;  %v1707_v60 = vpop.f32.mrb[34].mxu0 }
 0x2a4   :  { %v9058_v5 = vadd.f32 %v8731_v46, %v1707_v60  ;;  %v1709_v39 = vpop.f32.mrb[35].mxu0 }
 0x2a5   :  { %v9061_v29 = vadd.f32 %v8734_v47, %v1709_v39  ;;  %5926 = vmatprep.mubr.msk.f32.mxu1 %vm1934_vm4, %v11072_v55 }
 0x2a6   :  { %2152 = vmatmul.mubr.f32.gmra.mrb[32].mxu1 %v11071_v42  ;;  %v11075_v34 = vmax.f32 %v9058_v5, 0.0 }
 0x2a7   :  { %v11076_v23 = vmax.f32 %v9061_v29, 0.0  ;;  %v1713_v10 = vpop.f32.mrb[36].mxu0  ;;  %v11124_v35 = vmax.f32 %v9061_v29, 0.0 }
 0x2a8   :  { %v9071_v20 = vadd.f32 %v8731_v46, %v1713_v10  ;;  %v1715_v60 = vpop.f32.mrb[37].mxu0 }
 0x2a9   :  { %v9074_v11 = vadd.f32 %v8734_v47, %v1715_v60  ;;  %5927 = vmatprep.mubr.msk.f32.mxu1 %vm1934_vm4, %v11076_v23 }
 0x2aa   :  { %2157 = vmatmul.mubr.f32.gmra.mrb[34].mxu1 %v11075_v34  ;;  %v11079_v55 = vmax.f32 %v9071_v20, 0.0 }
 0x2ab   :  { %v11080_v39 = vmax.f32 %v9074_v11, 0.0  ;;  %v1719_v42 = vpop.f32.mrb[38].mxu0 }
 0x2ac   :  { %v9084_v4 = vadd.f32 %v8731_v46, %v1719_v42  ;;  %v1721_v10 = vpop.f32.mrb[39].mxu0 }
 0x2ad   :  { %v9087_v56 = vadd.f32 %v8734_v47, %v1721_v10  ;;  %5928 = vmatprep.mubr.msk.f32.mxu1 %vm1934_vm4, %v11080_v39 }
 0x2ae   :  { %2162 = vmatmul.mubr.f32.gmra.mrb[36].mxu1 %v11079_v55  ;;  %v11083_v23 = vmax.f32 %v9084_v4, 0.0 }
 0x2af   :  { %v11084_v60 = vmax.f32 %v9087_v56, 0.0  ;;  %v1725_v34 = vpop.f32.mrb[40].mxu0 }
 0x2b0   :  { %v9097_v51 = vadd.f32 %v8731_v46, %v1725_v34  ;;  %v1727_v42 = vpop.f32.mrb[41].mxu0 }
 0x2b1   :  { %v9100_v40 = vadd.f32 %v8734_v47, %v1727_v42  ;;  %5929 = vmatprep.mubr.msk.f32.mxu1 %vm1934_vm4, %v11084_v60 }
 0x2b2   :  { %2167 = vmatmul.mubr.f32.gmra.mrb[38].mxu1 %v11083_v23  ;;  %v11091_v39 = vmax.f32 %v9097_v51, 0.0 }
 0x2b3   :  { %v11089_v10 = vmax.f32 %v9100_v40, 0.0  ;;  %v1731_v55 = vpop.f32.mrb[42].mxu0  ;;  %v11130_v29 = vmax.f32 %v9100_v40, 0.0 }
 0x2b4   :  { %v9110_v37 = vadd.f32 %v8731_v46, %v1731_v55  ;;  %v1733_v34 = vpop.f32.mrb[43].mxu0 }
 0x2b5   :  { %v9113_v31 = vadd.f32 %v8734_v47, %v1733_v34  ;;  %5930 = vmatprep.mubr.msk.f32.mxu1 %vm1934_vm4, %v11089_v10 }
 0x2b6   :  { %2172 = vmatmul.mubr.f32.gmra.mrb[40].mxu1 %v11091_v39  ;;  %v1898_v60 = vmax.f32 %v9110_v37, 0.0 }
 0x2b7   :  { %v1899_v42 = vmax.f32 %v9113_v31, 0.0  ;;  %v1737_v23 = vpop.f32.mrb[44].mxu0 }
 0x2b8   :  { %v1852_v27 = vadd.f32 %v8731_v46, %v1737_v23  ;;  %v1739_v55 = vpop.f32.mrb[45].mxu0 }
 0x2b9   :  { %v1853_v21 = vadd.f32 %v8734_v47, %v1739_v55  ;;  %5931 = vmatprep.mubr.msk.f32.mxu1 %vm1934_vm4, %v1899_v42 }
 0x2ba   :  { %2177 = vmatmul.mubr.f32.gmra.mrb[42].mxu1 %v1898_v60  ;;  %v1900_v13 = vmax.f32 %v1852_v27, 0.0  ;;  %v11113_v27 = vmax.f32 %v8950_v15, 0.0  ;;  %v11129_v15 = vmax.f32 %v9084_v4, 0.0 }
 0x2bb   :  { %v1901_v34 = vmax.f32 %v1853_v21, 0.0  ;;  %v1743_v18 = vpop.f32.mrb[46].mxu0  ;;  %v11110_v21 = vmax.f32 %v8940_v61, 0.0  ;;  %v11126_v61 = vmax.f32 %v9074_v11, 0.0 }
 0x2bc   :  { %v1854_v10 = vadd.f32 %v8731_v46, %v1743_v18  ;;  %v1745_v9 = vpop.f32.mrb[47].mxu0  ;;  %v11094_v46 = vmax.f32 %v8780_v8, 0.0  ;;  %v11105_v8 = vmax.f32 %v8870_v59, 0.0  ;;  %v11109_v18 = vmax.f32 %v8910_v28, 0.0 }
 0x2bd   :  { %v1855_v39 = vadd.f32 %v8734_v47, %v1745_v9  ;;  %5932 = vmatprep.mubr.msk.f32.mxu1 %vm1934_vm4, %v1901_v34  ;;  %v11095_v47 = vmax.f32 %v8770_v3, 0.0  ;;  %v11104_v3 = vmax.f32 %v8880_v1, 0.0  ;;  %v11106_v9 = vmax.f32 %v8900_v19, 0.0 }
 0x2be   :  { %2182 = vmatmul.mubr.f32.gmra.mrb[44].mxu1 %v1900_v13  ;;  %v1902_v37 = vmax.f32 %v1854_v10, 0.0  ;;  %v11118_v59 = vmax.f32 %v9020_v6, 0.0  ;;  %v11119_v1 = vmax.f32 %v9010_v0, 0.0  ;;  %v11121_v19 = vmax.f32 %v9030_v38, 0.0 }
 0x2bf   :  { %v1903_v31 = vmax.f32 %v1855_v39, 0.0  ;;  %v11122_v28 = vmax.f32 %v9048_v25, 0.0  ;;  %v11127_v38 = vmax.f32 %v9071_v20, 0.0  ;;  %v11128_v0 = vmax.f32 %v9087_v56, 0.0 }
 0x2c1   :  { %5933 = vmatprep.mubr.msk.f32.mxu1 %vm1934_vm4, %v1903_v31 }
 0x2c2   :  { %2187 = vmatmul.mubr.f32.gmra.mrb[46].mxu1 %v1902_v37 }
 0x2c3   :  { %5964 = vmatprep.mubr.msk.f32.mxu1 %vm1934_vm4, %v1857_v54  ;;  %v11098_v54 = vmax.f32 %v8820_v26, 0.0  ;;  %v11112_v26 = vmax.f32 %v8960_v30, 0.0  ;;  %v11131_v30 = vmax.f32 %v9097_v51, 0.0 }
 0x2c6   :  { %2288 = vmatmul.mubr.f32.vlgmr.msra.gmra.mrb[48].mxu1 %v1856_v57  ;;  %v11099_v57 = vmax.f32 %v8810_v22, 0.0  ;;  %v11111_v22 = vmax.f32 %v8930_v48, 0.0  ;;  %v11125_v48 = vmax.f32 %v9058_v5, 0.0 }
 0x2c7   :  { %5965 = vmatprep.mubr.msk.f32.mxu1 %vm1934_vm4, %v1859_v63  ;;  %v11102_v63 = vmax.f32 %v8860_v50, 0.0  ;;  %v11117_v50 = vmax.f32 %v8990_v7, 0.0  ;;  %v11123_v7 = vmax.f32 %v9044_v24, 0.0 }
 0x2ca   :  { %2293 = vmatmul.mubr.f32.gmra.mrb[50].mxu1 %v1858_v2  ;;  %v11103_v2 = vmax.f32 %v8850_v41, 0.0  ;;  %v11116_v41 = vmax.f32 %v9000_v33, 0.0 }
 0x2cb   :  { %5966 = vmatprep.mubr.msk.f32.mxu1 %vm1934_vm4, %v11094_v46 }
 0x2ce   :  { %2298 = vmatmul.mubr.f32.gmra.mrb[52].mxu1 %v11095_v47 }
 0x2cf   :  { %5967 = vmatprep.mubr.msk.f32.mxu1 %vm1934_vm4, %v11096_v53 }
 0x2d2   :  { %2303 = vmatmul.mubr.f32.gmra.mrb[54].mxu1 %v11097_v49 }
 0x2d3   :  { %5968 = vmatprep.mubr.msk.f32.mxu1 %vm1934_vm4, %v11098_v54 }
 0x2d6   :  { %2308 = vmatmul.mubr.f32.gmra.mrb[56].mxu1 %v11099_v57 }
 0x2d7   :  { %5969 = vmatprep.mubr.msk.f32.mxu1 %vm1934_vm4, %v11100_v58 }
 0x2da   :  { %2313 = vmatmul.mubr.f32.gmra.mrb[58].mxu1 %v11101_v62 }
 0x2db   :  { %5970 = vmatprep.mubr.msk.f32.mxu1 %vm1934_vm4, %v11102_v63 }
 0x2de   :  { %2318 = vmatmul.mubr.f32.gmra.mrb[60].mxu1 %v11103_v2 }
 0x2df   :  { %5971 = vmatprep.mubr.msk.f32.mxu1 %vm1934_vm4, %v11104_v3  ;;  %v2433_v3 = vld [vmem:[%s11038_s4 + $0x8] sm:$0xff] }
 0x2e2   :  { %2323 = vmatmul.mubr.f32.gmra.mrb[62].mxu1 %v11105_v8 }
 0x2e3   :  { %5972 = vmatprep.mubr.msk.f32.mxu1 %vm1934_vm4, %v11106_v9 }
 0x2e6   :  { %2328 = vmatmul.mubr.f32.gmra.mrb[64].mxu1 %v11107_v14 }
 0x2e7   :  { %5973 = vmatprep.mubr.msk.f32.mxu1 %vm1934_vm4, %v11108_v17 }
 0x2ea   :  { %2333 = vmatmul.mubr.f32.gmra.mrb[66].mxu1 %v11109_v18 }
 0x2eb   :  { %5974 = vmatprep.mubr.msk.f32.mxu1 %vm1934_vm4, %v11110_v21 }
 0x2ee   :  { %2338 = vmatmul.mubr.f32.gmra.mrb[68].mxu1 %v11111_v22 }
 0x2ef   :  { %5975 = vmatprep.mubr.msk.f32.mxu1 %vm1934_vm4, %v11112_v26 }
 0x2f2   :  { %2343 = vmatmul.mubr.f32.gmra.mrb[70].mxu1 %v11113_v27 }
 0x2f3   :  { %5976 = vmatprep.mubr.msk.f32.mxu1 %vm1934_vm4, %v11114_v32 }
 0x2f6   :  { %2348 = vmatmul.mubr.f32.gmra.mrb[72].mxu1 %v11115_v36 }
 0x2f7   :  { %5977 = vmatprep.mubr.msk.f32.mxu1 %vm1934_vm4, %v11116_v41 }
 0x2fa   :  { %2353 = vmatmul.mubr.f32.gmra.mrb[74].mxu1 %v11117_v50 }
 0x2fb   :  { %5978 = vmatprep.mubr.msk.f32.mxu1 %vm1934_vm4, %v11118_v59 }
 0x2fe   :  { %2358 = vmatmul.mubr.f32.gmra.mrb[76].mxu1 %v11119_v1 }
 0x2ff   :  { %5979 = vmatprep.mubr.msk.f32.mxu1 %vm1934_vm4, %v11120_v12 }
 0x302   :  { %2363 = vmatmul.mubr.f32.gmra.mrb[78].mxu1 %v11121_v19 }
 0x303   :  { %5980 = vmatprep.mubr.msk.f32.mxu1 %vm1934_vm4, %v11122_v28 }
 0x306   :  { %2368 = vmatmul.mubr.f32.gmra.mrb[80].mxu1 %v11123_v7 }
 0x307   :  { %5981 = vmatprep.mubr.msk.f32.mxu1 %vm1934_vm4, %v11124_v35 }
 0x30a   :  { %2373 = vmatmul.mubr.f32.gmra.mrb[82].mxu1 %v11125_v48 }
 0x30b   :  { %5982 = vmatprep.mubr.msk.f32.mxu1 %vm1934_vm4, %v11126_v61 }
 0x30e   :  { %2378 = vmatmul.mubr.f32.gmra.mrb[84].mxu1 %v11127_v38 }
 0x30f   :  { %5983 = vmatprep.mubr.msk.f32.mxu1 %vm1934_vm4, %v11128_v0 }
 0x312   :  { %2383 = vmatmul.mubr.f32.gmra.mrb[86].mxu1 %v11129_v15  ;;  %v11132_v15 = vmov 0.0|0.0  }
 0x313   :  { %5984 = vmatprep.mubr.msk.f32.mxu1 %vm1934_vm4, %v11130_v29 }
 0x316   :  { %2388 = vmatmul.mubr.f32.gmra.mrb[88].mxu1 %v11131_v30 }
 0x317   :  { %5985 = vmatprep.mubr.msk.f32.mxu1 %vm1934_vm4, %v1899_v42 }
 0x31a   :  { %2393 = vmatmul.mubr.f32.gmra.mrb[90].mxu1 %v1898_v60 }
 0x31b   :  { %5986 = vmatprep.mubr.msk.f32.mxu1 %vm1934_vm4, %v1901_v34 }
 0x31e   :  { %2398 = vmatmul.mubr.f32.gmra.mrb[92].mxu1 %v1900_v13 }
 0x31f   :  { %5987 = vmatprep.mubr.msk.f32.mxu1 %vm1934_vm4, %v1903_v31 }
 0x322   :  { %2403 = vmatmul.mubr.f32.gmra.mrb[94].mxu1 %v1902_v37 }
 0x323   :  { %5988 = vmatprep.mubr.msk.f32.mxu1 %vm2456_vm5, %v2433_v3 }
 0x339   :  { %v2073_v56 = vpop.f32.mrb[0].mxu1 }
 0x33a   :  { %v2075_v11 = vpop.f32.mrb[1].mxu1 }
 0x33d   :  { %v2078_v4 = vpop.f32.mrb[2].mxu1 }
 0x33e   :  { %v2080_v20 = vpop.f32.mrb[3].mxu1 }
 0x341   :  { %v9237_v33 = vpop.f32.mrb[4].mxu1 }
 0x342   :  { %v2085_v40 = vpop.f32.mrb[5].mxu1 }
 0x345   :  { %v2088_v52 = vpop.f32.mrb[6].mxu1 }
 0x346   :  { %v2090_v16 = vpop.f32.mrb[7].mxu1 }
 0x349   :  { %v9239_v51 = vpop.f32.mrb[8].mxu1 }
 0x34a   :  { %v2095_v6 = vpop.f32.mrb[9].mxu1 }
 0x34d   :  { %v9241_v44 = vpop.f32.mrb[10].mxu1 }
 0x34e   :  { %v2100_v24 = vpop.f32.mrb[11].mxu1 }
 0x351   :  { %v9243_v25 = vpop.f32.mrb[12].mxu1 }
 0x352   :  { %v2105_v13 = vpop.f32.mrb[13].mxu1 }
 0x355   :  { %v9245_v5 = vpop.f32.mrb[14].mxu1 }
 0x356   :  { %v2110_v23 = vpop.f32.mrb[15].mxu1 }
 0x359   :  { %v9247_v39 = vpop.f32.mrb[16].mxu1 }
 0x35a   :  { %v2115_v60 = vpop.f32.mrb[17].mxu1 }
 0x35d   :  { %v9249_v10 = vpop.f32.mrb[18].mxu1 }
 0x35e   :  { %v2120_v42 = vpop.f32.mrb[19].mxu1 }
 0x361   :  { %v9251_v55 = vpop.f32.mrb[20].mxu1 }
 0x362   :  { %v2125_v34 = vpop.f32.mrb[21].mxu1 }
 0x365   :  { %v9253_v31 = vpop.f32.mrb[22].mxu1 }
 0x366   :  { %v2130_v37 = vpop.f32.mrb[23].mxu1 }
 0x369   :  { %v9255_v46 = vpop.f32.mrb[24].mxu1 }
 0x36a   :  { %v2135_v47 = vpop.f32.mrb[25].mxu1 }
 0x36d   :  { %v9257_v53 = vpop.f32.mrb[26].mxu1 }
 0x36e   :  { %v2140_v49 = vpop.f32.mrb[27].mxu1 }
 0x371   :  { %v9259_v54 = vpop.f32.mrb[28].mxu1 }
 0x372   :  { %v2145_v57 = vpop.f32.mrb[29].mxu1 }
 0x375   :  { %v9261_v58 = vpop.f32.mrb[30].mxu1 }
 0x376   :  { %v2150_v62 = vpop.f32.mrb[31].mxu1 }
 0x379   :  { %v9263_v63 = vpop.f32.mrb[32].mxu1 }
 0x37a   :  { %v2155_v2 = vpop.f32.mrb[33].mxu1 }
 0x37d   :  { %v9269_v8 = vpop.f32.mrb[34].mxu1 }
 0x37e   :  { %v2160_v9 = vpop.f32.mrb[35].mxu1 }
 0x381   :  { %v9271_v14 = vpop.f32.mrb[36].mxu1 }
 0x382   :  { %v2165_v17 = vpop.f32.mrb[37].mxu1 }
 0x385   :  { %v9273_v18 = vpop.f32.mrb[38].mxu1 }
 0x386   :  { %v2170_v21 = vpop.f32.mrb[39].mxu1 }
 0x389   :  { %v9275_v22 = vpop.f32.mrb[40].mxu1 }
 0x38a   :  { %v2175_v26 = vpop.f32.mrb[41].mxu1 }
 0x38d   :  { %v9277_v27 = vpop.f32.mrb[42].mxu1 }
 0x38e   :  { %v2180_v32 = vpop.f32.mrb[43].mxu1 }
 0x391   :  { %v9279_v36 = vpop.f32.mrb[44].mxu1 }
 0x392   :  { %v2185_v41 = vpop.f32.mrb[45].mxu1 }
 0x395   :  { %v9281_v50 = vpop.f32.mrb[46].mxu1 }
 0x396   :  { %v2190_v59 = vpop.f32.mrb[47].mxu1 }
 0x399   :  { %v2289_v1 = vpop.f32.mrb[48].mxu1 }
 0x39a   :  { %v2408_v12 = vmax.f32 %v2073_v56, %v2289_v1  ;;  %v2291_v19 = vpop.f32.mrb[49].mxu1 }
 0x39d   :  { %v2294_v28 = vpop.f32.mrb[50].mxu1 }
 0x39e   :  { %v2409_v7 = vmax.f32 %v2078_v4, %v2294_v28  ;;  %v2296_v35 = vpop.f32.mrb[51].mxu1 }
 0x3a0   :  { %v9283_v48 = vpack.c.bf16 %v2409_v7, %v2408_v12 }
 0x3a1   :  { %v2299_v61 = vpop.f32.mrb[52].mxu1 }
 0x3a2   :  { %v2410_v38 = vmax.f32 %v9237_v33, %v2299_v61  ;;  %v2301_v0 = vpop.f32.mrb[53].mxu1  ;;  %6944 = vmatpush1.bf16.msra.mxu1 %v9283_v48 }
 0x3a3   :  { %6945 = vmatprep.subr.bf16.mxu1 %v11132_v15 }
 0x3a5   :  { %v2304_v29 = vpop.f32.mrb[54].mxu1 }
 0x3a6   :  { %v2411_v30 = vmax.f32 %v2088_v52, %v2304_v29  ;;  %v2306_v11 = vpop.f32.mrb[55].mxu1 }
 0x3a8   :  { %v9288_v20 = vpack.c.bf16 %v2411_v30, %v2410_v38 }
 0x3a9   :  { %v2309_v56 = vpop.f32.mrb[56].mxu1 }
 0x3aa   :  { %v2412_v40 = vmax.f32 %v9239_v51, %v2309_v56  ;;  %v2311_v4 = vpop.f32.mrb[57].mxu1  ;;  %6947 = vmatpush1.bf16.msra.mxu1 %v9288_v20 }
 0x3ab   :  { %6948 = vmatprep.subr.bf16.mxu1 %v11132_v15 }
 0x3ad   :  { %v2314_v16 = vpop.f32.mrb[58].mxu1 }
 0x3ae   :  { %v2413_v33 = vmax.f32 %v9241_v44, %v2314_v16  ;;  %v2316_v6 = vpop.f32.mrb[59].mxu1 }
 0x3b0   :  { %v9294_v24 = vpack.c.bf16 %v2413_v33, %v2412_v40 }
 0x3b1   :  { %v2319_v13 = vpop.f32.mrb[60].mxu1 }
 0x3b2   :  { %v2414_v52 = vmax.f32 %v9243_v25, %v2319_v13  ;;  %v2321_v23 = vpop.f32.mrb[61].mxu1  ;;  %6950 = vmatpush1.bf16.msra.mxu1 %v9294_v24 }
 0x3b3   :  { %6951 = vmatprep.subr.bf16.mxu1 %v11132_v15 }
 0x3b5   :  { %v2324_v51 = vpop.f32.mrb[62].mxu1 }
 0x3b6   :  { %v2415_v60 = vmax.f32 %v9245_v5, %v2324_v51  ;;  %v2326_v42 = vpop.f32.mrb[63].mxu1 }
 0x3b8   :  { %v9300_v34 = vpack.c.bf16 %v2415_v60, %v2414_v52 }
 0x3b9   :  { %v2329_v37 = vpop.f32.mrb[64].mxu1 }
 0x3ba   :  { %v2416_v44 = vmax.f32 %v9247_v39, %v2329_v37  ;;  %v2331_v47 = vpop.f32.mrb[65].mxu1  ;;  %6953 = vmatpush1.bf16.msra.mxu1 %v9300_v34 }
 0x3bb   :  { %6954 = vmatprep.subr.bf16.mxu1 %v11132_v15  ;;  %v2437_v47 = vld [vmem:[%s11038_s4 + $0x28] sm:$0xff] }
 0x3bd   :  { %v2334_v25 = vpop.f32.mrb[66].mxu1 }
 0x3be   :  { %v2417_v49 = vmax.f32 %v9249_v10, %v2334_v25  ;;  %v2336_v57 = vpop.f32.mrb[67].mxu1  ;;  %v2439_v25 = vld [vmem:[%s11038_s4 + $0x38] sm:$0xff] }
 0x3bf   :  { %v2443_v57 = vld [vmem:[%s11038_s4 + $0x58] sm:$0xff] }
 0x3c0   :  { %v9306_v62 = vpack.c.bf16 %v2417_v49, %v2416_v44  ;;  %v2441_v49 = vld [vmem:[%s11038_s4 + $0x48] sm:$0xff] }
 0x3c1   :  { %v2339_v2 = vpop.f32.mrb[68].mxu1 }
 0x3c2   :  { %v2418_v5 = vmax.f32 %v9251_v55, %v2339_v2  ;;  %v2341_v3 = vpop.f32.mrb[69].mxu1  ;;  %6956 = vmatpush1.bf16.msra.mxu1 %v9306_v62  ;;  %v2445_v2 = vld [vmem:[%s11038_s4 + $0x68] sm:$0xff] }
 0x3c3   :  { %6957 = vmatprep.subr.bf16.mxu1 %v11132_v15  ;;  %v2446_v3 = vld [vmem:[%s11038_s4 + $0x70] sm:$0xff] }
 0x3c5   :  { %v2344_v39 = vpop.f32.mrb[70].mxu1 }
 0x3c6   :  { %v2419_v9 = vmax.f32 %v9253_v31, %v2344_v39  ;;  %v2346_v17 = vpop.f32.mrb[71].mxu1  ;;  %v2449_v39 = vld [vmem:[%s11038_s4 + $0x88] sm:$0xff] }
 0x3c7   :  { %v2451_v17 = vld [vmem:[%s11038_s4 + $0x98] sm:$0xff] }
 0x3c8   :  { %v9312_v21 = vpack.c.bf16 %v2419_v9, %v2418_v5  ;;  %v2447_v5 = vld [vmem:[%s11038_s4 + $0x78] sm:$0xff]  ;;  %v2448_v9 = vld [vmem:[%s11038_s4 + $0x80] sm:$0xff] }
 0x3c9   :  { %v2349_v26 = vpop.f32.mrb[72].mxu1 }
 0x3ca   :  { %v2420_v10 = vmax.f32 %v9255_v46, %v2349_v26  ;;  %v2351_v32 = vpop.f32.mrb[73].mxu1  ;;  %6959 = vmatpush1.bf16.msra.mxu1 %v9312_v21  ;;  %v2453_v26 = vld [vmem:[%s11038_s4 + $0xa8] sm:$0xff] }
 0x3cb   :  { %6960 = vmatprep.subr.bf16.mxu1 %v11132_v15  ;;  %v2455_v32 = vld [vmem:[%s11038_s4 + $0xb8] sm:$0xff] }
 0x3cd   :  { %v2354_v55 = vpop.f32.mrb[74].mxu1 }
 0x3ce   :  { %v2421_v41 = vmax.f32 %v9257_v53, %v2354_v55  ;;  %v2356_v59 = vpop.f32.mrb[75].mxu1  ;;  %v2454_v55 = vld [vmem:[%s11038_s4 + $0xb0] sm:$0xff] }
 0x3cf   :  { %v6000_v59 = vld [vmem:[%s11038_s4 + $0xc0] sm:$0xff] }
 0x3d0   :  { %v9318_v1 = vpack.c.bf16 %v2421_v41, %v2420_v10  ;;  %v2452_v10 = vld [vmem:[%s11038_s4 + $0xa0] sm:$0xff]  ;;  %v6001_v41 = vld [vmem:[%s11038_s4 + $0xc8] sm:$0xff] }
 0x3d1   :  { %v2359_v12 = vpop.f32.mrb[76].mxu1 }
 0x3d2   :  { %v2422_v31 = vmax.f32 %v9259_v54, %v2359_v12  ;;  %v2361_v19 = vpop.f32.mrb[77].mxu1  ;;  %6962 = vmatpush1.bf16.msra.mxu1 %v9318_v1  ;;  %v6002_v12 = vld [vmem:[%s11038_s4 + $0xd0] sm:$0xff] }
 0x3d3   :  { %6963 = vmatprep.subr.bf16.mxu1 %v11132_v15  ;;  %v6004_v19 = vld [vmem:[%s11038_s4 + $0xe0] sm:$0xff] }
 0x3d5   :  { %v2364_v46 = vpop.f32.mrb[78].mxu1 }
 0x3d6   :  { %v2423_v28 = vmax.f32 %v9261_v58, %v2364_v46  ;;  %v2366_v7 = vpop.f32.mrb[79].mxu1  ;;  %v6007_v46 = vld [vmem:[%s11038_s4 + $0xf8] sm:$0xff] }
 0x3d7   :  { %v6009_v7 = vld [vmem:[%s11038_s4 + $0x108] sm:$0xff] }
 0x3d8   :  { %v9324_v35 = vpack.c.bf16 %v2423_v28, %v2422_v31  ;;  %v6005_v31 = vld [vmem:[%s11038_s4 + $0xe8] sm:$0xff]  ;;  %v6006_v28 = vld [vmem:[%s11038_s4 + $0xf0] sm:$0xff] }
 0x3d9   :  { %v2369_v61 = vpop.f32.mrb[80].mxu1 }
 0x3da   :  { %v2424_v53 = vmax.f32 %v9263_v63, %v2369_v61  ;;  %v2371_v38 = vpop.f32.mrb[81].mxu1  ;;  %6965 = vmatpush1.bf16.msra.mxu1 %v9324_v35  ;;  %v6011_v61 = vld [vmem:[%s11038_s4 + $0x118] sm:$0xff] }
 0x3db   :  { %6966 = vmatprep.subr.bf16.mxu1 %v11132_v15  ;;  %v6013_v38 = vld [vmem:[%s11038_s4 + $0x128] sm:$0xff] }
 0x3dd   :  { %v2374_v54 = vpop.f32.mrb[82].mxu1 }
 0x3de   :  { %v2425_v0 = vmax.f32 %v9269_v8, %v2374_v54  ;;  %v2376_v29 = vpop.f32.mrb[83].mxu1  ;;  %v6012_v54 = vld [vmem:[%s11038_s4 + $0x120] sm:$0xff] }
 0x3df   :  { %v6014_v29 = vld [vmem:[%s11038_s4 + $0x130] sm:$0xff] }
 0x3e0   :  { %v9330_v30 = vpack.c.bf16 %v2425_v0, %v2424_v53  ;;  %v6010_v53 = vld [vmem:[%s11038_s4 + $0x110] sm:$0xff]  ;;  %v6015_v0 = vld [vmem:[%s11038_s4 + $0x138] sm:$0xff] }
 0x3e1   :  { %v2379_v11 = vpop.f32.mrb[84].mxu1 }
 0x3e2   :  { %v2426_v58 = vmax.f32 %v9271_v14, %v2379_v11  ;;  %v2381_v56 = vpop.f32.mrb[85].mxu1  ;;  %6968 = vmatpush1.bf16.msra.mxu1 %v9330_v30  ;;  %v6016_v11 = vld [vmem:[%s11038_s4 + $0x140] sm:$0xff] }
 0x3e3   :  { %6969 = vmatprep.subr.bf16.mxu1 %v11132_v15  ;;  %v6018_v56 = vld [vmem:[%s11038_s4 + $0x150] sm:$0xff] }
 0x3e5   :  { %v2384_v63 = vpop.f32.mrb[86].mxu1 }
 0x3e6   :  { %v2427_v40 = vmax.f32 %v9273_v18, %v2384_v63  ;;  %v2386_v4 = vpop.f32.mrb[87].mxu1  ;;  %v6021_v63 = vld [vmem:[%s11038_s4 + $0x168] sm:$0xff] }
 0x3e7   :  { %v6023_v4 = vld [vmem:[%s11038_s4 + $0x178] sm:$0xff] }
 0x3e8   :  { %v9336_v16 = vpack.c.bf16 %v2427_v40, %v2426_v58  ;;  %v6019_v58 = vld [vmem:[%s11038_s4 + $0x158] sm:$0xff]  ;;  %v6020_v40 = vld [vmem:[%s11038_s4 + $0x160] sm:$0xff] }
 0x3e9   :  { %v2389_v33 = vpop.f32.mrb[88].mxu1 }
 0x3ea   :  { %v2428_v8 = vmax.f32 %v9275_v22, %v2389_v33  ;;  %v2391_v6 = vpop.f32.mrb[89].mxu1  ;;  %6971 = vmatpush1.bf16.msra.mxu1 %v9336_v16  ;;  %v2816_v33 = vld [vmem:[%s11041_s7] sm:$0xff] }
 0x3eb   :  { %6972 = vmatprep.subr.bf16.mxu1 %v11132_v15 }
 0x3ed   :  { %v2394_v14 = vpop.f32.mrb[90].mxu1 }
 0x3ee   :  { %v2429_v13 = vmax.f32 %v9277_v27, %v2394_v14  ;;  %v2396_v52 = vpop.f32.mrb[91].mxu1  ;;  %v2432_v27 = vld [vmem:[%s11038_s4] sm:$0xff] }
 0x3f0   :  { %v9342_v23 = vpack.c.bf16 %v2429_v13, %v2428_v8  ;;  %v6160_v8 = vld [vmem:[%s11041_s7 + $0xc0] sm:$0xff] }
 0x3f1   :  { %v2399_v51 = vpop.f32.mrb[92].mxu1  ;;  %6666 = vmatprep.mubr.msk.f32.mxu0 %vm2824_vm6, %v6160_v8 }
 0x3f2   :  { %v2430_v18 = vmax.f32 %v9279_v36, %v2399_v51  ;;  %v2401_v60 = vpop.f32.mrb[93].mxu1  ;;  %6974 = vmatpush1.bf16.msra.mxu1 %v9342_v23  ;;  %v2435_v36 = vld [vmem:[%s11038_s4 + $0x18] sm:$0xff] }
 0x3f3   :  { %6975 = vmatprep.subr.bf16.mxu1 %v11132_v15 }
 0x3f5   :  { %v2404_v22 = vpop.f32.mrb[94].mxu1 }
 0x3f6   :  { %v2431_v42 = vmax.f32 %v9281_v50, %v2404_v22  ;;  %v2406_v37 = vpop.f32.mrb[95].mxu1  ;;  %v2434_v50 = vld [vmem:[%s11038_s4 + $0x10] sm:$0xff] }
 0x3f8   :  { %v9348_v44 = vpack.c.bf16 %v2431_v42, %v2430_v18 }
 0x3fa   :  { %6977 = vmatpush1.bf16.msra.mxu1 %v9348_v44 }
 0x3fb   :  { %6978 = vmatprep.subr.bf16.mxu1 %v11132_v15 }
 0x3fd   :  { %2558 = vmatmul.mubr.f32.vlgmr.msra.gmra.mrb[96].mxu1 %v2432_v27 }
 0x3fe   :  { %6980 = vmatpush1.bf16.msra.mxu1 %v9283_v48  ;;  %5989 = vmatprep.mubr.msk.f32.mxu1 %vm2456_vm5, %v2435_v36  ;;  %v2436_v48 = vld [vmem:[%s11038_s4 + $0x20] sm:$0xff] }
 0x3ff   :  { %6981 = vmatprep.subr.bf16.mxu1 %v11132_v15 }
 0x401   :  { %2563 = vmatmul.mubr.f32.gmra.mrb[98].mxu1 %v2434_v50 }
 0x402   :  { %6983 = vmatpush1.bf16.msra.mxu1 %v9288_v20  ;;  %5990 = vmatprep.mubr.msk.f32.mxu1 %vm2456_vm5, %v2437_v47  ;;  %v2438_v20 = vld [vmem:[%s11038_s4 + $0x30] sm:$0xff] }
 0x403   :  { %6984 = vmatprep.subr.bf16.mxu1 %v11132_v15 }
 0x405   :  { %2568 = vmatmul.mubr.f32.gmra.mrb[100].mxu1 %v2436_v48 }
 0x406   :  { %6986 = vmatpush1.bf16.msra.mxu1 %v9294_v24  ;;  %5991 = vmatprep.mubr.msk.f32.mxu1 %vm2456_vm5, %v2439_v25  ;;  %v2440_v24 = vld [vmem:[%s11038_s4 + $0x40] sm:$0xff] }
 0x407   :  { %6987 = vmatprep.subr.bf16.mxu1 %v11132_v15 }
 0x409   :  { %2573 = vmatmul.mubr.f32.gmra.mrb[102].mxu1 %v2438_v20 }
 0x40a   :  { %6989 = vmatpush1.bf16.msra.mxu1 %v9300_v34  ;;  %5992 = vmatprep.mubr.msk.f32.mxu1 %vm2456_vm5, %v2441_v49  ;;  %v2442_v34 = vld [vmem:[%s11038_s4 + $0x50] sm:$0xff] }
 0x40b   :  { %6990 = vmatprep.subr.bf16.mxu1 %v11132_v15 }
 0x40d   :  { %2578 = vmatmul.mubr.f32.gmra.mrb[104].mxu1 %v2440_v24 }
 0x40e   :  { %6992 = vmatpush1.bf16.msra.mxu1 %v9306_v62  ;;  %5993 = vmatprep.mubr.msk.f32.mxu1 %vm2456_vm5, %v2443_v57  ;;  %v2444_v62 = vld [vmem:[%s11038_s4 + $0x60] sm:$0xff] }
 0x40f   :  { %6993 = vmatprep.subr.bf16.mxu1 %v11132_v15 }
 0x411   :  { %2583 = vmatmul.mubr.f32.gmra.mrb[106].mxu1 %v2442_v34 }
 0x412   :  { %6995 = vmatpush1.bf16.msra.mxu1 %v9312_v21  ;;  %5994 = vmatprep.mubr.msk.f32.mxu1 %vm2456_vm5, %v2445_v2  ;;  %v2450_v21 = vld [vmem:[%s11038_s4 + $0x90] sm:$0xff] }
 0x413   :  { %6996 = vmatprep.subr.bf16.mxu1 %v11132_v15 }
 0x415   :  { %2588 = vmatmul.mubr.f32.gmra.mrb[108].mxu1 %v2444_v62 }
 0x416   :  { %6998 = vmatpush1.bf16.msra.mxu1 %v9318_v1  ;;  %5995 = vmatprep.mubr.msk.f32.mxu1 %vm2456_vm5, %v2447_v5  ;;  %v6003_v1 = vld [vmem:[%s11038_s4 + $0xd8] sm:$0xff] }
 0x417   :  { %6999 = vmatprep.subr.bf16.mxu1 %v11132_v15 }
 0x419   :  { %2593 = vmatmul.mubr.f32.gmra.mrb[110].mxu1 %v2446_v3 }
 0x41a   :  { %7001 = vmatpush1.bf16.msra.mxu1 %v9324_v35  ;;  %5996 = vmatprep.mubr.msk.f32.mxu1 %vm2456_vm5, %v2449_v39  ;;  %v6008_v35 = vld [vmem:[%s11038_s4 + $0x100] sm:$0xff] }
 0x41b   :  { %7002 = vmatprep.subr.bf16.mxu1 %v11132_v15 }
 0x41d   :  { %2598 = vmatmul.mubr.f32.gmra.mrb[112].mxu1 %v2448_v9 }
 0x41e   :  { %7004 = vmatpush1.bf16.msra.mxu1 %v9330_v30  ;;  %5997 = vmatprep.mubr.msk.f32.mxu1 %vm2456_vm5, %v2451_v17  ;;  %v6017_v30 = vld [vmem:[%s11038_s4 + $0x148] sm:$0xff] }
 0x41f   :  { %7005 = vmatprep.subr.bf16.mxu1 %v11132_v15 }
 0x421   :  { %2603 = vmatmul.mubr.f32.gmra.mrb[114].mxu1 %v2450_v21 }
 0x422   :  { %7007 = vmatpush1.bf16.msra.mxu1 %v9336_v16  ;;  %5998 = vmatprep.mubr.msk.f32.mxu1 %vm2456_vm5, %v2453_v26  ;;  %v6022_v16 = vld [vmem:[%s11038_s4 + $0x170] sm:$0xff] }
 0x423   :  { %7008 = vmatprep.subr.bf16.mxu1 %v11132_v15 }
 0x425   :  { %2608 = vmatmul.mubr.f32.gmra.mrb[116].mxu1 %v2452_v10 }
 0x426   :  { %7010 = vmatpush1.bf16.msra.mxu1 %v9342_v23  ;;  %5999 = vmatprep.mubr.msk.f32.mxu1 %vm2456_vm5, %v2455_v32 }
 0x427   :  { %7011 = vmatprep.subr.bf16.mxu1 %v11132_v15 }
 0x429   :  { %2613 = vmatmul.mubr.f32.gmra.mrb[118].mxu1 %v2454_v55 }
 0x42a   :  { %7013 = vmatpush1.bf16.msra.mxu1 %v9348_v44  ;;  %6024 = vmatprep.mubr.msk.f32.mxu1 %vm2456_vm5, %v6001_v41 }
 0x42d   :  { %2744 = vmatmul.mubr.f32.vlgmr.msra.gmra.mrb[120].mxu1 %v6000_v59 }
 0x42e   :  { %6025 = vmatprep.mubr.msk.f32.mxu1 %vm2456_vm5, %v6003_v1 }
 0x431   :  { %2749 = vmatmul.mubr.f32.gmra.mrb[122].mxu1 %v6002_v12 }
 0x432   :  { %6026 = vmatprep.mubr.msk.f32.mxu1 %vm2456_vm5, %v6005_v31 }
 0x435   :  { %2754 = vmatmul.mubr.f32.gmra.mrb[124].mxu1 %v6004_v19 }
 0x436   :  { %6027 = vmatprep.mubr.msk.f32.mxu1 %vm2456_vm5, %v6007_v46 }
 0x439   :  { %2759 = vmatmul.mubr.f32.gmra.mrb[126].mxu1 %v6006_v28 }
 0x43a   :  { %6028 = vmatprep.mubr.msk.f32.mxu1 %vm2456_vm5, %v6009_v7 }
 0x43d   :  { %2764 = vmatmul.mubr.f32.gmra.mrb[128].mxu1 %v6008_v35 }
 0x43e   :  { %6029 = vmatprep.mubr.msk.f32.mxu1 %vm2456_vm5, %v6011_v61 }
 0x441   :  { %2769 = vmatmul.mubr.f32.gmra.mrb[130].mxu1 %v6010_v53 }
 0x442   :  { %6030 = vmatprep.mubr.msk.f32.mxu1 %vm2456_vm5, %v6013_v38 }
 0x445   :  { %2774 = vmatmul.mubr.f32.gmra.mrb[132].mxu1 %v6012_v54 }
 0x446   :  { %6031 = vmatprep.mubr.msk.f32.mxu1 %vm2456_vm5, %v6015_v0 }
 0x449   :  { %2779 = vmatmul.mubr.f32.gmra.mrb[134].mxu1 %v6014_v29 }
 0x44a   :  { %6032 = vmatprep.mubr.msk.f32.mxu1 %vm2456_vm5, %v6017_v30 }
 0x44d   :  { %2784 = vmatmul.mubr.f32.gmra.mrb[136].mxu1 %v6016_v11 }
 0x44e   :  { %6033 = vmatprep.mubr.msk.f32.mxu1 %vm2456_vm5, %v6019_v58 }
 0x451   :  { %2789 = vmatmul.mubr.f32.gmra.mrb[138].mxu1 %v6018_v56 }
 0x452   :  { %6034 = vmatprep.mubr.msk.f32.mxu1 %vm2456_vm5, %v6021_v63 }
 0x455   :  { %2794 = vmatmul.mubr.f32.gmra.mrb[140].mxu1 %v6020_v40 }
 0x456   :  { %6035 = vmatprep.mubr.msk.f32.mxu1 %vm2456_vm5, %v6023_v4 }
 0x459   :  { %2799 = vmatmul.mubr.f32.gmra.mrb[142].mxu1 %v6022_v16 }
 0x45a   :  { %6558 = vmatprep.mubr.msk.f32.mxu1 %vm2824_vm6, %v2816_v33 }
 0x4d0   :  { %v2559_v6 = vpop.f32.mrb[96].mxu1 }
 0x4d1   :  { %v2561_v14 = vpop.f32.mrb[97].mxu1 }
 0x4d4   :  { %v2564_v13 = vpop.f32.mrb[98].mxu1 }
 0x4d5   :  { %v2566_v52 = vpop.f32.mrb[99].mxu1 }
 0x4d8   :  { %v2569_v23 = vpop.f32.mrb[100].mxu1 }
 0x4d9   :  { %v2571_v51 = vpop.f32.mrb[101].mxu1 }
 0x4da   :  { %v2817_v51 = vld [vmem:[%s11041_s7 + $0x8] sm:$0xff] }
 0x4dc   :  { %v2574_v18 = vpop.f32.mrb[102].mxu1 }
 0x4dd   :  { %v2576_v60 = vpop.f32.mrb[103].mxu1 }
 0x4de   :  { %v2818_v60 = vld [vmem:[%s11041_s7 + $0x10] sm:$0xff] }
 0x4e0   :  { %v2579_v22 = vpop.f32.mrb[104].mxu1 }
 0x4e1   :  { %v2581_v42 = vpop.f32.mrb[105].mxu1 }
 0x4e2   :  { %v2820_v42 = vld [vmem:[%s11041_s7 + $0x20] sm:$0xff] }
 0x4e4   :  { %v2584_v37 = vpop.f32.mrb[106].mxu1 }
 0x4e5   :  { %v2586_v44 = vpop.f32.mrb[107].mxu1 }
 0x4e6   :  { %v2822_v44 = vld [vmem:[%s11041_s7 + $0x30] sm:$0xff] }
 0x4e8   :  { %v2589_v27 = vpop.f32.mrb[108].mxu1 }
 0x4e9   :  { %v2591_v36 = vpop.f32.mrb[109].mxu1 }
 0x4ea   :  { %v6044_v36 = vld [vmem:[%s11041_s7 + $0x40] sm:$0xff] }
 0x4ec   :  { %v2594_v50 = vpop.f32.mrb[110].mxu1 }
 0x4ed   :  { %v2596_v47 = vpop.f32.mrb[111].mxu1 }
 0x4ee   :  { %v6063_v47 = vld [vmem:[%s11039_s5 + $0x108] sm:$0xff] }
 0x4f0   :  { %v2599_v48 = vpop.f32.mrb[112].mxu1 }
 0x4f1   :  { %v2601_v25 = vpop.f32.mrb[113].mxu1 }
 0x4f2   :  { %v6060_v25 = vld [vmem:[%s11039_s5 + $0xf0] sm:$0xff] }
 0x4f4   :  { %v2604_v20 = vpop.f32.mrb[114].mxu1 }
 0x4f5   :  { %v2606_v49 = vpop.f32.mrb[115].mxu1 }
 0x4f6   :  { %v6065_v49 = vld [vmem:[%s11039_s5 + $0x118] sm:$0xff] }
 0x4f8   :  { %v9547_v24 = vpop.f32.mrb[116].mxu1 }
 0x4f9   :  { %v2611_v57 = vpop.f32.mrb[117].mxu1 }
 0x4fa   :  { %v6045_v57 = vld [vmem:[%s11041_s7 + $0x48] sm:$0xff] }
 0x4fc   :  { %v9549_v34 = vpop.f32.mrb[118].mxu1 }
 0x4fd   :  { %v2616_v2 = vpop.f32.mrb[119].mxu1 }
 0x4fe   :  { %v6046_v2 = vld [vmem:[%s11041_s7 + $0x50] sm:$0xff] }
 0x500   :  { %v2745_v62 = vpop.f32.mrb[120].mxu1 }
 0x501   :  { %v2804_v5 = vmax.f32 %v2559_v6, %v2745_v62  ;;  %v2747_v3 = vpop.f32.mrb[121].mxu1 }
 0x502   :  { %v6048_v3 = vld [vmem:[%s11041_s7 + $0x60] sm:$0xff] }
 0x504   :  { %v2750_v39 = vpop.f32.mrb[122].mxu1 }
 0x505   :  { %v2805_v9 = vmax.f32 %v2564_v13, %v2750_v39  ;;  %v2752_v17 = vpop.f32.mrb[123].mxu1  ;;  %v6049_v39 = vld [vmem:[%s11041_s7 + $0x68] sm:$0xff] }
 0x506   :  { %v6051_v17 = vld [vmem:[%s11041_s7 + $0x78] sm:$0xff] }
 0x507   :  { %v9551_v21 = vpack.c.bf16 %v2805_v9, %v2804_v5  ;;  %v6047_v5 = vld [vmem:[%s11041_s7 + $0x58] sm:$0xff]  ;;  %v6050_v9 = vld [vmem:[%s11041_s7 + $0x70] sm:$0xff] }
 0x508   :  { %v2755_v26 = vpop.f32.mrb[124].mxu1 }
 0x509   :  { %v2806_v10 = vmax.f32 %v2569_v23, %v2755_v26  ;;  %v2757_v32 = vpop.f32.mrb[125].mxu1  ;;  %7015 = vmatprep.subr.bf16.mxu1 %v9551_v21  ;;  %7171 = vmatprep.subr.bf16.mxu0 %v9551_v21  ;;  %v11133_v26 = vmov 0.0  }
 0x50a   :  { %7017 = vmatpush3.bf16.msra.mxu1 %v9551_v21  ;;  %7173 = vmatpush3.bf16.msra.mxu0 %v9551_v21  ;;  %v6066_v32 = vld [vmem:[%s11039_s5 + $0x120] sm:$0xff] }
 0x50c   :  { %v2760_v55 = vpop.f32.mrb[126].mxu1 }
 0x50d   :  { %v2807_v41 = vmax.f32 %v2574_v18, %v2760_v55  ;;  %v2762_v59 = vpop.f32.mrb[127].mxu1  ;;  %v6161_v18 = vld [vmem:[%s11041_s7 + $0xc8] sm:$0xff] }
 0x50e   :  { %v6071_v59 = vld [vmem:[%s11039_s5 + $0x148] sm:$0xff] }
 0x50f   :  { %v9557_v1 = vpack.c.bf16 %v2807_v41, %v2806_v10  ;;  %v6064_v10 = vld [vmem:[%s11039_s5 + $0x110] sm:$0xff]  ;;  %v6069_v41 = vld [vmem:[%s11039_s5 + $0x138] sm:$0xff] }
 0x510   :  { %v2765_v12 = vpop.f32.mrb[128].mxu1  ;;  %v7068_v55 = vpack.c.bf16 %v6066_v32, %v6064_v10 }
 0x511   :  { %v2808_v31 = vmax.f32 %v2579_v22, %v2765_v12  ;;  %v2767_v19 = vpop.f32.mrb[129].mxu1  ;;  %7019 = vmatprep.subr.bf16.mxu1 %v9557_v1  ;;  %7175 = vmatprep.subr.bf16.mxu0 %v9557_v1  ;;  %v2819_v22 = vld [vmem:[%s11041_s7 + $0x18] sm:$0xff]  ;;  %v7070_v12 = vpack.c.bf16 %v6071_v59, %v6069_v41 }
 0x512   :  { %7021 = vmatpush3.bf16.msra.mxu1 %v9557_v1  ;;  %7177 = vmatpush3.bf16.msra.mxu0 %v9557_v1  ;;  %v6070_v19 = vld [vmem:[%s11039_s5 + $0x140] sm:$0xff] }
 0x514   :  { %v2770_v46 = vpop.f32.mrb[130].mxu1 }
 0x515   :  { %v2809_v28 = vmax.f32 %v2584_v37, %v2770_v46  ;;  %v2772_v7 = vpop.f32.mrb[131].mxu1  ;;  %v2821_v37 = vld [vmem:[%s11041_s7 + $0x28] sm:$0xff]  ;;  %v6073_v46 = vld [vmem:[%s11039_s5 + $0x158] sm:$0xff] }
 0x516   :  { %v6075_v7 = vld [vmem:[%s11039_s5 + $0x168] sm:$0xff] }
 0x517   :  { %v9563_v35 = vpack.c.bf16 %v2809_v28, %v2808_v31  ;;  %v6068_v31 = vld [vmem:[%s11039_s5 + $0x130] sm:$0xff] }
 0x518   :  { %v2775_v61 = vpop.f32.mrb[132].mxu1  ;;  %v7072_v28 = vpack.c.bf16 %v6070_v19, %v6068_v31  ;;  %v2954_v31 = vld [vmem:[%s11039_s5] sm:$0xff]  ;;  %v2956_v19 = vld [vmem:[%s11039_s5 + $0x10] sm:$0xff] }
 0x519   :  { %v2810_v53 = vmax.f32 %v2589_v27, %v2775_v61  ;;  %v2777_v38 = vpop.f32.mrb[133].mxu1  ;;  %7023 = vmatprep.subr.bf16.mxu1 %v9563_v35  ;;  %7179 = vmatprep.subr.bf16.mxu0 %v9563_v35  ;;  %v2823_v27 = vld [vmem:[%s11041_s7 + $0x38] sm:$0xff]  ;;  %v6072_v61 = vld [vmem:[%s11039_s5 + $0x150] sm:$0xff] }
 0x51a   :  { %7025 = vmatpush3.bf16.msra.mxu1 %v9563_v35  ;;  %7181 = vmatpush3.bf16.msra.mxu0 %v9563_v35  ;;  %v7074_v38 = vpack.c.bf16 %v6075_v7, %v6073_v46  ;;  %v2959_v46 = vld [vmem:[%s11039_s5 + $0x28] sm:$0xff]  ;;  %v7092_v7 = vpack.c.bf16 %v2956_v19, %v2954_v31 }
 0x51b   :  { %v2983_v19 = vld [vmem:[%s11039_s5 + $0xe8] sm:$0xff] }
 0x51c   :  { %v2780_v54 = vpop.f32.mrb[134].mxu1 }
 0x51d   :  { %v2811_v0 = vmax.f32 %v2594_v50, %v2780_v54  ;;  %v2782_v29 = vpop.f32.mrb[135].mxu1  ;;  %v6061_v50 = vld [vmem:[%s11039_s5 + $0xf8] sm:$0xff] }
 0x51e   :  { %v6079_v29 = vld [vmem:[%s11039_s5 + $0x188] sm:$0xff] }
 0x51f   :  { %v9569_v30 = vpack.c.bf16 %v2811_v0, %v2810_v53  ;;  %v6074_v53 = vld [vmem:[%s11039_s5 + $0x160] sm:$0xff]  ;;  %v6077_v0 = vld [vmem:[%s11039_s5 + $0x178] sm:$0xff] }
 0x520   :  { %v2785_v11 = vpop.f32.mrb[136].mxu1  ;;  %v7076_v54 = vpack.c.bf16 %v6074_v53, %v6072_v61 }
 0x521   :  { %v2812_v58 = vmax.f32 %v2599_v48, %v2785_v11  ;;  %v2787_v56 = vpop.f32.mrb[137].mxu1  ;;  %7027 = vmatprep.subr.bf16.mxu1 %v9569_v30  ;;  %7183 = vmatprep.subr.bf16.mxu0 %v9569_v30  ;;  %v7062_v48 = vpack.c.bf16 %v6063_v47, %v6061_v50  ;;  %v7078_v11 = vpack.c.bf16 %v6079_v29, %v6077_v0  ;;  %v6162_v50 = vld [vmem:[%s11041_s7 + $0xd0] sm:$0xff]  ;;  %v6163_v47 = vld [vmem:[%s11041_s7 + $0xd8] sm:$0xff]  ;;  %v2963_v29 = vld [vmem:[%s11039_s5 + $0x48] sm:$0xff] }
 0x522   :  { %7029 = vmatpush3.bf16.msra.mxu1 %v9569_v30  ;;  %7185 = vmatpush3.bf16.msra.mxu0 %v9569_v30  ;;  %v6078_v56 = vld [vmem:[%s11039_s5 + $0x180] sm:$0xff] }
 0x524   :  { %v2790_v63 = vpop.f32.mrb[138].mxu1 }
 0x525   :  { %v2813_v40 = vmax.f32 %v2604_v20, %v2790_v63  ;;  %v2792_v4 = vpop.f32.mrb[139].mxu1  ;;  %v6062_v20 = vld [vmem:[%s11039_s5 + $0x100] sm:$0xff] }
 0x526   :  { %v6083_v4 = vld [vmem:[%s11039_s5 + $0x1a8] sm:$0xff] }
 0x527   :  { %v9575_v16 = vpack.c.bf16 %v2813_v40, %v2812_v58  ;;  %v6076_v58 = vld [vmem:[%s11039_s5 + $0x170] sm:$0xff]  ;;  %v6081_v40 = vld [vmem:[%s11039_s5 + $0x198] sm:$0xff] }
 0x528   :  { %v2795_v33 = vpop.f32.mrb[140].mxu1  ;;  %v7080_v63 = vpack.c.bf16 %v6078_v56, %v6076_v58 }
 0x529   :  { %v2814_v8 = vmax.f32 %v9547_v24, %v2795_v33  ;;  %v2797_v6 = vpop.f32.mrb[141].mxu1  ;;  %7031 = vmatprep.subr.bf16.mxu1 %v9575_v16  ;;  %7187 = vmatprep.subr.bf16.mxu0 %v9575_v16  ;;  %v6067_v24 = vld [vmem:[%s11039_s5 + $0x128] sm:$0xff]  ;;  %v7082_v33 = vpack.c.bf16 %v6083_v4, %v6081_v40  ;;  %v2962_v40 = vld [vmem:[%s11039_s5 + $0x40] sm:$0xff]  ;;  %v2964_v4 = vld [vmem:[%s11039_s5 + $0x50] sm:$0xff] }
 0x52a   :  { %7033 = vmatpush3.bf16.msra.mxu1 %v9575_v16  ;;  %7189 = vmatpush3.bf16.msra.mxu0 %v9575_v16  ;;  %v7066_v62 = vpack.c.bf16 %v6067_v24, %v6065_v49  ;;  %v6082_v6 = vld [vmem:[%s11039_s5 + $0x1a0] sm:$0xff]  ;;  %v6167_v49 = vld [vmem:[%s11041_s7 + $0xf8] sm:$0xff] }
 0x52b   :  { %v6214_v24 = vld [vmem:[%s11041_s7 + $0x100] sm:$0xff] }
 0x52c   :  { %v2800_v14 = vpop.f32.mrb[142].mxu1 }
 0x52d   :  { %v2815_v13 = vmax.f32 %v9549_v34, %v2800_v14  ;;  %v2802_v52 = vpop.f32.mrb[143].mxu1  ;;  %v7064_v34 = vpack.c.bf16 %v6062_v20, %v6060_v25  ;;  %v6165_v25 = vld [vmem:[%s11041_s7 + $0xe8] sm:$0xff]  ;;  %v6166_v20 = vld [vmem:[%s11041_s7 + $0xf0] sm:$0xff] }
 0x52e   :  { %v6087_v52 = vld [vmem:[%s11039_s5 + $0x1c8] sm:$0xff] }
 0x52f   :  { %v9583_v23 = vpack.c.bf16 %v2815_v13, %v2814_v8  ;;  %v6080_v8 = vld [vmem:[%s11039_s5 + $0x190] sm:$0xff]  ;;  %v6085_v13 = vld [vmem:[%s11039_s5 + $0x1b8] sm:$0xff] }
 0x530   :  { %v7084_v14 = vpack.c.bf16 %v6082_v6, %v6080_v8  ;;  %v2967_v8 = vld [vmem:[%s11039_s5 + $0x68] sm:$0xff]  ;;  %v2969_v6 = vld [vmem:[%s11039_s5 + $0x78] sm:$0xff] }
 0x531   :  { %7035 = vmatprep.subr.bf16.mxu1 %v9583_v23  ;;  %7191 = vmatprep.subr.bf16.mxu0 %v9583_v23 }
 0x532   :  { %7037 = vmatpush3.bf16.msra.mxu1 %v9583_v23  ;;  %7193 = vmatpush3.bf16.msra.mxu0 %v9583_v23 }
 0x533   :  { %7039 = vmatprep.subr.bf16.mxu1 %v9551_v21  ;;  %7223 = vmatprep.subr.bf16.mxu0 %v9551_v21 }
 0x535   :  { %6559 = vmatmul.mubr.msk.f32.vlgmr.msra.gmra.mrb[144].mxu1 %vm2824_vm6, %v2817_v51  ;;  %6667 = vmatmul.mubr.msk.f32.vlgmr.msra.gmra.mrb[48].mxu0 %vm2824_vm6, %v6161_v18  ;;  %v7086_v51 = vpack.c.bf16 %v6087_v52, %v6085_v13  ;;  %v6084_v18 = vld [vmem:[%s11039_s5 + $0x1b0] sm:$0xff]  ;;  %v7102_v13 = vpack.c.bf16 %v2969_v6, %v2967_v8  ;;  %v2966_v52 = vld [vmem:[%s11039_s5 + $0x60] sm:$0xff]  ;;  %v6139_v6 = vld [vmem:[%s11039_s5 + $0x268] sm:$0xff] }
 0x536   :  { %7041 = vmatpush3.bf16.msra.mxu1 %v9551_v21  ;;  %7225 = vmatpush3.bf16.msra.mxu0 %v9551_v21  ;;  %v6136_v8 = vld [vmem:[%s11039_s5 + $0x250] sm:$0xff] }
 0x537   :  { %7043 = vmatprep.subr.bf16.mxu1 %v9557_v1  ;;  %7227 = vmatprep.subr.bf16.mxu0 %v9557_v1 }
 0x538   :  { %6561 = vmatprep.mubr.msk.f32.mxu1 %vm2824_vm6, %v2818_v60  ;;  %v6086_v60 = vld [vmem:[%s11039_s5 + $0x1c0] sm:$0xff]  ;;  %6669 = vmatprep.mubr.msk.f32.mxu0 %vm2824_vm6, %v6162_v50 }
 0x539   :  { %6562 = vmatmul.mubr.msk.f32.gmra.mrb[146].mxu1 %vm2824_vm6, %v2819_v22  ;;  %v7088_v22 = vpack.c.bf16 %v6086_v60, %v6084_v18  ;;  %6670 = vmatmul.mubr.msk.f32.gmra.mrb[50].mxu0 %vm2824_vm6, %v6163_v47  ;;  %v2975_v47 = vld [vmem:[%s11039_s5 + $0xa8] sm:$0xff] }
 0x53a   :  { %7045 = vmatpush3.bf16.msra.mxu1 %v9557_v1  ;;  %7229 = vmatpush3.bf16.msra.mxu0 %v9557_v1 }
 0x53b   :  { %7047 = vmatprep.subr.bf16.mxu1 %v9563_v35  ;;  %7231 = vmatprep.subr.bf16.mxu0 %v9563_v35 }
 0x53c   :  { %6564 = vmatprep.mubr.msk.f32.mxu1 %vm2824_vm6, %v2820_v42  ;;  %v6089_v42 = vld [vmem:[%s11039_s5 + $0x1d8] sm:$0xff] }
 0x53d   :  { %6565 = vmatmul.mubr.msk.f32.gmra.mrb[148].mxu1 %vm2824_vm6, %v2821_v37  ;;  %v2955_v37 = vld [vmem:[%s11039_s5 + $0x8] sm:$0xff] }
 0x53e   :  { %7049 = vmatpush3.bf16.msra.mxu1 %v9563_v35  ;;  %7233 = vmatpush3.bf16.msra.mxu0 %v9563_v35 }
 0x53f   :  { %7051 = vmatprep.subr.bf16.mxu1 %v9569_v30  ;;  %7235 = vmatprep.subr.bf16.mxu0 %v9569_v30 }
 0x540   :  { %6567 = vmatprep.mubr.msk.f32.mxu1 %vm2824_vm6, %v2822_v44  ;;  %v2957_v44 = vld [vmem:[%s11039_s5 + $0x18] sm:$0xff] }
 0x541   :  { %6568 = vmatmul.mubr.msk.f32.gmra.mrb[150].mxu1 %vm2824_vm6, %v2823_v27  ;;  %v6088_v27 = vld [vmem:[%s11039_s5 + $0x1d0] sm:$0xff] }
 0x542   :  { %7053 = vmatpush3.bf16.msra.mxu1 %v9569_v30  ;;  %7237 = vmatpush3.bf16.msra.mxu0 %v9569_v30 }
 0x543   :  { %7055 = vmatprep.subr.bf16.mxu1 %v9575_v16  ;;  %7239 = vmatprep.subr.bf16.mxu0 %v9575_v16 }
 0x544   :  { %6594 = vmatprep.mubr.msk.f32.mxu1 %vm2824_vm6, %v6044_v36  ;;  %v7090_v36 = vpack.c.bf16 %v2957_v44, %v2955_v37 }
 0x546   :  { %7057 = vmatpush3.bf16.msra.mxu1 %v9575_v16  ;;  %7241 = vmatpush3.bf16.msra.mxu0 %v9575_v16 }
 0x547   :  { %7059 = vmatprep.subr.bf16.mxu1 %v9583_v23  ;;  %7243 = vmatprep.subr.bf16.mxu0 %v9583_v23 }
 0x54a   :  { %7061 = vmatpush3.bf16.msra.mxu1 %v9583_v23  ;;  %7245 = vmatpush3.bf16.msra.mxu0 %v9583_v23 }
 0x54b   :  { %7063 = vmatprep.subr.bf16.mxu1 %v7062_v48  ;;  %7274 = vmatprep.subr.bf16.mxu0 %v11132_v15  ;;  %v6164_v48 = vld [vmem:[%s11041_s7 + $0xe0] sm:$0xff] }
 0x54c   :  { %6672 = vmatprep.mubr.msk.f32.mxu0 %vm2824_vm6, %v6164_v48  ;;  %v2977_v48 = vld [vmem:[%s11039_s5 + $0xb8] sm:$0xff] }
 0x54d   :  { %6595 = vmatmul.mubr.msk.f32.vlgmr.msra.gmra.mrb[152].mxu1 %vm2824_vm6, %v6045_v57  ;;  %6673 = vmatmul.mubr.msk.f32.gmra.mrb[52].mxu0 %vm2824_vm6, %v6165_v25  ;;  %v6215_v57 = vld [vmem:[%s11041_s7 + $0x108] sm:$0xff] }
 0x54e   :  { %6597 = vmatprep.mubr.msk.f32.mxu1 %vm2824_vm6, %v6046_v2  ;;  %7065 = vmatpush1.bf16.msra.mxu1 %v7064_v34  ;;  %v6216_v34 = vld [vmem:[%s11041_s7 + $0x110] sm:$0xff]  ;;  %v6217_v2 = vld [vmem:[%s11041_s7 + $0x118] sm:$0xff] }
 0x54f   :  { %7067 = vmatprep.subr.bf16.mxu1 %v7066_v62  ;;  %6675 = vmatprep.mubr.msk.f32.mxu0 %vm2824_vm6, %v6166_v20  ;;  %v6218_v62 = vld [vmem:[%s11041_s7 + $0x120] sm:$0xff] }
 0x551   :  { %6598 = vmatmul.mubr.msk.f32.gmra.mrb[154].mxu1 %vm2824_vm6, %v6047_v5  ;;  %6676 = vmatmul.mubr.msk.f32.gmra.mrb[54].mxu0 %vm2824_vm6, %v6167_v49  ;;  %v6219_v5 = vld [vmem:[%s11041_s7 + $0x128] sm:$0xff]  ;;  %v7110_v49 = vpack.c.bf16 %v2977_v48, %v2975_v47  ;;  %v6149_v47 = vld [vmem:[%s11039_s5 + $0x2b8] sm:$0xff] }
 0x552   :  { %6600 = vmatprep.mubr.msk.f32.mxu1 %vm2824_vm6, %v6048_v3  ;;  %7069 = vmatpush1.bf16.msra.mxu1 %v7068_v55  ;;  %v6220_v3 = vld [vmem:[%s11041_s7 + $0x130] sm:$0xff] }
 0x553   :  { %7071 = vmatprep.subr.bf16.mxu1 %v7070_v12  ;;  %6702 = vmatprep.mubr.msk.f32.mxu0 %vm2824_vm6, %v6214_v24  ;;  %v2974_v24 = vld [vmem:[%s11039_s5 + $0xa0] sm:$0xff] }
 0x555   :  { %6601 = vmatmul.mubr.msk.f32.gmra.mrb[156].mxu1 %vm2824_vm6, %v6049_v39  ;;  %6703 = vmatmul.mubr.msk.f32.vlgmr.msra.gmra.mrb[56].mxu0 %vm2824_vm6, %v6215_v57  ;;  %v6221_v39 = vld [vmem:[%s11041_s7 + $0x138] sm:$0xff]  ;;  %v2976_v57 = vld [vmem:[%s11039_s5 + $0xb0] sm:$0xff] }
 0x556   :  { %6603 = vmatprep.mubr.msk.f32.mxu1 %vm2824_vm6, %v6050_v9  ;;  %7073 = vmatpush1.bf16.msra.mxu1 %v7072_v28  ;;  %v2961_v28 = vld [vmem:[%s11039_s5 + $0x38] sm:$0xff] }
 0x557   :  { %7075 = vmatprep.subr.bf16.mxu1 %v7074_v38  ;;  %6705 = vmatprep.mubr.msk.f32.mxu0 %vm2824_vm6, %v6216_v34  ;;  %v7094_v53 = vpack.c.bf16 %v2961_v28, %v2959_v46  ;;  %v2958_v38 = vld [vmem:[%s11039_s5 + $0x20] sm:$0xff]  ;;  %v2979_v34 = vld [vmem:[%s11039_s5 + $0xc8] sm:$0xff] }
 0x558   :  { %v2982_v46 = vld [vmem:[%s11039_s5 + $0xe0] sm:$0xff]  ;;  %v6131_v28 = vld [vmem:[%s11039_s5 + $0x228] sm:$0xff] }
 0x559   :  { %6604 = vmatmul.mubr.msk.f32.gmra.mrb[158].mxu1 %vm2824_vm6, %v6051_v17  ;;  %6706 = vmatmul.mubr.msk.f32.gmra.mrb[58].mxu0 %vm2824_vm6, %v6217_v2  ;;  %v2981_v2 = vld [vmem:[%s11039_s5 + $0xd8] sm:$0xff] }
 0x55a   :  { %3242 = vmatprep.mubr.f32.mxu1 %v11133_v26  ;;  %7077 = vmatpush1.bf16.msra.mxu1 %v7076_v54  ;;  %v2960_v54 = vld [vmem:[%s11039_s5 + $0x30] sm:$0xff] }
 0x55b   :  { %7079 = vmatprep.subr.bf16.mxu1 %v7078_v11  ;;  %6708 = vmatprep.mubr.msk.f32.mxu0 %vm2824_vm6, %v6218_v62  ;;  %v2965_v11 = vld [vmem:[%s11039_s5 + $0x58] sm:$0xff]  ;;  %v7096_v58 = vpack.c.bf16 %v2960_v54, %v2958_v38  ;;  %v7112_v62 = vpack.c.bf16 %v2976_v57, %v2974_v24  ;;  %v6110_v38 = vld [vmem:[%s11041_s7 + $0xa0] sm:$0xff]  ;;  %v6151_v57 = vld [vmem:[%s11039_s5 + $0x2c8] sm:$0xff] }
 0x55d   :  { %6709 = vmatmul.mubr.msk.f32.gmra.mrb[60].mxu0 %vm2824_vm6, %v6219_v5  ;;  %v7114_v5 = vpack.c.bf16 %v2981_v2, %v2979_v34  ;;  %v6150_v34 = vld [vmem:[%s11039_s5 + $0x2c0] sm:$0xff]  ;;  %v6177_v2 = vld [vmem:[%s11039_s5 + $0x2d8] sm:$0xff] }
 0x55e   :  { %7081 = vmatpush1.bf16.msra.mxu1 %v7080_v63  ;;  %6711 = vmatprep.mubr.msk.f32.mxu0 %vm2824_vm6, %v6220_v3  ;;  %v7098_v63 = vpack.c.bf16 %v2965_v11, %v2963_v29  ;;  %v2978_v3 = vld [vmem:[%s11039_s5 + $0xc0] sm:$0xff]  ;;  %v6132_v29 = vld [vmem:[%s11039_s5 + $0x230] sm:$0xff]  ;;  %v6135_v11 = vld [vmem:[%s11039_s5 + $0x248] sm:$0xff] }
 0x55f   :  { %7083 = vmatprep.subr.bf16.mxu1 %v7082_v33 }
 0x561   :  { %6712 = vmatmul.mubr.msk.f32.gmra.mrb[62].mxu0 %vm2824_vm6, %v6221_v39  ;;  %v2980_v39 = vld [vmem:[%s11039_s5 + $0xd0] sm:$0xff] }
 0x562   :  { %7085 = vmatpush1.bf16.msra.mxu1 %v7084_v14  ;;  %v7100_v14 = vpack.c.bf16 %v2964_v4, %v2962_v40  ;;  %v7116_v31 = vpack.c.bf16 %v2980_v39, %v2978_v3  ;;  %v6112_v40 = vld [vmem:[%s11041_s7 + $0xb0] sm:$0xff] }
 0x563   :  { %7087 = vmatprep.subr.bf16.mxu1 %v7086_v51  ;;  %v2968_v51 = vld [vmem:[%s11039_s5 + $0x70] sm:$0xff] }
 0x564   :  { %v7104_v37 = vpack.c.bf16 %v2968_v51, %v2966_v52 }
 0x566   :  { %7089 = vmatpush1.bf16.msra.mxu1 %v7088_v22  ;;  %v2971_v22 = vld [vmem:[%s11039_s5 + $0x88] sm:$0xff] }
 0x567   :  { %3206 = vmatprep.subr.mxu1 %v6089_v42  ;;  %v2973_v42 = vld [vmem:[%s11039_s5 + $0x98] sm:$0xff] }
 0x568   :  { %v7106_v44 = vpack.c.bf16 %v2973_v42, %v2971_v22  ;;  %v6143_v22 = vld [vmem:[%s11039_s5 + $0x288] sm:$0xff]  ;;  %v6145_v42 = vld [vmem:[%s11039_s5 + $0x298] sm:$0xff] }
 0x56a   :  { %3207 = vmatpush1.msra.mxu1 %v6088_v27  ;;  %v2970_v27 = vld [vmem:[%s11039_s5 + $0x80] sm:$0xff] }
 0x56b   :  { %7091 = vmatprep.subr.bf16.mxu1 %v7090_v36  ;;  %v2972_v36 = vld [vmem:[%s11039_s5 + $0x90] sm:$0xff] }
 0x56c   :  { %v7108_v20 = vpack.c.bf16 %v2972_v36, %v2970_v27  ;;  %v6142_v27 = vld [vmem:[%s11039_s5 + $0x280] sm:$0xff]  ;;  %v6144_v36 = vld [vmem:[%s11039_s5 + $0x290] sm:$0xff] }
 0x56d   :  { %v7164_v48 = vpack.c.bf16 %v6144_v36, %v6142_v27 }
 0x608   :  { %v9830_v9 = vpop.f32.mrb[144].mxu1  ;;  %v10111_v3 = vpop.f32.mrb[48].mxu0 }
 0x609   :  { %v9833_v17 = vpop.f32.mrb[145].mxu1  ;;  %v10113_v39 = vpop.f32.mrb[49].mxu0 }
 0x60c   :  { %v9835_v10 = vpop.f32.mrb[146].mxu1 }
 0x60d   :  { %v9837_v32 = vpop.f32.mrb[147].mxu1 }
 0x610   :  { %v9839_v55 = vpop.f32.mrb[148].mxu1 }
 0x611   :  { %v9841_v41 = vpop.f32.mrb[149].mxu1 }
 0x614   :  { %v9843_v59 = vpop.f32.mrb[150].mxu1 }
 0x615   :  { %v9845_v12 = vpop.f32.mrb[151].mxu1 }
 0x620   :  { %v6596_v61 = vpop.f32.mrb[152].mxu1 }
 0x621   :  { %v3083_v0 = vpop.f32.mrb[153].mxu1 }
 0x622   :  { %6090 = vmatmul.mubr.msk.f32.vlgmr.msra.gmra.mrb[160].mxu1 %vm3153_vm7, %v3083_v0  ;;  %v6130_v0 = vld [vmem:[%s11039_s5 + $0x220] sm:$0xff] }
 0x623   :  { %7093 = vmatpush1.bf16.msra.mxu1 %v7092_v7  ;;  %3248 = vmatprep.mubr.f32.mxu1 %v11133_v26  ;;  %v6133_v7 = vld [vmem:[%s11039_s5 + $0x238] sm:$0xff] }
 0x624   :  { %7095 = vmatprep.subr.bf16.mxu1 %v7094_v53  ;;  %v6599_v56 = vpop.f32.mrb[154].mxu1  ;;  %v7150_v54 = vpack.c.bf16 %v6133_v7, %v6131_v28  ;;  %v4441_v7 = vld [vmem:[%s11042_s8 + $0x18] sm:$0xff] }
 0x625   :  { %v3093_v33 = vpop.f32.mrb[155].mxu1 }
 0x626   :  { %6091 = vmatmul.mubr.msk.f32.gmra.mrb[162].mxu1 %vm3153_vm7, %v6596_v61  ;;  %v6109_v61 = vld [vmem:[%s11041_s7 + $0x98] sm:$0xff] }
 0x627   :  { %7097 = vmatpush1.bf16.msra.mxu1 %v7096_v58  ;;  %3254 = vmatprep.mubr.f32.mxu1 %v11133_v26  ;;  %v6137_v58 = vld [vmem:[%s11039_s5 + $0x258] sm:$0xff] }
 0x628   :  { %7099 = vmatprep.subr.bf16.mxu1 %v7098_v63  ;;  %v6602_v18 = vpop.f32.mrb[156].mxu1  ;;  %v7152_v63 = vpack.c.bf16 %v6132_v29, %v6130_v0  ;;  %v7154_v4 = vpack.c.bf16 %v6137_v58, %v6135_v11  ;;  %v4444_v0 = vld [vmem:[%s11042_s8 + $0x30] sm:$0xff]  ;;  %v4445_v29 = vld [vmem:[%s11042_s8 + $0x38] sm:$0xff]  ;;  %v4446_v58 = vld [vmem:[%s11042_s8 + $0x40] sm:$0xff] }
 0x629   :  { %v3103_v60 = vpop.f32.mrb[157].mxu1  ;;  %v7284_v11 = vpack.c.bf16 %v4445_v29, %v4444_v0  ;;  %v6193_v0 = vld [vmem:[%s11039_s5 + $0x358] sm:$0xff]  ;;  %v6195_v29 = vld [vmem:[%s11039_s5 + $0x368] sm:$0xff] }
 0x62a   :  { %6092 = vmatmul.mubr.msk.f32.gmra.mrb[164].mxu1 %vm3153_vm7, %v3093_v33  ;;  %v6134_v33 = vld [vmem:[%s11039_s5 + $0x240] sm:$0xff] }
 0x62b   :  { %7101 = vmatpush1.bf16.msra.mxu1 %v7100_v14  ;;  %3260 = vmatprep.mubr.f32.mxu1 %v11133_v26  ;;  %v6141_v14 = vld [vmem:[%s11039_s5 + $0x278] sm:$0xff]  ;;  %v7156_v52 = vpack.c.bf16 %v6136_v8, %v6134_v33  ;;  %v4450_v8 = vld [vmem:[%s11042_s8 + $0x60] sm:$0xff] }
 0x62c   :  { %7103 = vmatprep.subr.bf16.mxu1 %v7102_v13  ;;  %v6605_v50 = vpop.f32.mrb[158].mxu1  ;;  %v6113_v13 = vld [vmem:[%s11041_s7 + $0xb8] sm:$0xff]  ;;  %v7158_v51 = vpack.c.bf16 %v6141_v14, %v6139_v6  ;;  %v4451_v6 = vld [vmem:[%s11042_s8 + $0x68] sm:$0xff] }
 0x62d   :  { %v3113_v25 = vpop.f32.mrb[159].mxu1  ;;  %v7293_v14 = vpack.c.bf16 %v4451_v6, %v4450_v8  ;;  %v6199_v8 = vld [vmem:[%s11039_s5 + $0x388] sm:$0xff] }
 0x62e   :  { %6093 = vmatmul.mubr.msk.f32.gmra.mrb[166].mxu1 %vm3153_vm7, %v6599_v56  ;;  %v6111_v56 = vld [vmem:[%s11041_s7 + $0xa8] sm:$0xff] }
 0x62f   :  { %7105 = vmatpush1.bf16.msra.mxu1 %v7104_v37  ;;  %3266 = vmatprep.mubr.f32.mxu1 %v11133_v26 }
 0x630   :  { %7107 = vmatprep.subr.bf16.mxu1 %v7106_v44  ;;  %v7162_v44 = vpack.c.bf16 %v6145_v42, %v6143_v22  ;;  %v6176_v22 = vld [vmem:[%s11039_s5 + $0x2d0] sm:$0xff]  ;;  %v6178_v42 = vld [vmem:[%s11039_s5 + $0x2e0] sm:$0xff] }
 0x631   :  { %v7196_v36 = vpack.c.bf16 %v6178_v42, %v6176_v22  ;;  %v6200_v42 = vld [vmem:[%s11039_s5 + $0x390] sm:$0xff] }
 0x632   :  { %6094 = vmatmul.mubr.msk.f32.gmra.mrb[168].mxu1 %vm3153_vm7, %v3103_v60  ;;  %v6140_v60 = vld [vmem:[%s11039_s5 + $0x270] sm:$0xff] }
 0x633   :  { %7109 = vmatpush1.bf16.msra.mxu1 %v7108_v20  ;;  %3272 = vmatprep.mubr.f32.mxu1 %v11133_v26  ;;  %v6146_v20 = vld [vmem:[%s11039_s5 + $0x2a0] sm:$0xff] }
 0x634   :  { %7111 = vmatprep.subr.bf16.mxu1 %v7110_v49  ;;  %v6148_v49 = vld [vmem:[%s11039_s5 + $0x2b0] sm:$0xff] }
 0x635   :  { %v7168_v24 = vpack.c.bf16 %v6148_v49, %v6146_v20  ;;  %v6185_v49 = vld [vmem:[%s11039_s5 + $0x318] sm:$0xff] }
 0x636   :  { %6095 = vmatmul.mubr.msk.f32.gmra.mrb[170].mxu1 %vm3153_vm7, %v6602_v18  ;;  %v6138_v18 = vld [vmem:[%s11039_s5 + $0x260] sm:$0xff] }
 0x637   :  { %7113 = vmatpush1.bf16.msra.mxu1 %v7112_v62  ;;  %3278 = vmatprep.mubr.f32.mxu1 %v11133_v26  ;;  %v7160_v37 = vpack.c.bf16 %v6140_v60, %v6138_v18  ;;  %v6179_v62 = vld [vmem:[%s11039_s5 + $0x2e8] sm:$0xff]  ;;  %v4454_v18 = vld [vmem:[%s11042_s8 + $0x80] sm:$0xff] }
 0x638   :  { %7115 = vmatprep.subr.bf16.mxu1 %v7114_v5  ;;  %v7194_v5 = vpack.c.bf16 %v6179_v62, %v6177_v2  ;;  %v4455_v60 = vld [vmem:[%s11042_s8 + $0x88] sm:$0xff]  ;;  %v6184_v62 = vld [vmem:[%s11039_s5 + $0x310] sm:$0xff] }
 0x639   :  { %v7299_v27 = vpack.c.bf16 %v4455_v60, %v4454_v18  ;;  %v6203_v18 = vld [vmem:[%s11039_s5 + $0x3a8] sm:$0xff] }
 0x63a   :  { %6096 = vmatmul.mubr.msk.f32.gmra.mrb[172].mxu1 %vm3153_vm7, %v3113_v25 }
 0x63b   :  { %7117 = vmatpush1.bf16.msra.mxu1 %v7116_v31  ;;  %3284 = vmatprep.mubr.f32.mxu1 %v11133_v26  ;;  %v10115_v31 = vpop.f32.mrb[50].mxu0 }
 0x63c   :  { %3343 = vmatprep.subr.mxu1 %v2983_v19  ;;  %v10117_v19 = vpop.f32.mrb[51].mxu0 }
 0x63e   :  { %6097 = vmatmul.mubr.msk.f32.gmra.mrb[174].mxu1 %vm3153_vm7, %v6605_v50  ;;  %v6147_v50 = vld [vmem:[%s11039_s5 + $0x2a8] sm:$0xff] }
 0x63f   :  { %3344 = vmatpush1.msra.mxu1 %v2982_v46  ;;  %3379 = vmatprep.mubr.f32.mxu1 %v11133_v26  ;;  %v7166_v25 = vpack.c.bf16 %v6149_v47, %v6147_v50  ;;  %v10119_v46 = vpop.f32.mrb[52].mxu0 }
 0x640   :  { %7119 = vmatprep.subr.bf16.mxu1 %v9551_v21 }
 0x642   :  { %6098 = vmatmul.mubr.msk.f32.vlgmr.msra.gmra.mrb[160].mxu1 %vm3153_vm7, %v9833_v17  ;;  %v6129_v17 = vld [vmem:[%s11039_s5 + $0x218] sm:$0xff] }
 0x643   :  { %7121 = vmatpush3.bf16.msra.mxu1 %v9551_v21  ;;  %3385 = vmatprep.mubr.f32.mxu1 %v11133_v26  ;;  %v6123_v21 = vld [vmem:[%s11039_s5 + $0x1e8] sm:$0xff] }
 0x644   :  { %7123 = vmatprep.subr.bf16.mxu1 %v9557_v1 }
 0x646   :  { %6099 = vmatmul.mubr.msk.f32.gmra.mrb[162].mxu1 %vm3153_vm7, %v9830_v9  ;;  %v6127_v9 = vld [vmem:[%s11039_s5 + $0x208] sm:$0xff] }
 0x647   :  { %7125 = vmatpush3.bf16.msra.mxu1 %v9557_v1  ;;  %3391 = vmatprep.mubr.f32.mxu1 %v11133_v26  ;;  %v6125_v1 = vld [vmem:[%s11039_s5 + $0x1f8] sm:$0xff] }
 0x648   :  { %7127 = vmatprep.subr.bf16.mxu1 %v9563_v35 }
 0x64a   :  { %6100 = vmatmul.mubr.msk.f32.gmra.mrb[164].mxu1 %vm3153_vm7, %v9837_v32 }
 0x64b   :  { %7129 = vmatpush3.bf16.msra.mxu1 %v9563_v35  ;;  %3397 = vmatprep.mubr.f32.mxu1 %v11133_v26  ;;  %v7142_v35 = vpack.c.bf16 %v6125_v1, %v6123_v21  ;;  %v10121_v21 = vpop.f32.mrb[53].mxu0 }
 0x64c   :  { %7131 = vmatprep.subr.bf16.mxu1 %v9569_v30  ;;  %v10123_v1 = vpop.f32.mrb[54].mxu0 }
 0x64e   :  { %6101 = vmatmul.mubr.msk.f32.gmra.mrb[166].mxu1 %vm3153_vm7, %v9835_v10  ;;  %v6107_v10 = vld [vmem:[%s11041_s7 + $0x88] sm:$0xff] }
 0x64f   :  { %7133 = vmatpush3.bf16.msra.mxu1 %v9569_v30  ;;  %3403 = vmatprep.mubr.f32.mxu1 %v11133_v26  ;;  %v6106_v30 = vld [vmem:[%s11041_s7 + $0x80] sm:$0xff] }
 0x650   :  { %7135 = vmatprep.subr.bf16.mxu1 %v9575_v16 }
 0x652   :  { %6102 = vmatmul.mubr.msk.f32.gmra.mrb[168].mxu1 %vm3153_vm7, %v9841_v41  ;;  %v7146_v41 = vpack.c.bf16 %v6129_v17, %v6127_v9 }
 0x653   :  { %7137 = vmatpush3.bf16.msra.mxu1 %v9575_v16  ;;  %3409 = vmatprep.mubr.f32.mxu1 %v11133_v26  ;;  %v6122_v16 = vld [vmem:[%s11039_s5 + $0x1e0] sm:$0xff] }
 0x654   :  { %7139 = vmatprep.subr.bf16.mxu1 %v9583_v23 }
 0x656   :  { %6103 = vmatmul.mubr.msk.f32.gmra.mrb[170].mxu1 %vm3153_vm7, %v9839_v55  ;;  %v6108_v55 = vld [vmem:[%s11041_s7 + $0x90] sm:$0xff] }
 0x657   :  { %7141 = vmatpush3.bf16.msra.mxu1 %v9583_v23  ;;  %3415 = vmatprep.mubr.f32.mxu1 %v11133_v26  ;;  %v6124_v23 = vld [vmem:[%s11039_s5 + $0x1f0] sm:$0xff] }
 0x658   :  { %7143 = vmatprep.subr.bf16.mxu1 %v7142_v35  ;;  %v7144_v32 = vpack.c.bf16 %v6124_v23, %v6122_v16  ;;  %v10125_v35 = vpop.f32.mrb[55].mxu0 }
 0x65a   :  { %6104 = vmatmul.mubr.msk.f32.gmra.mrb[172].mxu1 %vm3153_vm7, %v9845_v12  ;;  %v6126_v12 = vld [vmem:[%s11039_s5 + $0x200] sm:$0xff] }
 0x65b   :  { %3421 = vmatprep.mubr.f32.mxu1 %v11133_v26 }
 0x65e   :  { %6105 = vmatmul.mubr.msk.f32.gmra.mrb[174].mxu1 %vm3153_vm7, %v9843_v59  ;;  %v6128_v59 = vld [vmem:[%s11039_s5 + $0x210] sm:$0xff] }
 0x65f   :  { %6630 = vmatprep.mubr.msk.f32.mxu1 %vm2824_vm6, %v6106_v30  ;;  %v7148_v53 = vpack.c.bf16 %v6128_v59, %v6126_v12  ;;  %v10127_v30 = vpop.f32.mrb[56].mxu0  ;;  %v4439_v12 = vld [vmem:[%s11042_s8 + $0x8] sm:$0xff]  ;;  %v4440_v59 = vld [vmem:[%s11042_s8 + $0x10] sm:$0xff] }
 0x660   :  { %v10129_v16 = vpop.f32.mrb[57].mxu0 }
 0x661   :  { %v10131_v23 = vpop.f32.mrb[58].mxu0 }
 0x662   :  { %6631 = vmatmul.mubr.msk.f32.vlgmr.msra.gmra.mrb[176].mxu1 %vm2824_vm6, %v6107_v10  ;;  %v10133_v9 = vpop.f32.mrb[59].mxu0 }
 0x663   :  { %6633 = vmatprep.mubr.msk.f32.mxu1 %vm2824_vm6, %v6108_v55  ;;  %7145 = vmatpush1.bf16.msra.mxu1 %v7144_v32  ;;  %v10135_v17 = vpop.f32.mrb[60].mxu0 }
 0x664   :  { %7147 = vmatprep.subr.bf16.mxu1 %v7146_v41  ;;  %v10137_v10 = vpop.f32.mrb[61].mxu0  ;;  %v4438_v41 = vld [vmem:[%s11042_s8] sm:$0xff] }
 0x665   :  { %v10139_v32 = vpop.f32.mrb[62].mxu0  ;;  %v7275_v28 = vpack.c.bf16 %v4439_v12, %v4438_v41  ;;  %v6189_v12 = vld [vmem:[%s11039_s5 + $0x338] sm:$0xff] }
 0x666   :  { %6634 = vmatmul.mubr.msk.f32.gmra.mrb[178].mxu1 %vm2824_vm6, %v6109_v61  ;;  %v10141_v55 = vpop.f32.mrb[63].mxu0  ;;  %v7278_v61 = vpack.c.bf16 %v4441_v7, %v4440_v59  ;;  %v6191_v59 = vld [vmem:[%s11039_s5 + $0x348] sm:$0xff] }
 0x667   :  { %6636 = vmatprep.mubr.msk.f32.mxu1 %vm2824_vm6, %v6110_v38  ;;  %7149 = vmatpush1.bf16.msra.mxu1 %v7148_v53  ;;  %v4442_v53 = vld [vmem:[%s11042_s8 + $0x20] sm:$0xff]  ;;  %v4443_v38 = vld [vmem:[%s11042_s8 + $0x28] sm:$0xff] }
 0x668   :  { %7151 = vmatprep.subr.bf16.mxu1 %v7150_v54  ;;  %7276 = vmatpush1.bf16.msra.mxu0 %v7275_v28  ;;  %v7281_v54 = vpack.c.bf16 %v4443_v38, %v4442_v53  ;;  %v6188_v53 = vld [vmem:[%s11039_s5 + $0x330] sm:$0xff]  ;;  %v6190_v38 = vld [vmem:[%s11039_s5 + $0x340] sm:$0xff] }
 0x669   :  { %7277 = vmatprep.subr.bf16.mxu0 %v11132_v15 }
 0x66a   :  { %6637 = vmatmul.mubr.msk.f32.gmra.mrb[180].mxu1 %vm2824_vm6, %v6111_v56  ;;  %v4447_v56 = vld [vmem:[%s11042_s8 + $0x48] sm:$0xff] }
 0x66b   :  { %6639 = vmatprep.mubr.msk.f32.mxu1 %vm2824_vm6, %v6112_v40  ;;  %7153 = vmatpush1.bf16.msra.mxu1 %v7152_v63  ;;  %v7287_v63 = vpack.c.bf16 %v4447_v56, %v4446_v58  ;;  %v4448_v40 = vld [vmem:[%s11042_s8 + $0x50] sm:$0xff]  ;;  %v7210_v58 = vpack.c.bf16 %v6195_v29, %v6193_v0  ;;  %v6247_v29 = vld [vmem:[%s11039_s5 + $0x448] sm:$0xff] }
 0x66c   :  { %7155 = vmatprep.subr.bf16.mxu1 %v7154_v4  ;;  %7279 = vmatpush1.bf16.msra.mxu0 %v7278_v61  ;;  %v4449_v4 = vld [vmem:[%s11042_s8 + $0x58] sm:$0xff]  ;;  %v7206_v61 = vpack.c.bf16 %v6191_v59, %v6189_v12  ;;  %v6192_v56 = vld [vmem:[%s11039_s5 + $0x350] sm:$0xff] }
 0x66d   :  { %7280 = vmatprep.subr.bf16.mxu0 %v11132_v15  ;;  %v7290_v33 = vpack.c.bf16 %v4449_v4, %v4448_v40  ;;  %v6244_v0 = vld [vmem:[%s11039_s5 + $0x430] sm:$0xff] }
 0x66e   :  { %6640 = vmatmul.mubr.msk.f32.gmra.mrb[182].mxu1 %vm2824_vm6, %v6113_v13  ;;  %v4452_v13 = vld [vmem:[%s11042_s8 + $0x70] sm:$0xff] }
 0x66f   :  { %7157 = vmatpush1.bf16.msra.mxu1 %v7156_v52  ;;  %3685 = vmatprep.mubr.f32.mxu1 %v11133_v26  ;;  %v4453_v52 = vld [vmem:[%s11042_s8 + $0x78] sm:$0xff] }
 0x670   :  { %7159 = vmatprep.subr.bf16.mxu1 %v7158_v51  ;;  %7282 = vmatpush1.bf16.msra.mxu0 %v7281_v54  ;;  %v7296_v51 = vpack.c.bf16 %v4453_v52, %v4452_v13  ;;  %v6196_v13 = vld [vmem:[%s11039_s5 + $0x370] sm:$0xff]  ;;  %v6198_v52 = vld [vmem:[%s11039_s5 + $0x380] sm:$0xff] }
 0x671   :  { %7283 = vmatprep.subr.bf16.mxu0 %v11132_v15  ;;  %v7216_v60 = vpack.c.bf16 %v6198_v52, %v6196_v13 }
 0x673   :  { %7161 = vmatpush1.bf16.msra.mxu1 %v7160_v37  ;;  %v6181_v37 = vld [vmem:[%s11039_s5 + $0x2f8] sm:$0xff] }
 0x674   :  { %7163 = vmatprep.subr.bf16.mxu1 %v7162_v44  ;;  %7285 = vmatpush1.bf16.msra.mxu0 %v7284_v11  ;;  %v6183_v44 = vld [vmem:[%s11039_s5 + $0x308] sm:$0xff]  ;;  %v7208_v11 = vpack.c.bf16 %v6190_v38, %v6188_v53 }
 0x675   :  { %7286 = vmatprep.subr.bf16.mxu0 %v11132_v15  ;;  %v7198_v47 = vpack.c.bf16 %v6183_v44, %v6181_v37  ;;  %v6202_v37 = vld [vmem:[%s11039_s5 + $0x3a0] sm:$0xff] }
 0x676   :  { %v7220_v44 = vpack.c.bf16 %v6202_v37, %v6200_v42 }
 0x677   :  { %7165 = vmatpush1.bf16.msra.mxu1 %v7164_v48  ;;  %v6180_v48 = vld [vmem:[%s11039_s5 + $0x2f0] sm:$0xff] }
 0x678   :  { %7167 = vmatprep.subr.bf16.mxu1 %v7166_v25  ;;  %7288 = vmatpush1.bf16.msra.mxu0 %v7287_v63  ;;  %v6182_v25 = vld [vmem:[%s11039_s5 + $0x300] sm:$0xff] }
 0x679   :  { %7289 = vmatprep.subr.bf16.mxu0 %v11132_v15  ;;  %v6194_v63 = vld [vmem:[%s11039_s5 + $0x360] sm:$0xff] }
 0x67a   :  { %v7212_v6 = vpack.c.bf16 %v6194_v63, %v6192_v56  ;;  %v6246_v56 = vld [vmem:[%s11039_s5 + $0x440] sm:$0xff]  ;;  %v6248_v63 = vld [vmem:[%s11039_s5 + $0x450] sm:$0xff] }
 0x67b   :  { %7169 = vmatpush1.bf16.msra.mxu1 %v7168_v24  ;;  %v6187_v24 = vld [vmem:[%s11039_s5 + $0x328] sm:$0xff] }
 0x67c   :  { %3649 = vmatprep.subr.mxu1 %v6151_v57  ;;  %7291 = vmatpush1.bf16.msra.mxu0 %v7290_v33  ;;  %v7200_v57 = vpack.c.bf16 %v6182_v25, %v6180_v48  ;;  %v7202_v2 = vpack.c.bf16 %v6187_v24, %v6185_v49  ;;  %v6197_v33 = vld [vmem:[%s11039_s5 + $0x378] sm:$0xff]  ;;  %v6230_v25 = vld [vmem:[%s11039_s5 + $0x3c0] sm:$0xff]  ;;  %v6235_v49 = vld [vmem:[%s11039_s5 + $0x3e8] sm:$0xff] }
 0x67d   :  { %7292 = vmatprep.subr.bf16.mxu0 %v11132_v15  ;;  %v6237_v24 = vld [vmem:[%s11039_s5 + $0x3f8] sm:$0xff] }
 0x67f   :  { %3650 = vmatpush1.msra.mxu1 %v6150_v34 }
 0x680   :  { %7195 = vmatprep.subr.bf16.mxu1 %v7194_v5  ;;  %7294 = vmatpush1.bf16.msra.mxu0 %v7293_v14  ;;  %v6186_v5 = vld [vmem:[%s11039_s5 + $0x320] sm:$0xff]  ;;  %v7214_v14 = vpack.c.bf16 %v6199_v8, %v6197_v33 }
 0x681   :  { %7295 = vmatprep.subr.bf16.mxu0 %v11132_v15  ;;  %v7204_v28 = vpack.c.bf16 %v6186_v5, %v6184_v62  ;;  %v6236_v62 = vld [vmem:[%s11039_s5 + $0x3f0] sm:$0xff]  ;;  %v6239_v5 = vld [vmem:[%s11039_s5 + $0x408] sm:$0xff]  ;;  %v6250_v8 = vld [vmem:[%s11039_s5 + $0x460] sm:$0xff] }
 0x684   :  { %7297 = vmatpush1.bf16.msra.mxu0 %v7296_v51  ;;  %v6201_v51 = vld [vmem:[%s11039_s5 + $0x398] sm:$0xff] }
 0x685   :  { %7298 = vmatprep.subr.bf16.mxu0 %v11132_v15  ;;  %v7218_v22 = vpack.c.bf16 %v6203_v18, %v6201_v51  ;;  %v6254_v51 = vld [vmem:[%s11039_s5 + $0x480] sm:$0xff]  ;;  %v6256_v18 = vld [vmem:[%s11039_s5 + $0x490] sm:$0xff] }
 0x688   :  { %7300 = vmatpush1.bf16.msra.mxu0 %v7299_v27  ;;  %v6205_v27 = vld [vmem:[%s11039_s5 + $0x3b8] sm:$0xff] }
 0x689   :  { %7301 = vmatprep.subr.bf16.mxu0 %v11132_v15 }
 0x735   :  { %v6632_v50 = vpop.f32.mrb[176].mxu1 }
 0x736   :  { %v3527_v20 = vpop.f32.mrb[177].mxu1 }
 0x737   :  { %6152 = vmatmul.mubr.msk.f32.vlgmr.msra.gmra.mrb[160].mxu1 %vm3153_vm7, %v3527_v20  ;;  %v6232_v20 = vld [vmem:[%s11039_s5 + $0x3d0] sm:$0xff] }
 0x738   :  { %3691 = vmatprep.mubr.f32.mxu1 %v11133_v26  ;;  %7197 = vmatpush1.bf16.msra.mxu1 %v7196_v36  ;;  %v6231_v36 = vld [vmem:[%s11039_s5 + $0x3c8] sm:$0xff] }
 0x739   :  { %v6635_v34 = vpop.f32.mrb[178].mxu1  ;;  %7199 = vmatprep.subr.bf16.mxu1 %v7198_v47  ;;  %v6204_v47 = vld [vmem:[%s11039_s5 + $0x3b0] sm:$0xff] }
 0x73a   :  { %v3537_v41 = vpop.f32.mrb[179].mxu1 }
 0x73b   :  { %6153 = vmatmul.mubr.msk.f32.gmra.mrb[162].mxu1 %vm3153_vm7, %v6632_v50  ;;  %v6233_v50 = vld [vmem:[%s11039_s5 + $0x3d8] sm:$0xff] }
 0x73c   :  { %3697 = vmatprep.mubr.f32.mxu1 %v11133_v26  ;;  %7201 = vmatpush1.bf16.msra.mxu1 %v7200_v57  ;;  %v7246_v48 = vpack.c.bf16 %v6233_v50, %v6231_v36  ;;  %v7248_v57 = vpack.c.bf16 %v6232_v20, %v6230_v25  ;;  %v6279_v25 = vld [vmem:[%s11042_s8 + $0xb8] sm:$0xff] }
 0x73d   :  { %7203 = vmatprep.subr.bf16.mxu1 %v7202_v2  ;;  %v6638_v7 = vpop.f32.mrb[180].mxu1  ;;  %v6234_v2 = vld [vmem:[%s11039_s5 + $0x3e0] sm:$0xff] }
 0x73e   :  { %v3547_v54 = vpop.f32.mrb[181].mxu1  ;;  %v7252_v12 = vpack.c.bf16 %v6236_v62, %v6234_v2 }
 0x73f   :  { %6154 = vmatmul.mubr.msk.f32.gmra.mrb[164].mxu1 %vm3153_vm7, %v3537_v41  ;;  %v6241_v41 = vld [vmem:[%s11039_s5 + $0x418] sm:$0xff] }
 0x740   :  { %3703 = vmatprep.mubr.f32.mxu1 %v11133_v26  ;;  %7205 = vmatpush1.bf16.msra.mxu1 %v7204_v28  ;;  %v7254_v59 = vpack.c.bf16 %v6241_v41, %v6239_v5  ;;  %v6238_v28 = vld [vmem:[%s11039_s5 + $0x400] sm:$0xff]  ;;  %v6281_v41 = vld [vmem:[%s11042_s8 + $0xc8] sm:$0xff] }
 0x741   :  { %7207 = vmatprep.subr.bf16.mxu1 %v7206_v61  ;;  %v6641_v40 = vpop.f32.mrb[182].mxu1  ;;  %v6243_v61 = vld [vmem:[%s11039_s5 + $0x428] sm:$0xff]  ;;  %v6280_v5 = vld [vmem:[%s11042_s8 + $0xc0] sm:$0xff] }
 0x742   :  { %v3557_v4 = vpop.f32.mrb[183].mxu1 }
 0x743   :  { %6155 = vmatmul.mubr.msk.f32.gmra.mrb[166].mxu1 %vm3153_vm7, %v6635_v34  ;;  %v7250_v34 = vpack.c.bf16 %v6237_v24, %v6235_v49 }
 0x744   :  { %3709 = vmatprep.mubr.f32.mxu1 %v11133_v26  ;;  %7209 = vmatpush1.bf16.msra.mxu1 %v7208_v11 }
 0x745   :  { %7211 = vmatprep.subr.bf16.mxu1 %v7210_v58 }
 0x747   :  { %6156 = vmatmul.mubr.msk.f32.gmra.mrb[168].mxu1 %vm3153_vm7, %v3547_v54  ;;  %v6242_v54 = vld [vmem:[%s11039_s5 + $0x420] sm:$0xff] }
 0x748   :  { %3715 = vmatprep.mubr.f32.mxu1 %v11133_v26  ;;  %7213 = vmatpush1.bf16.msra.mxu1 %v7212_v6  ;;  %v7260_v11 = vpack.c.bf16 %v6244_v0, %v6242_v54  ;;  %v6252_v6 = vld [vmem:[%s11039_s5 + $0x470] sm:$0xff]  ;;  %v6283_v54 = vld [vmem:[%s11042_s8 + $0xd8] sm:$0xff] }
 0x749   :  { %7215 = vmatprep.subr.bf16.mxu1 %v7214_v14  ;;  %v6255_v14 = vld [vmem:[%s11039_s5 + $0x488] sm:$0xff]  ;;  %v7268_v13 = vpack.c.bf16 %v6252_v6, %v6250_v8 }
 0x74b   :  { %6157 = vmatmul.mubr.msk.f32.gmra.mrb[170].mxu1 %vm3153_vm7, %v6638_v7  ;;  %v6240_v7 = vld [vmem:[%s11039_s5 + $0x410] sm:$0xff] }
 0x74c   :  { %3721 = vmatprep.mubr.f32.mxu1 %v11133_v26  ;;  %7217 = vmatpush1.bf16.msra.mxu1 %v7216_v60  ;;  %v7256_v53 = vpack.c.bf16 %v6240_v7, %v6238_v28  ;;  %v6259_v60 = vld [vmem:[%s11039_s5 + $0x4a8] sm:$0xff]  ;;  %v7311_v7 = vpack.c.bf16 %v6281_v41, %v6280_v5  ;;  %v6292_v41 = vld [vmem:[%s11042_s8 + $0x120] sm:$0xff] }
 0x74d   :  { %7219 = vmatprep.subr.bf16.mxu1 %v7218_v22  ;;  %v6277_v22 = vld [vmem:[%s11042_s8 + $0xa8] sm:$0xff] }
 0x74f   :  { %6158 = vmatmul.mubr.msk.f32.gmra.mrb[172].mxu1 %vm3153_vm7, %v3557_v4  ;;  %v7264_v4 = vpack.c.bf16 %v6248_v63, %v6246_v56 }
 0x750   :  { %3727 = vmatprep.mubr.f32.mxu1 %v11133_v26  ;;  %7221 = vmatpush1.bf16.msra.mxu1 %v7220_v44 }
 0x751   :  { %3971 = vmatprep.subr.mxu1 %v6205_v27 }
 0x753   :  { %6159 = vmatmul.mubr.msk.f32.gmra.mrb[174].mxu1 %vm3153_vm7, %v6641_v40  ;;  %v6251_v40 = vld [vmem:[%s11039_s5 + $0x468] sm:$0xff] }
 0x754   :  { %3972 = vmatpush1.msra.mxu1 %v6204_v47  ;;  %4007 = vmatprep.mubr.f32.mxu1 %v11133_v26 }
 0x755   :  { %7247 = vmatprep.subr.bf16.mxu1 %v7246_v48  ;;  %v6278_v48 = vld [vmem:[%s11042_s8 + $0xb0] sm:$0xff] }
 0x757   :  { %6206 = vmatmul.mubr.msk.f32.vlgmr.msra.gmra.mrb[160].mxu1 %vm3153_vm7, %v10113_v39  ;;  %v6245_v39 = vld [vmem:[%s11039_s5 + $0x438] sm:$0xff] }
 0x758   :  { %4013 = vmatprep.mubr.f32.mxu1 %v11133_v26  ;;  %7249 = vmatpush1.bf16.msra.mxu1 %v7248_v57  ;;  %v7258_v38 = vpack.c.bf16 %v6245_v39, %v6243_v61  ;;  %v7308_v57 = vpack.c.bf16 %v6279_v25, %v6278_v48  ;;  %v6290_v25 = vld [vmem:[%s11042_s8 + $0x110] sm:$0xff] }
 0x759   :  { %7251 = vmatprep.subr.bf16.mxu1 %v7250_v34 }
 0x75b   :  { %6207 = vmatmul.mubr.msk.f32.gmra.mrb[162].mxu1 %vm3153_vm7, %v10111_v3  ;;  %v6249_v3 = vld [vmem:[%s11039_s5 + $0x458] sm:$0xff] }
 0x75c   :  { %4019 = vmatprep.mubr.f32.mxu1 %v11133_v26  ;;  %7253 = vmatpush1.bf16.msra.mxu1 %v7252_v12  ;;  %v7262_v58 = vpack.c.bf16 %v6249_v3, %v6247_v29 }
 0x75d   :  { %7255 = vmatprep.subr.bf16.mxu1 %v7254_v59 }
 0x75f   :  { %6208 = vmatmul.mubr.msk.f32.gmra.mrb[164].mxu1 %vm3153_vm7, %v10117_v19  ;;  %v6253_v19 = vld [vmem:[%s11039_s5 + $0x478] sm:$0xff] }
 0x760   :  { %4025 = vmatprep.mubr.f32.mxu1 %v11133_v26  ;;  %7257 = vmatpush1.bf16.msra.mxu1 %v7256_v53  ;;  %v7266_v33 = vpack.c.bf16 %v6253_v19, %v6251_v40  ;;  %v6284_v40 = vld [vmem:[%s11042_s8 + $0xe0] sm:$0xff]  ;;  %v6285_v19 = vld [vmem:[%s11042_s8 + $0xe8] sm:$0xff] }
 0x761   :  { %7259 = vmatprep.subr.bf16.mxu1 %v7258_v38  ;;  %v6282_v38 = vld [vmem:[%s11042_s8 + $0xd0] sm:$0xff]  ;;  %v7317_v6 = vpack.c.bf16 %v6285_v19, %v6284_v40 }
 0x763   :  { %6209 = vmatmul.mubr.msk.f32.gmra.mrb[166].mxu1 %vm3153_vm7, %v10115_v31  ;;  %v6257_v31 = vld [vmem:[%s11039_s5 + $0x498] sm:$0xff] }
 0x764   :  { %4031 = vmatprep.mubr.f32.mxu1 %v11133_v26  ;;  %7261 = vmatpush1.bf16.msra.mxu1 %v7260_v11  ;;  %v7270_v52 = vpack.c.bf16 %v6257_v31, %v6255_v14  ;;  %v7314_v11 = vpack.c.bf16 %v6283_v54, %v6282_v38 }
 0x765   :  { %7263 = vmatprep.subr.bf16.mxu1 %v7262_v58 }
 0x767   :  { %6210 = vmatmul.mubr.msk.f32.gmra.mrb[168].mxu1 %vm3153_vm7, %v10121_v21  ;;  %v7272_v21 = vpack.c.bf16 %v6256_v18, %v6254_v51  ;;  %v6287_v51 = vld [vmem:[%s11042_s8 + $0xf8] sm:$0xff] }
 0x768   :  { %4037 = vmatprep.mubr.f32.mxu1 %v11133_v26  ;;  %7265 = vmatpush1.bf16.msra.mxu1 %v7264_v4 }
 0x769   :  { %7267 = vmatprep.subr.bf16.mxu1 %v7266_v33 }
 0x76b   :  { %6211 = vmatmul.mubr.msk.f32.gmra.mrb[170].mxu1 %vm3153_vm7, %v10119_v46  ;;  %v6258_v46 = vld [vmem:[%s11039_s5 + $0x4a0] sm:$0xff] }
 0x76c   :  { %4043 = vmatprep.mubr.f32.mxu1 %v11133_v26  ;;  %7269 = vmatpush1.bf16.msra.mxu1 %v7268_v13 }
 0x76d   :  { %7271 = vmatprep.subr.bf16.mxu1 %v7270_v52  ;;  %v6286_v52 = vld [vmem:[%s11042_s8 + $0xf0] sm:$0xff] }
 0x76f   :  { %6212 = vmatmul.mubr.msk.f32.gmra.mrb[172].mxu1 %vm3153_vm7, %v10125_v35  ;;  %v4457_v35 = vld [vmem:[%s11042_s8 + $0x98] sm:$0xff] }
 0x770   :  { %4049 = vmatprep.mubr.f32.mxu1 %v11133_v26  ;;  %7273 = vmatpush1.bf16.msra.mxu1 %v7272_v21 }
 0x771   :  { %4293 = vmatprep.subr.mxu1 %v6259_v60 }
 0x773   :  { %6213 = vmatmul.mubr.msk.f32.gmra.mrb[174].mxu1 %vm3153_vm7, %v10123_v1  ;;  %v4456_v1 = vld [vmem:[%s11042_s8 + $0x90] sm:$0xff] }
 0x774   :  { %4294 = vmatpush1.msra.mxu1 %v6258_v46  ;;  %4329 = vmatprep.mubr.f32.mxu1 %v11133_v26  ;;  %v7320_v46 = vpack.c.bf16 %v6287_v51, %v6286_v52 }
 0x777   :  { %6260 = vmatmul.mubr.msk.f32.vlgmr.msra.gmra.mrb[160].mxu1 %vm3153_vm7, %v10129_v16  ;;  %v4394_v16 = vld [vmem:[%s11040_s6] sm:$0x3] }
 0x778   :  { %4335 = vmatprep.mubr.f32.mxu1 %v11133_v26 }
 0x77b   :  { %6261 = vmatmul.mubr.msk.f32.gmra.mrb[162].mxu1 %vm3153_vm7, %v10127_v30  ;;  %v7302_v30 = vpack.c.bf16 %v4457_v35, %v4456_v1 }
 0x77c   :  { %4341 = vmatprep.mubr.f32.mxu1 %v11133_v26 }
 0x77d   :  { %7303 = vmatpush1.bf16.msra.mxu0 %v7302_v30 }
 0x77e   :  { %7304 = vmatprep.subr.bf16.mxu0 %v11132_v15 }
 0x77f   :  { %6262 = vmatmul.mubr.msk.f32.gmra.mrb[164].mxu1 %vm3153_vm7, %v10133_v9  ;;  %v10457_v9 = vrot.slane %v4394_v16, %v8728_v45 }
 0x780   :  { %4347 = vmatprep.mubr.f32.mxu1 %v11133_v26 }
 0x783   :  { %6263 = vmatmul.mubr.msk.f32.gmra.mrb[166].mxu1 %vm3153_vm7, %v10131_v23  ;;  %v10454_v23 = vrot.slane %v4394_v16, %v8723_v43  ;;  %v6288_v16 = vld [vmem:[%s11042_s8 + $0x100] sm:$0xff] }
 0x784   :  { %4353 = vmatprep.mubr.f32.mxu1 %v11133_v26 }
 0x787   :  { %6264 = vmatmul.mubr.msk.f32.gmra.mrb[168].mxu1 %vm3153_vm7, %v10137_v10 }
 0x788   :  { %4359 = vmatprep.mubr.f32.mxu1 %v11133_v26 }
 0x78b   :  { %6265 = vmatmul.mubr.msk.f32.gmra.mrb[170].mxu1 %vm3153_vm7, %v10135_v17 }
 0x78c   :  { %4365 = vmatprep.mubr.f32.mxu1 %v11133_v26 }
 0x78f   :  { %6266 = vmatmul.mubr.msk.f32.gmra.mrb[172].mxu1 %vm3153_vm7, %v10141_v55  ;;  %v6276_v55 = vld [vmem:[%s11042_s8 + $0xa0] sm:$0xff] }
 0x790   :  { %4371 = vmatprep.mubr.f32.mxu1 %v11133_v26  ;;  %v7305_v27 = vpack.c.bf16 %v6277_v22, %v6276_v55 }
 0x793   :  { %6267 = vmatmul.mubr.msk.f32.gmra.mrb[174].mxu1 %vm3153_vm7, %v10139_v32 }
 0x84a   :  { %v4331_v17 = vpop.f32.mrb[160].mxu1 }
 0x84b   :  { %v10460_v10 = vadd.f32 %v10454_v23, %v4331_v17  ;;  %v4333_v32 = vpop.f32.mrb[161].mxu1  ;;  %v6289_v17 = vld [vmem:[%s11042_s8 + $0x108] sm:$0xff] }
 0x84c   :  { %v10469_v42 = vadd.f32 %v10457_v9, %v4333_v32 }
 0x84d   :  { %v4422_v36 = vmax.f32 %v10460_v10, 0.0  ;;  %v4722_v10 = vld [vmem:[%s11043_s9] sm:$0xff] }
 0x84e   :  { %v4423_v37 = vmax.f32 %v10469_v42, 0.0  ;;  %v4337_v44 = vpop.f32.mrb[162].mxu1  ;;  %v6308_v42 = vld [vmem:[%s11043_s9 + $0x20] sm:$0xff] }
 0x84f   :  { %v10474_v50 = vadd.f32 %v10454_v23, %v4337_v44  ;;  %v4339_v47 = vpop.f32.mrb[163].mxu1  ;;  %v7323_v44 = vpack.c.bf16 %v6289_v17, %v6288_v16  ;;  %6752 = vmatprep.mubr.msk.f32.mxu1 %vm2456_vm5, %v6308_v42  ;;  %v6320_v42 = vld [vmem:[%s11045_s11 + $0xa8] sm:$0xff] }
 0x850   :  { %v10483_v20 = vadd.f32 %v10457_v9, %v4339_v47  ;;  %6268 = vmatprep.mubr.msk.f32.mxu0 %vm4458_vm8, %v4423_v37 }
 0x851   :  { %4548 = vmatmul.mubr.f32.vlgmr.msra.gmra.mrb[64].mxu0 %v4422_v36  ;;  %v4424_v34 = vmax.f32 %v10474_v50, 0.0 }
 0x852   :  { %v4425_v49 = vmax.f32 %v10483_v20, 0.0  ;;  %7306 = vmatpush1.bf16.msra.mxu0 %v7305_v27  ;;  %v4343_v24 = vpop.f32.mrb[164].mxu1 }
 0x853   :  { %v10493_v2 = vadd.f32 %v10454_v23, %v4343_v24  ;;  %v4345_v62 = vpop.f32.mrb[165].mxu1  ;;  %7307 = vmatprep.subr.bf16.mxu0 %v11132_v15  ;;  %v6291_v24 = vld [vmem:[%s11042_s8 + $0x118] sm:$0xff] }
 0x854   :  { %v10503_v12 = vadd.f32 %v10457_v9, %v4345_v62  ;;  %6269 = vmatprep.mubr.msk.f32.mxu0 %vm4458_vm8, %v4425_v49  ;;  %v7326_v5 = vpack.c.bf16 %v6291_v24, %v6290_v25  ;;  %v4724_v25 = vld [vmem:[%s11043_s9 + $0x10] sm:$0xff] }
 0x855   :  { %4553 = vmatmul.mubr.f32.gmra.mrb[66].mxu0 %v4424_v34  ;;  %v4426_v61 = vmax.f32 %v10493_v2, 0.0  ;;  %v6310_v24 = vld [vmem:[%s11043_s9 + $0x30] sm:$0xff] }
 0x856   :  { %v4427_v59 = vmax.f32 %v10503_v12, 0.0  ;;  %7309 = vmatpush1.bf16.msra.mxu0 %v7308_v57  ;;  %v4349_v28 = vpop.f32.mrb[166].mxu1 }
 0x857   :  { %v10513_v39 = vadd.f32 %v10454_v23, %v4349_v28  ;;  %v4351_v53 = vpop.f32.mrb[167].mxu1  ;;  %7310 = vmatprep.subr.bf16.mxu0 %v11132_v15  ;;  %v6293_v28 = vld [vmem:[%s11042_s8 + $0x128] sm:$0xff] }
 0x858   :  { %v10523_v0 = vadd.f32 %v10457_v9, %v4351_v53  ;;  %6270 = vmatprep.mubr.msk.f32.mxu0 %vm4458_vm8, %v4427_v59  ;;  %v6295_v53 = vld [vmem:[%s11042_s8 + $0x138] sm:$0xff] }
 0x859   :  { %4558 = vmatmul.mubr.f32.gmra.mrb[68].mxu0 %v4426_v61  ;;  %v4428_v58 = vmax.f32 %v10513_v39, 0.0 }
 0x85a   :  { %v4429_v29 = vmax.f32 %v10523_v0, 0.0  ;;  %7312 = vmatpush1.bf16.msra.mxu0 %v7311_v7  ;;  %v4355_v3 = vpop.f32.mrb[168].mxu1  ;;  %v6294_v7 = vld [vmem:[%s11042_s8 + $0x130] sm:$0xff] }
 0x85b   :  { %v10533_v56 = vadd.f32 %v10454_v23, %v4355_v3  ;;  %v4357_v63 = vpop.f32.mrb[169].mxu1  ;;  %7313 = vmatprep.subr.bf16.mxu0 %v11132_v15  ;;  %v7332_v38 = vpack.c.bf16 %v6295_v53, %v6294_v7 }
 0x85c   :  { %v10543_v4 = vadd.f32 %v10457_v9, %v4357_v63  ;;  %6271 = vmatprep.mubr.msk.f32.mxu0 %vm4458_vm8, %v4429_v29 }
 0x85d   :  { %4563 = vmatmul.mubr.f32.gmra.mrb[70].mxu0 %v4428_v58  ;;  %v4430_v14 = vmax.f32 %v10533_v56, 0.0 }
 0x85e   :  { %v4431_v33 = vmax.f32 %v10543_v4, 0.0  ;;  %7315 = vmatpush1.bf16.msra.mxu0 %v7314_v11  ;;  %v4361_v8 = vpop.f32.mrb[170].mxu1 }
 0x85f   :  { %v10553_v31 = vadd.f32 %v10454_v23, %v4361_v8  ;;  %v4363_v13 = vpop.f32.mrb[171].mxu1  ;;  %7316 = vmatprep.subr.bf16.mxu0 %v11132_v15 }
 0x860   :  { %v4417_v18 = vadd.f32 %v10457_v9, %v4363_v13  ;;  %6272 = vmatprep.mubr.msk.f32.mxu0 %vm4458_vm8, %v4431_v33 }
 0x861   :  { %4568 = vmatmul.mubr.f32.gmra.mrb[72].mxu0 %v4430_v14  ;;  %v4432_v1 = vmax.f32 %v10553_v31, 0.0 }
 0x862   :  { %v4433_v21 = vmax.f32 %v4417_v18, 0.0  ;;  %7318 = vmatpush1.bf16.msra.mxu0 %v7317_v6  ;;  %v4367_v60 = vpop.f32.mrb[172].mxu1 }
 0x863   :  { %v4418_v35 = vadd.f32 %v10454_v23, %v4367_v60  ;;  %v4369_v30 = vpop.f32.mrb[173].mxu1  ;;  %7319 = vmatprep.subr.bf16.mxu0 %v11132_v15 }
 0x864   :  { %v4419_v32 = vadd.f32 %v10457_v9, %v4369_v30  ;;  %6273 = vmatprep.mubr.msk.f32.mxu0 %vm4458_vm8, %v4433_v21 }
 0x865   :  { %4573 = vmatmul.mubr.f32.gmra.mrb[74].mxu0 %v4432_v1  ;;  %v4434_v27 = vmax.f32 %v4418_v35, 0.0 }
 0x866   :  { %v4435_v55 = vmax.f32 %v4419_v32, 0.0  ;;  %7321 = vmatpush1.bf16.msra.mxu0 %v7320_v46  ;;  %v4373_v22 = vpop.f32.mrb[174].mxu1 }
 0x867   :  { %v4420_v47 = vadd.f32 %v10454_v23, %v4373_v22  ;;  %v4375_v48 = vpop.f32.mrb[175].mxu1  ;;  %7322 = vmatprep.subr.bf16.mxu0 %v11132_v15 }
 0x868   :  { %v4421_v57 = vadd.f32 %v10457_v9, %v4375_v48  ;;  %6274 = vmatprep.mubr.msk.f32.mxu0 %vm4458_vm8, %v4435_v55  ;;  %v7329_v9 = vpack.c.bf16 %v6293_v28, %v6292_v41  ;;  %v6309_v48 = vld [vmem:[%s11043_s9 + $0x28] sm:$0xff] }
 0x869   :  { %4578 = vmatmul.mubr.f32.gmra.mrb[76].mxu0 %v4434_v27  ;;  %v4436_v23 = vmax.f32 %v4420_v47, 0.0  ;;  %v4723_v47 = vld [vmem:[%s11043_s9 + $0x8] sm:$0xff] }
 0x86a   :  { %v4437_v62 = vmax.f32 %v4421_v57, 0.0  ;;  %7324 = vmatpush1.bf16.msra.mxu0 %v7323_v44  ;;  %v4725_v57 = vld [vmem:[%s11043_s9 + $0x18] sm:$0xff] }
 0x86b   :  { %7325 = vmatprep.subr.bf16.mxu0 %v11132_v15 }
 0x86c   :  { %6275 = vmatprep.mubr.msk.f32.mxu0 %vm4458_vm8, %v4437_v62 }
 0x86d   :  { %4583 = vmatmul.mubr.f32.gmra.mrb[78].mxu0 %v4436_v23 }
 0x86e   :  { %7327 = vmatpush1.bf16.msra.mxu0 %v7326_v5  ;;  %6296 = vmatprep.mubr.msk.f32.mxu0 %vm4458_vm8, %v4423_v37 }
 0x86f   :  { %7328 = vmatprep.subr.bf16.mxu0 %v11132_v15 }
 0x872   :  { %7330 = vmatpush1.bf16.msra.mxu0 %v7329_v9 }
 0x873   :  { %7331 = vmatprep.subr.bf16.mxu0 %v11132_v15 }
 0x876   :  { %7333 = vmatpush1.bf16.msra.mxu0 %v7332_v38 }
 0x879   :  { %4674 = vmatmul.mubr.f32.vlgmr.msra.gmra.mrb[80].mxu0 %v4422_v36 }
 0x87a   :  { %6297 = vmatprep.mubr.msk.f32.mxu0 %vm4458_vm8, %v4425_v49 }
 0x87d   :  { %4679 = vmatmul.mubr.f32.gmra.mrb[82].mxu0 %v4424_v34 }
 0x87e   :  { %6298 = vmatprep.mubr.msk.f32.mxu0 %vm4458_vm8, %v4427_v59 }
 0x881   :  { %4684 = vmatmul.mubr.f32.gmra.mrb[84].mxu0 %v4426_v61 }
 0x882   :  { %6299 = vmatprep.mubr.msk.f32.mxu0 %vm4458_vm8, %v4429_v29 }
 0x885   :  { %4689 = vmatmul.mubr.f32.gmra.mrb[86].mxu0 %v4428_v58 }
 0x886   :  { %6300 = vmatprep.mubr.msk.f32.mxu0 %vm4458_vm8, %v4431_v33 }
 0x889   :  { %4694 = vmatmul.mubr.f32.gmra.mrb[88].mxu0 %v4430_v14 }
 0x88a   :  { %6301 = vmatprep.mubr.msk.f32.mxu0 %vm4458_vm8, %v4433_v21 }
 0x88d   :  { %4699 = vmatmul.mubr.f32.gmra.mrb[90].mxu0 %v4432_v1 }
 0x88e   :  { %6302 = vmatprep.mubr.msk.f32.mxu0 %vm4458_vm8, %v4435_v55 }
 0x891   :  { %4704 = vmatmul.mubr.f32.gmra.mrb[92].mxu0 %v4434_v27 }
 0x892   :  { %6303 = vmatprep.mubr.msk.f32.mxu0 %vm4458_vm8, %v4437_v62  ;;  %v6311_v62 = vld [vmem:[%s11043_s9 + $0x38] sm:$0xff] }
 0x895   :  { %4709 = vmatmul.mubr.f32.gmra.mrb[94].mxu0 %v4436_v23 }
 0x896   :  { %6730 = vmatprep.mubr.msk.f32.mxu0 %vm2456_vm5, %v4722_v10 }
 0x924   :  { %v4549_v37 = vpop.f32.mrb[64].mxu0 }
 0x925   :  { %v4551_v36 = vpop.f32.mrb[65].mxu0 }
 0x928   :  { %v4554_v50 = vpop.f32.mrb[66].mxu0 }
 0x929   :  { %v4556_v20 = vpop.f32.mrb[67].mxu0 }
 0x92c   :  { %v4559_v49 = vpop.f32.mrb[68].mxu0 }
 0x92d   :  { %v4561_v34 = vpop.f32.mrb[69].mxu0 }
 0x930   :  { %v4564_v2 = vpop.f32.mrb[70].mxu0 }
 0x931   :  { %v4566_v12 = vpop.f32.mrb[71].mxu0 }
 0x932   :  { %v6319_v12 = vld [vmem:[%s11045_s11 + $0xa0] sm:$0xff] }
 0x934   :  { %v4569_v59 = vpop.f32.mrb[72].mxu0 }
 0x935   :  { %v4571_v61 = vpop.f32.mrb[73].mxu0 }
 0x936   :  { %v6324_v61 = vld [vmem:[%s11045_s11 + $0xc8] sm:$0xff] }
 0x938   :  { %v4574_v39 = vpop.f32.mrb[74].mxu0 }
 0x939   :  { %v4576_v54 = vpop.f32.mrb[75].mxu0 }
 0x93a   :  { %v6317_v54 = vld [vmem:[%s11044_s10 + $0x8] sm:$0xff] }
 0x93c   :  { %v4579_v0 = vpop.f32.mrb[76].mxu0 }
 0x93d   :  { %v4581_v29 = vpop.f32.mrb[77].mxu0 }
 0x940   :  { %v4584_v3 = vpop.f32.mrb[78].mxu0 }
 0x941   :  { %v4586_v11 = vpop.f32.mrb[79].mxu0 }
 0x942   :  { %v6323_v11 = vld [vmem:[%s11045_s11 + $0xc0] sm:$0xff] }
 0x94c   :  { %v4675_v58 = vpop.f32.mrb[80].mxu0 }
 0x94d   :  { %v4714_v56 = vmax.f32 %v4549_v37, %v4675_v58  ;;  %v4677_v63 = vpop.f32.mrb[81].mxu0  ;;  %v6322_v37 = vld [vmem:[%s11045_s11 + $0xb8] sm:$0xff]  ;;  %v6325_v58 = vld [vmem:[%s11045_s11 + $0xd0] sm:$0xff] }
 0x94e   :  { %v7378_v34 = vpack.c.bf16 %v6322_v37, %v6320_v42  ;;  %v6330_v63 = vld [vmem:[%s11045_s11 + $0xf8] sm:$0xff]  ;;  %v5640_v42 = vld [vmem:[%s11047_s13 + $0x60] sm:$0xff]  ;;  %v5641_v37 = vld [vmem:[%s11047_s13 + $0x68] sm:$0xff] }
 0x950   :  { %v4680_v40 = vpop.f32.mrb[82].mxu0 }
 0x951   :  { %v4715_v19 = vmax.f32 %v4554_v50, %v4680_v40  ;;  %v4682_v4 = vpop.f32.mrb[83].mxu0  ;;  %v7384_v40 = vpack.c.bf16 %v6325_v58, %v6323_v11 }
 0x952   :  { %v6327_v4 = vld [vmem:[%s11045_s11 + $0xe0] sm:$0xff] }
 0x953   :  { %v7334_v33 = vpack.c.bf16 %v4715_v19, %v4714_v56  ;;  %v6328_v56 = vld [vmem:[%s11045_s11 + $0xe8] sm:$0xff] }
 0x954   :  { %v4685_v8 = vpop.f32.mrb[84].mxu0  ;;  %v7386_v19 = vpack.c.bf16 %v6330_v63, %v6328_v56 }
 0x955   :  { %v4716_v6 = vmax.f32 %v4559_v49, %v4685_v8  ;;  %v4687_v14 = vpop.f32.mrb[85].mxu0  ;;  %7335 = vmatprep.subr.bf16.mxu0 %v7334_v33  ;;  %7351 = vmatprep.subr.bf16.mxu1 %v7334_v33  ;;  %v6332_v8 = vld [vmem:[%s11045_s11 + $0x108] sm:$0xff] }
 0x956   :  { %7337 = vmatpush3.bf16.msra.mxu0 %v7334_v33  ;;  %7353 = vmatpush3.bf16.msra.mxu1 %v7334_v33  ;;  %v6329_v33 = vld [vmem:[%s11045_s11 + $0xf0] sm:$0xff] }
 0x957   :  { %v6341_v14 = vld [vmem:[%s11044_s10 + $0x10] sm:$0xff] }
 0x958   :  { %v4690_v31 = vpop.f32.mrb[86].mxu0 }
 0x959   :  { %v4717_v13 = vmax.f32 %v4564_v2, %v4690_v31  ;;  %v4692_v52 = vpop.f32.mrb[87].mxu0  ;;  %v7388_v31 = vpack.c.bf16 %v6329_v33, %v6327_v4  ;;  %v5013_v4 = vld [vmem:[%s11045_s11 + $0x50] sm:$0xff]  ;;  %v5016_v33 = vld [vmem:[%s11045_s11 + $0x68] sm:$0xff] }
 0x95a   :  { %v6331_v52 = vld [vmem:[%s11045_s11 + $0x100] sm:$0xff] }
 0x95b   :  { %v7338_v51 = vpack.c.bf16 %v4717_v13, %v4716_v6  ;;  %v6334_v6 = vld [vmem:[%s11045_s11 + $0x118] sm:$0xff] }
 0x95c   :  { %v4695_v18 = vpop.f32.mrb[88].mxu0  ;;  %v7390_v13 = vpack.c.bf16 %v6334_v6, %v6332_v8  ;;  %v5018_v8 = vld [vmem:[%s11045_s11 + $0x78] sm:$0xff] }
 0x95d   :  { %v4718_v21 = vmax.f32 %v4569_v59, %v4695_v18  ;;  %v4697_v60 = vpop.f32.mrb[89].mxu0  ;;  %7339 = vmatprep.subr.bf16.mxu0 %v7338_v51  ;;  %7355 = vmatprep.subr.bf16.mxu1 %v7338_v51  ;;  %v6321_v59 = vld [vmem:[%s11045_s11 + $0xb0] sm:$0xff]  ;;  %v6336_v18 = vld [vmem:[%s11045_s11 + $0x128] sm:$0xff] }
 0x95e   :  { %7341 = vmatpush3.bf16.msra.mxu0 %v7338_v51  ;;  %7357 = vmatpush3.bf16.msra.mxu1 %v7338_v51  ;;  %v7380_v29 = vpack.c.bf16 %v6321_v59, %v6319_v12  ;;  %v6333_v51 = vld [vmem:[%s11045_s11 + $0x110] sm:$0xff]  ;;  %v5008_v12 = vld [vmem:[%s11045_s11 + $0x28] sm:$0xff]  ;;  %v5010_v59 = vld [vmem:[%s11045_s11 + $0x38] sm:$0xff] }
 0x95f   :  { %v7392_v60 = vpack.c.bf16 %v6333_v51, %v6331_v52  ;;  %v5020_v52 = vld [vmem:[%s11045_s11 + $0x88] sm:$0xff]  ;;  %v5022_v51 = vld [vmem:[%s11045_s11 + $0x98] sm:$0xff] }
 0x960   :  { %v4700_v46 = vpop.f32.mrb[90].mxu0 }
 0x961   :  { %v4719_v1 = vmax.f32 %v4574_v39, %v4700_v46  ;;  %v4702_v35 = vpop.f32.mrb[91].mxu0  ;;  %v6326_v39 = vld [vmem:[%s11045_s11 + $0xd8] sm:$0xff] }
 0x962   :  { %v6337_v35 = vld [vmem:[%s11045_s11 + $0x130] sm:$0xff] }
 0x963   :  { %v7342_v30 = vpack.c.bf16 %v4719_v1, %v4718_v21  ;;  %v6338_v21 = vld [vmem:[%s11045_s11 + $0x138] sm:$0xff]  ;;  %v6335_v1 = vld [vmem:[%s11045_s11 + $0x120] sm:$0xff] }
 0x964   :  { %v4705_v16 = vpop.f32.mrb[92].mxu0  ;;  %v7394_v46 = vpack.c.bf16 %v6338_v21, %v6336_v18 }
 0x965   :  { %v4720_v17 = vmax.f32 %v4579_v0, %v4705_v16  ;;  %v4707_v32 = vpop.f32.mrb[93].mxu0  ;;  %7343 = vmatprep.subr.bf16.mxu0 %v7342_v30  ;;  %7359 = vmatprep.subr.bf16.mxu1 %v7342_v30  ;;  %v4929_v0 = vld [vmem:[%s11044_s10] sm:$0xff]  ;;  %v7396_v16 = vpack.c.bf16 %v6337_v35, %v6335_v1  ;;  %v5021_v35 = vld [vmem:[%s11045_s11 + $0x90] sm:$0xff] }
 0x966   :  { %7345 = vmatpush3.bf16.msra.mxu0 %v7342_v30  ;;  %7361 = vmatpush3.bf16.msra.mxu1 %v7342_v30  ;;  %v6364_v30 = vld [vmem:[%s11044_s10 + $0x18] sm:$0xff]  ;;  %v5019_v1 = vld [vmem:[%s11045_s11 + $0x80] sm:$0xff]  ;;  %s5740_s10 = sshll.u32 %s7792_s20, 4  ;;  %s5741_s10 = int_to_ptr.vmem [resolvable:$true] %s5740_s10 }
 0x967   :  { %v5006_v32 = vld [vmem:[%s11045_s11 + $0x18] sm:$0xff]  ;;  %p7769_p1 = scmp.lt.s32.totalorder %s5741_s10, %s5741_s10 }
 0x968   :  { %v4710_v55 = vpop.f32.mrb[94].mxu0 }
 0x969   :  { %v4721_v22 = vmax.f32 %v4584_v3, %v4710_v55  ;;  %v4712_v44 = vpop.f32.mrb[95].mxu0  ;;  %v7382_v3 = vpack.c.bf16 %v6326_v39, %v6324_v61  ;;  %v7402_v39 = vpack.c.bf16 %v5010_v59, %v5008_v12  ;;  %v6361_v12 = vld [vmem:[%s11045_s11 + $0x1d0] sm:$0xff]  ;;  %v6367_v59 = vld [vmem:[%s11045_s11 + $0x1e8] sm:$0xff] }
 0x96a   :  { %v5629_v44 = vld [vmem:[%s11047_s13 + $0x8] sm:$0xff] }
 0x96b   :  { %v7346_v27 = vpack.c.bf16 %v4721_v22, %v4720_v17  ;;  %v5004_v17 = vld [vmem:[%s11045_s11 + $0x8] sm:$0xff]  ;;  %v5628_v22 = vld [vmem:[%s11047_s13] sm:$0xff] }
 0x96c   :  { %v7398_v55 = vpack.c.bf16 %v5006_v32, %v5004_v17  ;;  %v7416_v17 = vpack.c.bf16 %v5021_v35, %v5019_v1  ;;  %v6382_v35 = vld [vmem:[%s11045_s11 + $0x260] sm:$0xff] }
 0x96d   :  { %7347 = vmatprep.subr.bf16.mxu0 %v7346_v27  ;;  %7363 = vmatprep.subr.bf16.mxu1 %v7346_v27 }
 0x96e   :  { %7349 = vmatpush3.bf16.msra.mxu0 %v7346_v27  ;;  %7365 = vmatpush3.bf16.msra.mxu1 %v7346_v27  ;;  %v5630_v27 = vld [vmem:[%s11047_s13 + $0x10] sm:$0xff] }
 0x96f   :  { %7372 = vmatprep.subr.bf16.mxu0 %v11132_v15  ;;  %7366 = vmatprep.subr.bf16.mxu1 %v11132_v15 }
 0x971   :  { %6731 = vmatmul.mubr.msk.f32.vlgmr.msra.gmra.mrb[96].mxu0 %vm2456_vm5, %v4723_v47  ;;  %6753 = vmatmul.mubr.msk.f32.vlgmr.msra.gmra.mrb[184].mxu1 %vm2456_vm5, %v6309_v48  ;;  %v7471_v47 = vpack.c.bf16 %v5629_v44, %v5628_v22  ;;  %v5631_v48 = vld [vmem:[%s11047_s13 + $0x18] sm:$0xff]  ;;  %v6345_v22 = vld [vmem:[%s11045_s11 + $0x150] sm:$0xff]  ;;  %v6348_v44 = vld [vmem:[%s11045_s11 + $0x168] sm:$0xff] }
 0x972   :  { %6733 = vmatprep.mubr.msk.f32.mxu0 %vm2456_vm5, %v4724_v25  ;;  %6755 = vmatprep.mubr.msk.f32.mxu1 %vm2456_vm5, %v6310_v24  ;;  %v7474_v25 = vpack.c.bf16 %v5631_v48, %v5630_v27  ;;  %v5632_v24 = vld [vmem:[%s11047_s13 + $0x20] sm:$0xff]  ;;  %v6350_v27 = vld [vmem:[%s11045_s11 + $0x178] sm:$0xff] }
 0x975   :  { %6734 = vmatmul.mubr.msk.f32.gmra.mrb[98].mxu0 %vm2456_vm5, %v4725_v57  ;;  %6756 = vmatmul.mubr.msk.f32.gmra.mrb[186].mxu1 %vm2456_vm5, %v6311_v62  ;;  %v5633_v57 = vld [vmem:[%s11047_s13 + $0x28] sm:$0xff] }
 0x976   :  { %6777 = vmatprep.mubr.msk.f32.mxu0 %vm7791_vm9, %v11133_v26  ;;  %6766 = vmatprep.mubr.msk.f32.mxu1 %vm7791_vm9, %v11133_v26  ;;  %v7477_v62 = vpack.c.bf16 %v5633_v57, %v5632_v24  ;;  %v7428_v24 = vpack.c.bf16 %v6350_v27, %v6348_v44  ;;  %v6347_v57 = vld [vmem:[%s11045_s11 + $0x160] sm:$0xff] }
 0x977   :  { %v5612_v44 = vld [vmem:[%s11046_s12] sm:$0x3]  ;;  %s7764_s12 = scalar_lea.vmem %s5741_s10, 128 }
 0x978   :  { %v5617_v27 = vrot.slane %v5612_v44, %v8723_v43  ;;  %p7765_p0 = scmp.ne.s32.totalorder %s5741_s10, %s7764_s12  ;;  %p7770_p2 = scmp.lt.s32.totalorder %s7764_s12, %s7764_s12 }
 0x97a   :  { %p7771_p3 = por %p7770_p2, %p7769_p1 }
 0x97c   :  { %p7772_p4 = pnand %p7771_p3, %p7765_p0 }
 0xa44   :  { %v6732_v5 = vpop.f32.mrb[96].mxu0  ;;  %v6754_v23 = vpop.f32.mrb[184].mxu1 }
 0xa45   :  { %v4926_v41 = vmax.f32 %v6732_v5, %v6754_v23  ;;  %v4804_v28 = vpop.f32.mrb[97].mxu0  ;;  %v4906_v9 = vpop.f32.mrb[185].mxu1  ;;  %v5634_v5 = vld [vmem:[%s11047_s13 + $0x30] sm:$0xff]  ;;  %v5635_v23 = vld [vmem:[%s11047_s13 + $0x38] sm:$0xff] }
 0xa46   :  { %v4925_v7 = vmax.f32 %v4804_v28, %v4906_v9  ;;  %v5636_v28 = vld [vmem:[%s11047_s13 + $0x40] sm:$0xff]  ;;  %v5637_v9 = vld [vmem:[%s11047_s13 + $0x48] sm:$0xff] }
 0xa48   :  { %v7367_v53 = vpack.c.bf16 %v4926_v41, %v4925_v7  ;;  %v6735_v38 = vpop.f32.mrb[98].mxu0  ;;  %v6757_v10 = vpop.f32.mrb[186].mxu1  ;;  %v7480_v41 = vpack.c.bf16 %v5635_v23, %v5634_v5  ;;  %v7483_v7 = vpack.c.bf16 %v5637_v9, %v5636_v28  ;;  %v6352_v5 = vld [vmem:[%s11045_s11 + $0x188] sm:$0xff]  ;;  %v6354_v23 = vld [vmem:[%s11045_s11 + $0x198] sm:$0xff]  ;;  %v6351_v9 = vld [vmem:[%s11045_s11 + $0x180] sm:$0xff] }
 0xa49   :  { %v4928_v36 = vmax.f32 %v6735_v38, %v6757_v10  ;;  %v4814_v50 = vpop.f32.mrb[99].mxu0  ;;  %v4916_v20 = vpop.f32.mrb[187].mxu1  ;;  %v5639_v38 = vld [vmem:[%s11047_s13 + $0x58] sm:$0xff]  ;;  %v7432_v28 = vpack.c.bf16 %v6354_v23, %v6352_v5  ;;  %v6387_v5 = vld [vmem:[%s11048_s14] ss:$0 sm:$0xff] }
 0xa4a   :  { %v4927_v49 = vmax.f32 %v4814_v50, %v4916_v20  ;;  %7374 = vmatpush3.bf16.msra.mxu0 %v7367_v53  ;;  %7368 = vmatpush3.bf16.msra.mxu1 %v7367_v53  ;;  %v5642_v50 = vld [vmem:[%s11047_s13 + $0x70] sm:$0xff]  ;;  %v5643_v20 = vld [vmem:[%s11047_s13 + $0x78] sm:$0xff] }
 0xa4b   :  { %7375 = vmatprep.subr.bf16.mxu0 %v11132_v15  ;;  %7369 = vmatprep.subr.bf16.mxu1 %v11132_v15 }
 0xa4c   :  { %v7370_v2 = vpack.c.bf16 %v4928_v36, %v4927_v49  ;;  %v7489_v36 = vpack.c.bf16 %v5641_v37, %v5640_v42  ;;  %v7492_v49 = vpack.c.bf16 %v5643_v20, %v5642_v50  ;;  %v6355_v37 = vld [vmem:[%s11045_s11 + $0x1a0] sm:$0xff]  ;;  %v6360_v50 = vld [vmem:[%s11045_s11 + $0x1c8] sm:$0xff]  ;;  %v6362_v20 = vld [vmem:[%s11045_s11 + $0x1d8] sm:$0xff] }
 0xa4e   :  { %7377 = vmatpush3.bf16.msra.mxu0 %v7370_v2  ;;  %7371 = vmatpush3.bf16.msra.mxu1 %v7370_v2 }
 0xa4f   :  { %7418 = vmatprep.subr.bf16.mxu0 %v11132_v15  ;;  %7379 = vmatprep.subr.bf16.mxu1 %v7378_v34  ;;  %v5003_v34 = vld [vmem:[%s11045_s11] sm:$0xff] }
 0xa51   :  { %6778 = vmatmul.mubr.msk.f32.vlgmr.msra.gmra.mrb[100].mxu0 %vm4458_vm8, %v6317_v54  ;;  %6767 = vmatmul.mubr.msk.f32.vlgmr.msra.gmra.mrb[188].mxu1 %vm4458_vm8, %v4929_v0  ;;  %v5009_v54 = vld [vmem:[%s11045_s11 + $0x30] sm:$0xff] }
 0xa52   :  { %7420 = vmatpush3.bf16.msra.mxu0 %v7367_v53  ;;  %6788 = vmatprep.mubr.msk.f32.mxu0 %vm7791_vm9, %v11133_v26 }
 0xa53   :  { %7421 = vmatprep.subr.bf16.mxu0 %v11132_v15  ;;  %7381 = vmatpush1.bf16.msra.mxu1 %v7380_v29  ;;  %v5012_v29 = vld [vmem:[%s11045_s11 + $0x48] sm:$0xff] }
 0xa54   :  { %7383 = vmatprep.subr.bf16.mxu1 %v7382_v3  ;;  %5187 = vmatprep.mubr.f32.mxu1 %v11133_v26  ;;  %v5014_v3 = vld [vmem:[%s11045_s11 + $0x58] sm:$0xff] }
 0xa56   :  { %7423 = vmatpush3.bf16.msra.mxu0 %v7370_v2 }
 0xa57   :  { %7444 = vmatprep.subr.bf16.mxu0 %v11132_v15  ;;  %7385 = vmatpush1.bf16.msra.mxu1 %v7384_v40  ;;  %v7406_v40 = vpack.c.bf16 %v5014_v3, %v5012_v29  ;;  %v6371_v29 = vld [vmem:[%s11045_s11 + $0x208] sm:$0xff]  ;;  %v6373_v3 = vld [vmem:[%s11045_s11 + $0x218] sm:$0xff] }
 0xa58   :  { %7387 = vmatprep.subr.bf16.mxu1 %v7386_v19  ;;  %v5011_v19 = vld [vmem:[%s11045_s11 + $0x40] sm:$0xff] }
 0xa59   :  { %6789 = vmatmul.mubr.msk.f32.vlgmr.msra.gmra.mrb[102].mxu0 %vm4458_vm8, %v6341_v14  ;;  %v7408_v6 = vpack.c.bf16 %v5013_v4, %v5011_v19  ;;  %v7410_v14 = vpack.c.bf16 %v5018_v8, %v5016_v33  ;;  %v6377_v19 = vld [vmem:[%s11045_s11 + $0x238] sm:$0xff]  ;;  %v6374_v8 = vld [vmem:[%s11045_s11 + $0x220] sm:$0xff] }
 0xa5a   :  { %7446 = vmatpush3.bf16.msra.mxu0 %v7367_v53  ;;  %6799 = vmatprep.mubr.msk.f32.mxu0 %vm7791_vm9, %v11133_v26  ;;  %v5638_v53 = vld [vmem:[%s11047_s13 + $0x50] sm:$0xff] }
 0xa5b   :  { %7447 = vmatprep.subr.bf16.mxu0 %v11132_v15  ;;  %7389 = vmatpush1.bf16.msra.mxu1 %v7388_v31  ;;  %v7486_v10 = vpack.c.bf16 %v5639_v38, %v5638_v53  ;;  %v5015_v31 = vld [vmem:[%s11045_s11 + $0x60] sm:$0xff]  ;;  %v6356_v53 = vld [vmem:[%s11045_s11 + $0x1a8] sm:$0xff]  ;;  %v6358_v38 = vld [vmem:[%s11045_s11 + $0x1b8] sm:$0xff] }
 0xa5c   :  { %7391 = vmatprep.subr.bf16.mxu1 %v7390_v13  ;;  %v5017_v13 = vld [vmem:[%s11045_s11 + $0x70] sm:$0xff]  ;;  %v7436_v42 = vpack.c.bf16 %v6358_v38, %v6356_v53 }
 0xa5e   :  { %7449 = vmatpush3.bf16.msra.mxu0 %v7370_v2  ;;  %v5005_v2 = vld [vmem:[%s11045_s11 + $0x10] sm:$0xff] }
 0xa5f   :  { %7393 = vmatpush1.bf16.msra.mxu1 %v7392_v60  ;;  %7470 = vmatprep.subr.bf16.mxu0 %v11132_v15  ;;  %v7400_v61 = vpack.c.bf16 %v5005_v2, %v5003_v34  ;;  %v7412_v60 = vpack.c.bf16 %v5017_v13, %v5015_v31  ;;  %v7440_v34 = vpack.c.bf16 %v6362_v20, %v6360_v50  ;;  %v6359_v2 = vld [vmem:[%s11045_s11 + $0x1c0] sm:$0xff]  ;;  %v6381_v31 = vld [vmem:[%s11045_s11 + $0x258] sm:$0xff] }
 0xa60   :  { %7395 = vmatprep.subr.bf16.mxu1 %v7394_v46  ;;  %v7414_v46 = vpack.c.bf16 %v5022_v51, %v5020_v52  ;;  %v6378_v51 = vld [vmem:[%s11045_s11 + $0x240] sm:$0xff] }
 0xa61   :  { %6800 = vmatmul.mubr.msk.f32.vlgmr.msra.gmra.mrb[104].mxu0 %vm4458_vm8, %v6364_v30  ;;  %v6344_v30 = vld [vmem:[%s11045_s11 + $0x148] sm:$0xff] }
 0xa62   :  { %7472 = vmatpush1.bf16.msra.mxu0 %v7471_v47 }
 0xa63   :  { %7397 = vmatpush1.bf16.msra.mxu1 %v7396_v16  ;;  %7473 = vmatprep.subr.bf16.mxu0 %v11132_v15  ;;  %v6346_v16 = vld [vmem:[%s11045_s11 + $0x158] sm:$0xff] }
 0xa64   :  { %7399 = vmatprep.subr.bf16.mxu1 %v7398_v55  ;;  %v7424_v32 = vpack.c.bf16 %v6346_v16, %v6344_v30  ;;  %v6343_v55 = vld [vmem:[%s11045_s11 + $0x140] sm:$0xff]  ;;  %v6384_v30 = vld [vmem:[%s11045_s11 + $0x270] sm:$0xff] }
 0xa65   :  { %v7468_v16 = vpack.c.bf16 %v6384_v30, %v6382_v35 }
 0xa66   :  { %7475 = vmatpush1.bf16.msra.mxu0 %v7474_v25  ;;  %v7426_v25 = vpack.c.bf16 %v6345_v22, %v6343_v55  ;;  %v5646_v22 = vld [vmem:[%s11047_s13 + $0x90] sm:$0x3f] }
 0xa67   :  { %7476 = vmatprep.subr.bf16.mxu0 %v11132_v15 }
 0xa6a   :  { %7478 = vmatpush1.bf16.msra.mxu0 %v7477_v62  ;;  %v6349_v62 = vld [vmem:[%s11045_s11 + $0x170] sm:$0xff] }
 0xa6b   :  { %7479 = vmatprep.subr.bf16.mxu0 %v11132_v15 }
 0xa6e   :  { %7481 = vmatpush1.bf16.msra.mxu0 %v7480_v41  ;;  %v7430_v41 = vpack.c.bf16 %v6349_v62, %v6347_v57 }
 0xa6f   :  { %7482 = vmatprep.subr.bf16.mxu0 %v11132_v15 }
 0xa72   :  { %7484 = vmatpush1.bf16.msra.mxu0 %v7483_v7  ;;  %v6353_v7 = vld [vmem:[%s11045_s11 + $0x190] sm:$0xff] }
 0xa73   :  { %7485 = vmatprep.subr.bf16.mxu0 %v11132_v15 }
 0xa76   :  { %7487 = vmatpush1.bf16.msra.mxu0 %v7486_v10  ;;  %v7434_v10 = vpack.c.bf16 %v6353_v7, %v6351_v9 }
 0xa77   :  { %7488 = vmatprep.subr.bf16.mxu0 %v11132_v15 }
 0xa7a   :  { %7490 = vmatpush1.bf16.msra.mxu0 %v7489_v36  ;;  %v6357_v36 = vld [vmem:[%s11045_s11 + $0x1b0] sm:$0xff] }
 0xa7b   :  { %7491 = vmatprep.subr.bf16.mxu0 %v11132_v15 }
 0xa7e   :  { %7493 = vmatpush1.bf16.msra.mxu0 %v7492_v49  ;;  %v7438_v49 = vpack.c.bf16 %v6357_v36, %v6355_v37 }
 0xa7f   :  { %7494 = vmatprep.subr.bf16.mxu0 %v11132_v15  ;;  %v5007_v15 = vld [vmem:[%s11045_s11 + $0x20] sm:$0xff] }
 0xa80   :  { %v7404_v63 = vpack.c.bf16 %v5009_v54, %v5007_v15  ;;  %v6366_v54 = vld [vmem:[%s11045_s11 + $0x1e0] sm:$0xff] }
 0xb24   :  { %v5094_v0 = vpop.f32.mrb[100].mxu0  ;;  %v4999_v11 = vpop.f32.mrb[188].mxu1 }
 0xb25   :  { %6339 = vmatmul.mubr.msk.f32.vlgmr.msra.gmra.mrb[190].mxu1 %vm5119_vm10, %v5094_v0  ;;  %v6779_v58 = vpop.f32.mrb[101].mxu0  ;;  %v6768_v56 = vpop.f32.mrb[189].mxu1  ;;  %v6368_v0 = vld [vmem:[%s11045_s11 + $0x1f0] sm:$0xff] }
 0xb26   :  { %7401 = vmatpush1.bf16.msra.mxu1 %v7400_v61  ;;  %5261 = vmatprep.mubr.f32.mxu1 %v11133_v26  ;;  %v6369_v61 = vld [vmem:[%s11045_s11 + $0x1f8] sm:$0xff]  ;;  %v7454_v58 = vpack.c.bf16 %v6373_v3, %v6371_v29  ;;  %v6370_v56 = vld [vmem:[%s11045_s11 + $0x200] sm:$0xff] }
 0xb27   :  { %7403 = vmatprep.subr.bf16.mxu1 %v7402_v39  ;;  %v7442_v39 = vpack.c.bf16 %v6361_v12, %v6359_v2  ;;  %v7450_v15 = vpack.c.bf16 %v6369_v61, %v6367_v59 }
 0xb2a   :  { %7405 = vmatpush1.bf16.msra.mxu1 %v7404_v63  ;;  %v6372_v63 = vld [vmem:[%s11045_s11 + $0x210] sm:$0xff] }
 0xb2b   :  { %7407 = vmatprep.subr.bf16.mxu1 %v7406_v40  ;;  %v6375_v40 = vld [vmem:[%s11045_s11 + $0x228] sm:$0xff]  ;;  %v7456_v4 = vpack.c.bf16 %v6372_v63, %v6370_v56 }
 0xb2c   :  { %v10867_v18 = vpop.f32.mrb[102].mxu0  ;;  %v7458_v33 = vpack.c.bf16 %v6377_v19, %v6375_v40 }
 0xb2d   :  { %v6790_v21 = vpop.f32.mrb[103].mxu0 }
 0xb2e   :  { %7409 = vmatpush1.bf16.msra.mxu1 %v7408_v6  ;;  %v6376_v6 = vld [vmem:[%s11045_s11 + $0x230] sm:$0xff]  ;;  %v6383_v21 = vld [vmem:[%s11045_s11 + $0x268] sm:$0xff] }
 0xb2f   :  { %7411 = vmatprep.subr.bf16.mxu1 %v7410_v14  ;;  %v6379_v14 = vld [vmem:[%s11045_s11 + $0x248] sm:$0xff]  ;;  %v7460_v13 = vpack.c.bf16 %v6376_v6, %v6374_v8 }
 0xb30   :  { %v7462_v52 = vpack.c.bf16 %v6381_v31, %v6379_v14 }
 0xb32   :  { %7413 = vmatpush1.bf16.msra.mxu1 %v7412_v60  ;;  %v6385_v60 = vld [vmem:[%s11045_s11 + $0x278] sm:$0xff] }
 0xb33   :  { %7415 = vmatprep.subr.bf16.mxu1 %v7414_v46  ;;  %v7466_v1 = vpack.c.bf16 %v6385_v60, %v6383_v21 }
 0xb34   :  { %v10893_v47 = vpop.f32.mrb[104].mxu0 }
 0xb35   :  { %v6801_v48 = vpop.f32.mrb[105].mxu0 }
 0xb36   :  { %7417 = vmatpush1.bf16.msra.mxu1 %v7416_v17  ;;  %v5644_v17 = vld [vmem:[%s11047_s13 + $0x80] sm:$0xff] }
 0xb37   :  { %7425 = vmatprep.subr.bf16.mxu1 %v7424_v32  ;;  %v5645_v32 = vld [vmem:[%s11047_s13 + $0x88] sm:$0xff] }
 0xb38   :  { %v7495_v55 = vpack.c.bf16 %v5645_v32, %v5644_v17 }
 0xb39   :  { %6340 = vmatmul.mubr.msk.f32.vlgmr.msra.gmra.mrb[190].mxu1 %vm5119_vm10, %v4999_v11  ;;  %v7452_v11 = vpack.c.bf16 %v6368_v0, %v6366_v54 }
 0xb3a   :  { %7427 = vmatpush1.bf16.msra.mxu1 %v7426_v25  ;;  %5431 = vmatprep.mubr.f32.mxu1 %v11133_v26 }
 0xb3b   :  { %7429 = vmatprep.subr.bf16.mxu1 %v7428_v24  ;;  %7496 = vmatpush1.bf16.msra.mxu0 %v7495_v55 }
 0xb3c   :  { %5698 = vmatprep.subr.mxu0 %v11133_v26 }
 0xb3e   :  { %7431 = vmatpush1.bf16.msra.mxu1 %v7430_v41 }
 0xb3f   :  { %7433 = vmatprep.subr.bf16.mxu1 %v7432_v28  ;;  %6388 = vmatpush1.msk.msra.mxu0 %vm5658_vm11, %v5646_v22 }
 0xb42   :  { %7435 = vmatpush1.bf16.msra.mxu1 %v7434_v10 }
 0xb43   :  { %7437 = vmatprep.subr.bf16.mxu1 %v7436_v42 }
 0xb46   :  { %7439 = vmatpush1.bf16.msra.mxu1 %v7438_v49 }
 0xb47   :  { %7441 = vmatprep.subr.bf16.mxu1 %v7440_v34 }
 0xb4a   :  { %7443 = vmatpush1.bf16.msra.mxu1 %v7442_v39 }
 0xb4b   :  { %7451 = vmatprep.subr.bf16.mxu1 %v7450_v15 }
 0xb4d   :  { %6363 = vmatmul.mubr.msk.f32.vlgmr.msra.gmra.mrb[190].mxu1 %vm5119_vm10, %v10867_v18  ;;  %v6380_v18 = vld [vmem:[%s11045_s11 + $0x250] sm:$0xff] }
 0xb4e   :  { %7453 = vmatpush1.bf16.msra.mxu1 %v7452_v11  ;;  %5603 = vmatprep.mubr.f32.mxu1 %v11133_v26  ;;  %v7464_v46 = vpack.c.bf16 %v6380_v18, %v6378_v51 }
 0xb4f   :  { %7455 = vmatprep.subr.bf16.mxu1 %v7454_v58 }
 0xb52   :  { %7457 = vmatpush1.bf16.msra.mxu1 %v7456_v4 }
 0xb53   :  { %7459 = vmatprep.subr.bf16.mxu1 %v7458_v33 }
 0xb56   :  { %7461 = vmatpush1.bf16.msra.mxu1 %v7460_v13 }
 0xb57   :  { %7463 = vmatprep.subr.bf16.mxu1 %v7462_v52 }
 0xb5a   :  { %7465 = vmatpush1.bf16.msra.mxu1 %v7464_v46 }
 0xb5b   :  { %7467 = vmatprep.subr.bf16.mxu1 %v7466_v1 }
 0xb5e   :  { %7469 = vmatpush1.bf16.msra.mxu1 %v7468_v16 }
 0xb61   :  { %6386 = vmatmul.mubr.msk.f32.vlgmr.msra.gmra.mrb[190].mxu1 %vm5119_vm10, %v10893_v47  ;;  %v5621_v47 = vrot.slane %v5612_v44, %v8728_v45 }
 0xc34   :  { %v5605_v48 = vpop.f32.mrb[190].mxu1 }
 0xc35   :  { %v5624_v25 = vadd.f32 %v5617_v27, %v5605_v48  ;;  %v5607_v24 = vpop.f32.mrb[191].mxu1 }
 0xc36   :  { %v5625_v57 = vadd.f32 %v5621_v47, %v5607_v24 }
 0xc37   :  { %v5626_v62 = vmax.f32 %v5624_v25, 0.0 }
 0xc38   :  { %v5627_v26 = vmax.f32 %v5625_v57, 0.0 }
 0xc3a   :  { %6389 = vmatprep.mubr.msk.f32.mxu0 %vm5654_vm12, %v5627_v26 }
 0xc3b   :  { %5727 = vmatmul.mubr.f32.vlgmr.msra.gmra.mrb[106].mxu0 %v5626_v62 }
 0xd0e   :  { %v5728_v23 = vpop.f32.mrb[106].mxu0 }
 0xd0f   :  { %v5729_v43 = vadd.f32 %v6387_v5, %v5728_v23  ;;  %v5730_v41 = vpop.f32.mrb[107].mxu0 }
 0xd11   :  { %5733 = vst.msk [vmem:[#allocation2] sm:$0xff] %vm5732_vm13, %v5729_v43 }
 0xd12   :  { %7775 = shalt.err (!%p7772_p4)
}
 0xd13   :  { %s7776_s7 = scalar_lea.hbm %s11049_s15, 128 }
 0xd14   :  { %p7777_p5 = scmp.ne.s32.totalorder %s11049_s15, %s7776_s7  ;;  %p7780_p6 = scmp.lt.u32.totalorder %s7776_s7, %s11049_s15 }
 0xd16   :  { %p7782_p7 = pnand %p7780_p6, %p7777_p5 }
 0xd18   :  { %7785 = shalt.err (!%p7782_p7)
}
 0xd19   :  { %5743 = dma.vmem_to_hbm [thread:$0]  %s5741_s10, 128, %s11049_s15, [#allocation3]  }
 0xd1a   :  { %7786 = dma.done.wait [#allocation3], 128  }
 0xd1b   :  { %7787 = vsyncadd [#allocation3], 4294967168 }
 0xd1c   :  { %5747 = vsyncpa [#allocation3], 1 }

</bundles_post_ra>
